<compile_context>
chip_gen: v5e
topology: v5e:2x2
jax: 0.10.0
libtpu: 0.0.40
codegen_flags: <defaults>
</compile_context>

<pallas_src>
import math

import jax
import jax.numpy as jnp
from jax import lax
from jax.experimental import pallas as pl
from jax.experimental.pallas import tpu as pltpu

NEG_SLOPE = 0.2
ACT_SCALE = math.sqrt(2.0)
EPS = 1e-8
# bf16 MXU operands with f32 accumulation (~3x MXU throughput on v6e/v7x, halves
# weight/operand footprint).  Set False for tighter numerics.
USE_BF16_MXU = True


def _round_up(x, m):
    return (x + m - 1) // m * m


def _make_kernel(Wp, Cin, Cout, K, q_rows):
    """q_rows = TH*Wp output rows per grid step (padded-width flattened grid)."""

    def kernel(style_ref, x_ref, noise_ref, wmod_ref, bmod_ref,
               wconv_ref, bact_ref, o_ref):
        # ---- EqualLinear modulation: (n_rows, D) @ (D, Cin) + bias ----
        s = jnp.dot(style_ref[0, 0], wmod_ref[...],
                    preferred_element_type=jnp.float32) + bmod_ref[...]
        # ---- normalize_2nd_moment over channels (spatial-style demod path) ----
        s = s * lax.rsqrt(jnp.mean(s * s, axis=-1, keepdims=True) + EPS)
        # ---- modulate the input (channel-minor layout: no relayout needed) ----
        xm = x_ref[0, 0] * s
        if USE_BF16_MXU:
            xm = xm.astype(jnp.bfloat16)

        # ---- tap-accumulated conv: K*K matmuls with Cin contraction ----
        # Output q = h*Wp + w (w in [0, W) valid, [W, Wp) halo garbage, dropped
        # in the wrapper).  Tap (dy,dx) source row = q + dy*Wp + dx, so every
        # tap operand is a contiguous sublane slice (no im2col patch matrix).
        acc = jnp.zeros((q_rows, Cout), jnp.float32)
        for dy in range(K):
            for dx in range(K):
                off = dy * Wp + dx
                t_idx = dy * K + dx
                acc = acc + jnp.dot(
                    xm[off:off + q_rows, :],
                    wconv_ref[t_idx * Cin:(t_idx + 1) * Cin, :],
                    preferred_element_type=jnp.float32)

        # ---- NoiseInjection (noise pre-scaled in wrapper) + FusedLeakyReLU ----
        out = acc + noise_ref[0, 0] + bact_ref[...]
        out = jnp.where(out >= 0.0, out, NEG_SLOPE * out) * ACT_SCALE
        o_ref[0, 0] = out.astype(o_ref.dtype)

    return kernel


def spatial_styled_conv(x, style, noise, params, *, tile_rows=None):
    """Forward of SpatialStyledConv (spatial_style=True, demodulate=True,
    upsample=False).  x: [B,Cin,H,W], style: [B,D,Hs,Ws], noise: [B,1,H,W].
    Returns float32 [B,Cout,H,W]."""
    B, Cin, H, W = x.shape
    Cout, _, K, _ = params["conv_weight"].shape
    D = params["mod_weight"].shape[1]
    P = K // 2
    Wp = W + 2 * P

    if tile_rows is None:
        tile_rows = next(t for t in (16, 8, 4, 2, 1) if H % t == 0)
    assert H % tile_rows == 0
    TH = tile_rows
    n_t = H // TH
    R = TH + 2 * P                            # window rows per tile (with halo)
    q_rows = TH * Wp                          # output rows per tile
    n_rows = _round_up(R * Wp + 2 * P, 8)     # window rows incl. slice-overrun tail

    conv_scale = 1.0 / math.sqrt(Cin * K * K)
    mod_scale = 1.0 / math.sqrt(D)
    op_dtype = jnp.bfloat16 if USE_BF16_MXU else jnp.float32

    # ---------- wrapper-side glue (all relayouts kept out of the kernel) ----------
    # F.interpolate(style, (H, W), mode='bilinear', align_corners=False)
    style_r = jax.image.resize(style.astype(jnp.float32), (B, D, H, W),
                               method="bilinear")
    style_hwd = jnp.transpose(style_r, (0, 2, 3, 1))              # (B,H,W,D)
    x_hwc = jnp.transpose(x.astype(jnp.float32), (0, 2, 3, 1))    # (B,H,W,Cin)

    def window(a):
        """(B,H,W,C) -> (B, n_t, n_rows, C): zero-pad H/W by P, cut overlapping
        (TH+2P)-row halo windows, flatten (row, col) onto the sublane axis."""
        a = jnp.pad(a, ((0, 0), (P, P), (P, P), (0, 0)))
        idx = jnp.arange(n_t)[:, None] * TH + jnp.arange(R)[None, :]
        a = jnp.take(a, idx, axis=1)                              # (B,n_t,R,Wp,C)
        a = a.reshape(B, n_t, R * Wp, a.shape[-1])
        return jnp.pad(a, ((0, 0), (0, 0), (0, n_rows - R * Wp), (0, 0)))

    x_win = window(x_hwc)                                         # f32
    style_win = window(style_hwd).astype(op_dtype)

    # noise, pre-scaled by the NoiseInjection weight, on the padded-width grid
    noise_q = (params["noise_weight"].reshape(()).astype(jnp.float32)
               * noise.astype(jnp.float32).reshape(B, H, W))
    noise_q = jnp.pad(noise_q, ((0, 0), (0, 0), (0, 2 * P))).reshape(B, n_t, q_rows, 1)

    # ---------- grid-invariant parameter prep (hoisted out of the kernel) ----------
    wmod_t = (mod_scale * params["mod_weight"]).T.astype(op_dtype)        # (D,Cin)
    bmod = params["mod_bias"].reshape(1, Cin).astype(jnp.float32)
    w = conv_scale * params["conv_weight"].astype(jnp.float32)            # (Cout,Cin,K,K)
    demod = lax.rsqrt(jnp.sum(w * w, axis=(1, 2, 3)) + EPS)               # style-independent
    w = w * demod[:, None, None, None]
    wconv = jnp.transpose(w, (2, 3, 1, 0)).reshape(K * K * Cin, Cout).astype(op_dtype)
    bact = params["act_bias"].reshape(1, Cout).astype(jnp.float32)

    kernel = _make_kernel(Wp, Cin, Cout, K, q_rows)

    # per-step VMEM budget (double-buffered streams + params + temporaries), 2x headroom
    itm = 2 if USE_BF16_MXU else 4
    stream = n_rows * (Cin * 4 + D * itm) + q_rows * (4 + Cout * 4)
    param = D * Cin * itm + K * K * Cin * Cout * itm + (Cin + Cout) * 4
    temp = n_rows * Cin * (4 + itm) + n_rows * D * itm + q_rows * Cout * 4
    vmem_limit = int(min(64 << 20, max(16 << 20,
                                       2 * (2 * stream + 2 * param + 2 * temp))))

    def _param_spec(shape, single_buffered):
        if single_buffered:
            # grid-invariant weights: no need for 2-deep pipeline buffers
            return pl.BlockSpec(shape, lambda b, t: (0,) * len(shape),
                                pipeline_mode=pl.Buffered(1))
        return pl.BlockSpec(shape, lambda b, t: (0,) * len(shape))

    def _build(single_buffered):
        return pl.pallas_call(
            kernel,
            out_shape=jax.ShapeDtypeStruct((B, n_t, q_rows, Cout), jnp.float32),
            grid=(B, n_t),
            in_specs=[
                pl.BlockSpec((1, 1, n_rows, D), lambda b, t: (b, t, 0, 0)),
                pl.BlockSpec((1, 1, n_rows, Cin), lambda b, t: (b, t, 0, 0)),
                pl.BlockSpec((1, 1, q_rows, 1), lambda b, t: (b, t, 0, 0)),
                _param_spec((D, Cin), single_buffered),
                _param_spec((1, Cin), single_buffered),
                _param_spec((K * K * Cin, Cout), single_buffered),
                _param_spec((1, Cout), single_buffered),
            ],
            out_specs=pl.BlockSpec((1, 1, q_rows, Cout), lambda b, t: (b, t, 0, 0)),
            compiler_params=pltpu.CompilerParams(
                dimension_semantics=("parallel", "parallel"),
                vmem_limit_bytes=vmem_limit),
        )

    operands = (style_win, x_win, noise_q, wmod_t, bmod, wconv, bact)
    try:
        out_q = jax.block_until_ready(_build(True)(*operands))
    except Exception:
        # pl.Buffered(1) (single-buffered invariant weights) not supported by
        # this jax version -> fall back to default double-buffered param blocks.
        out_q = _build(False)(*operands)

    # drop the padded-width halo columns, back to NCHW (free XLA layout plumbing)
    out = out_q.reshape(B, n_t, TH, Wp, Cout)[:, :, :, :W, :]
    out = out.reshape(B, H, W, Cout)
    return jnp.transpose(out, (0, 3, 1, 2))


def reference(x, style, noise, params):
    """Pure-JAX reference of the same forward (f32, highest precision)."""
    B, Cin, H, W = x.shape
    Cout, _, K, _ = params["conv_weight"].shape
    D = params["mod_weight"].shape[1]
    P = K // 2
    conv_scale = 1.0 / math.sqrt(Cin * K * K)
    mod_scale = 1.0 / math.sqrt(D)
    hp = lax.Precision.HIGHEST

    style_r = jax.image.resize(style.astype(jnp.float32), (B, D, H, W),
                               method="bilinear")
    s = jnp.einsum("bdhw,cd->bchw", style_r, mod_scale * params["mod_weight"],
                   precision=hp) + params["mod_bias"][None, :, None, None]
    s = s * lax.rsqrt(jnp.mean(s * s, axis=1, keepdims=True) + EPS)

    w = conv_scale * params["conv_weight"]
    demod = lax.rsqrt(jnp.sum(w * w, axis=(1, 2, 3)) + EPS)
    w = w * demod[:, None, None, None]

    xm = x.astype(jnp.float32) * s
    out = lax.conv_general_dilated(xm, w, (1, 1), [(P, P), (P, P)],
                                   dimension_numbers=("NCHW", "OIHW", "NCHW"),
                                   precision=hp)
    out = out + params["noise_weight"][0] * noise
    out = out + params["act_bias"][None, :, None, None]
    out = jnp.where(out >= 0.0, out, NEG_SLOPE * out) * ACT_SCALE
    return out


if __name__ == "__main__":
    B, Cin, Cout, D, H, W, K = 2, 8, 16, 32, 16, 16, 3

    key = jax.random.PRNGKey(0)
    k0, k1, k2, k3, k4 = jax.random.split(key, 5)

    x = jax.random.normal(k0, (B, Cin, H, W), jnp.float32)
    style = jax.random.normal(k1, (B, D, 8, 8), jnp.float32)      # spatial style map
    noise = jax.random.normal(k2, (B, 1, H, W), jnp.float32)

    params = dict(
        # SpatialModulatedConv2d.weight: randn(1, out, in, k, k) (squeezed here)
        conv_weight=jax.random.normal(k3, (Cout, Cin, K, K), jnp.float32),
        # EqualLinear(style_dim, in_channel, bias_init=1), lr_mul=1
        mod_weight=jax.random.normal(k4, (Cin, D), jnp.float32),
        mod_bias=jnp.ones((Cin,), jnp.float32),
        # FusedLeakyReLU bias init = 0
        act_bias=jnp.zeros((Cout,), jnp.float32),
        # NoiseInjection weight init is 0; use 0.1 here so the path is exercised
        noise_weight=jnp.full((1,), 0.1, jnp.float32),
    )

    # tile_rows=8 -> 2 H-tiles per image: exercises the halo-window stitching
    out = spatial_styled_conv(x, style, noise, params, tile_rows=8)
    out = jax.block_until_ready(out)
    assert out.shape == (B, Cout, H, W) and out.dtype == jnp.float32

    ref = reference(x, style, noise, params)
    err = float(jnp.max(jnp.abs(out - ref)))
    # bf16 MXU operands (f32 accumulation) vs an f32-highest reference: expect
    # ~1e-2-level max abs error (per perf-review guidance, loosened tolerance).
    tol = 5e-2 if USE_BF16_MXU else 1e-2
    assert jnp.allclose(out, ref, atol=tol, rtol=tol), f"max abs err = {err}"

    print("KERNEL_OK")
</pallas_src>

<mosaic_0001>
module attributes {stable_mosaic.version = 11 : i64} {
  func.func @kernel(%arg0: i32, %arg1: i32, %arg2: memref<1x1x184x32xbf16, #tpu.memory_space<vmem>>, %arg3: memref<1x1x184x8xf32, #tpu.memory_space<vmem>>, %arg4: memref<1x1x144x1xf32, #tpu.memory_space<vmem>>, %arg5: memref<32x8xbf16, #tpu.memory_space<vmem>>, %arg6: memref<1x8xf32, #tpu.memory_space<vmem>>, %arg7: memref<72x16xbf16, #tpu.memory_space<vmem>>, %arg8: memref<1x16xf32, #tpu.memory_space<vmem>>, %arg9: memref<1x1x144x16xf32, #tpu.memory_space<vmem>>) attributes {dimension_semantics = [#tpu.dimension_semantics<parallel>, #tpu.dimension_semantics<parallel>], iteration_bounds = array<i64: 2, 2>, scalar_prefetch = 0 : i64, scratch_operands = 0 : i64, tpu.core_type = #tpu.core_type<tc>, window_params = [{transform_indices = @transform_0, window_bounds = array<i64: 1, 1, 184, 32>}, {transform_indices = @transform_1, window_bounds = array<i64: 1, 1, 184, 8>}, {transform_indices = @transform_2, window_bounds = array<i64: 1, 1, 144, 1>}, {pipeline_mode = #tpu.pipeline_mode<synchronous>, transform_indices = @transform_3, window_bounds = array<i64: 32, 8>}, {pipeline_mode = #tpu.pipeline_mode<synchronous>, transform_indices = @transform_4, window_bounds = array<i64: 1, 8>}, {pipeline_mode = #tpu.pipeline_mode<synchronous>, transform_indices = @transform_5, window_bounds = array<i64: 72, 16>}, {pipeline_mode = #tpu.pipeline_mode<synchronous>, transform_indices = @transform_6, window_bounds = array<i64: 1, 16>}, {transform_indices = @transform_7, window_bounds = array<i64: 1, 1, 144, 16>}]} {
    %c0 = arith.constant 0 : index
    %c0_0 = arith.constant 0 : index
    %c0_1 = arith.constant 0 : index
    %c0_2 = arith.constant 0 : index
    %0 = vector.load %arg2[%c0, %c0_0, %c0_1, %c0_2] : memref<1x1x184x32xbf16, #tpu.memory_space<vmem>>, vector<1x1x184x32xbf16>
    %1 = vector.shape_cast %0 : vector<1x1x184x32xbf16> to vector<184x32xbf16>
    %c0_3 = arith.constant 0 : index
    %c0_4 = arith.constant 0 : index
    %2 = vector.load %arg5[%c0_3, %c0_4] : memref<32x8xbf16, #tpu.memory_space<vmem>>, vector<32x8xbf16>
    %cst = arith.constant dense<0.000000e+00> : vector<184x8xf32>
    %3 = tpu.matmul %1, %2, %cst {dimension_numbers = #tpu.dot_dimension_numbers<[1], [0], [0], [1], [0, 0, 1, 1], [], []>} : vector<184x32xbf16>, vector<32x8xbf16>, vector<184x8xf32> -> vector<184x8xf32>
    %c0_5 = arith.constant 0 : index
    %c0_6 = arith.constant 0 : index
    %4 = vector.load %arg6[%c0_5, %c0_6] : memref<1x8xf32, #tpu.memory_space<vmem>>, vector<1x8xf32>
    %5 = vector.broadcast %4 : vector<1x8xf32> to vector<184x8xf32>
    %6 = arith.addf %3, %5 : vector<184x8xf32>
    %7 = arith.mulf %6, %6 : vector<184x8xf32>
    %cst_7 = arith.constant dense<0.000000e+00> : vector<184xf32>
    %8 = vector.multi_reduction <add>, %7, %cst_7 [1] : vector<184x8xf32> to vector<184xf32>
    %9 = vector.shape_cast %8 : vector<184xf32> to vector<184x1xf32>
    %cst_8 = arith.constant 8.000000e+00 : f32
    %10 = vector.broadcast %cst_8 : f32 to vector<184x1xf32>
    %11 = arith.divf %9, %10 : vector<184x1xf32>
    %cst_9 = arith.constant 9.99999993E-9 : f32
    %12 = vector.broadcast %cst_9 : f32 to vector<184x1xf32>
    %13 = arith.addf %11, %12 : vector<184x1xf32>
    %14 = math.rsqrt %13 : vector<184x1xf32>
    %15 = vector.broadcast %14 : vector<184x1xf32> to vector<184x8xf32>
    %16 = arith.mulf %6, %15 : vector<184x8xf32>
    %c0_10 = arith.constant 0 : index
    %c0_11 = arith.constant 0 : index
    %c0_12 = arith.constant 0 : index
    %c0_13 = arith.constant 0 : index
    %17 = vector.load %arg3[%c0_10, %c0_11, %c0_12, %c0_13] : memref<1x1x184x8xf32, #tpu.memory_space<vmem>>, vector<1x1x184x8xf32>
    %18 = vector.shape_cast %17 : vector<1x1x184x8xf32> to vector<184x8xf32>
    %19 = arith.mulf %18, %16 : vector<184x8xf32>
    %20 = arith.truncf %19 : vector<184x8xf32> to vector<184x8xbf16>
    %cst_14 = arith.constant 0.000000e+00 : f32
    %21 = vector.broadcast %cst_14 : f32 to vector<144x16xf32>
    %22 = vector.extract_strided_slice %20 {offsets = [0, 0], sizes = [144, 8], strides = [1, 1]} : vector<184x8xbf16> to vector<144x8xbf16>
    %c0_15 = arith.constant 0 : index
    %c0_16 = arith.constant 0 : index
    %23 = vector.load %arg7[%c0_15, %c0_16] : memref<72x16xbf16, #tpu.memory_space<vmem>>, vector<8x16xbf16>
    %cst_17 = arith.constant dense<0.000000e+00> : vector<144x16xf32>
    %24 = tpu.matmul %22, %23, %cst_17 {dimension_numbers = #tpu.dot_dimension_numbers<[1], [0], [0], [1], [0, 0, 1, 1], [], []>} : vector<144x8xbf16>, vector<8x16xbf16>, vector<144x16xf32> -> vector<144x16xf32>
    %25 = arith.addf %21, %24 : vector<144x16xf32>
    %26 = vector.extract_strided_slice %20 {offsets = [1, 0], sizes = [144, 8], strides = [1, 1]} : vector<184x8xbf16> to vector<144x8xbf16>
    %c8 = arith.constant 8 : index
    %c0_18 = arith.constant 0 : index
    %27 = vector.load %arg7[%c8, %c0_18] : memref<72x16xbf16, #tpu.memory_space<vmem>>, vector<8x16xbf16>
    %cst_19 = arith.constant dense<0.000000e+00> : vector<144x16xf32>
    %28 = tpu.matmul %26, %27, %cst_19 {dimension_numbers = #tpu.dot_dimension_numbers<[1], [0], [0], [1], [0, 0, 1, 1], [], []>} : vector<144x8xbf16>, vector<8x16xbf16>, vector<144x16xf32> -> vector<144x16xf32>
    %29 = arith.addf %25, %28 : vector<144x16xf32>
    %30 = vector.extract_strided_slice %20 {offsets = [2, 0], sizes = [144, 8], strides = [1, 1]} : vector<184x8xbf16> to vector<144x8xbf16>
    %c16 = arith.constant 16 : index
    %c0_20 = arith.constant 0 : index
    %31 = vector.load %arg7[%c16, %c0_20] : memref<72x16xbf16, #tpu.memory_space<vmem>>, vector<8x16xbf16>
    %cst_21 = arith.constant dense<0.000000e+00> : vector<144x16xf32>
    %32 = tpu.matmul %30, %31, %cst_21 {dimension_numbers = #tpu.dot_dimension_numbers<[1], [0], [0], [1], [0, 0, 1, 1], [], []>} : vector<144x8xbf16>, vector<8x16xbf16>, vector<144x16xf32> -> vector<144x16xf32>
    %33 = arith.addf %29, %32 : vector<144x16xf32>
    %34 = vector.extract_strided_slice %20 {offsets = [18, 0], sizes = [144, 8], strides = [1, 1]} : vector<184x8xbf16> to vector<144x8xbf16>
    %c24 = arith.constant 24 : index
    %c0_22 = arith.constant 0 : index
    %35 = vector.load %arg7[%c24, %c0_22] : memref<72x16xbf16, #tpu.memory_space<vmem>>, vector<8x16xbf16>
    %cst_23 = arith.constant dense<0.000000e+00> : vector<144x16xf32>
    %36 = tpu.matmul %34, %35, %cst_23 {dimension_numbers = #tpu.dot_dimension_numbers<[1], [0], [0], [1], [0, 0, 1, 1], [], []>} : vector<144x8xbf16>, vector<8x16xbf16>, vector<144x16xf32> -> vector<144x16xf32>
    %37 = arith.addf %33, %36 : vector<144x16xf32>
    %38 = vector.extract_strided_slice %20 {offsets = [19, 0], sizes = [144, 8], strides = [1, 1]} : vector<184x8xbf16> to vector<144x8xbf16>
    %c32 = arith.constant 32 : index
    %c0_24 = arith.constant 0 : index
    %39 = vector.load %arg7[%c32, %c0_24] : memref<72x16xbf16, #tpu.memory_space<vmem>>, vector<8x16xbf16>
    %cst_25 = arith.constant dense<0.000000e+00> : vector<144x16xf32>
    %40 = tpu.matmul %38, %39, %cst_25 {dimension_numbers = #tpu.dot_dimension_numbers<[1], [0], [0], [1], [0, 0, 1, 1], [], []>} : vector<144x8xbf16>, vector<8x16xbf16>, vector<144x16xf32> -> vector<144x16xf32>
    %41 = arith.addf %37, %40 : vector<144x16xf32>
    %42 = vector.extract_strided_slice %20 {offsets = [20, 0], sizes = [144, 8], strides = [1, 1]} : vector<184x8xbf16> to vector<144x8xbf16>
    %c40 = arith.constant 40 : index
    %c0_26 = arith.constant 0 : index
    %43 = vector.load %arg7[%c40, %c0_26] : memref<72x16xbf16, #tpu.memory_space<vmem>>, vector<8x16xbf16>
    %cst_27 = arith.constant dense<0.000000e+00> : vector<144x16xf32>
    %44 = tpu.matmul %42, %43, %cst_27 {dimension_numbers = #tpu.dot_dimension_numbers<[1], [0], [0], [1], [0, 0, 1, 1], [], []>} : vector<144x8xbf16>, vector<8x16xbf16>, vector<144x16xf32> -> vector<144x16xf32>
    %45 = arith.addf %41, %44 : vector<144x16xf32>
    %46 = vector.extract_strided_slice %20 {offsets = [36, 0], sizes = [144, 8], strides = [1, 1]} : vector<184x8xbf16> to vector<144x8xbf16>
    %c48 = arith.constant 48 : index
    %c0_28 = arith.constant 0 : index
    %47 = vector.load %arg7[%c48, %c0_28] : memref<72x16xbf16, #tpu.memory_space<vmem>>, vector<8x16xbf16>
    %cst_29 = arith.constant dense<0.000000e+00> : vector<144x16xf32>
    %48 = tpu.matmul %46, %47, %cst_29 {dimension_numbers = #tpu.dot_dimension_numbers<[1], [0], [0], [1], [0, 0, 1, 1], [], []>} : vector<144x8xbf16>, vector<8x16xbf16>, vector<144x16xf32> -> vector<144x16xf32>
    %49 = arith.addf %45, %48 : vector<144x16xf32>
    %50 = vector.extract_strided_slice %20 {offsets = [37, 0], sizes = [144, 8], strides = [1, 1]} : vector<184x8xbf16> to vector<144x8xbf16>
    %c56 = arith.constant 56 : index
    %c0_30 = arith.constant 0 : index
    %51 = vector.load %arg7[%c56, %c0_30] : memref<72x16xbf16, #tpu.memory_space<vmem>>, vector<8x16xbf16>
    %cst_31 = arith.constant dense<0.000000e+00> : vector<144x16xf32>
    %52 = tpu.matmul %50, %51, %cst_31 {dimension_numbers = #tpu.dot_dimension_numbers<[1], [0], [0], [1], [0, 0, 1, 1], [], []>} : vector<144x8xbf16>, vector<8x16xbf16>, vector<144x16xf32> -> vector<144x16xf32>
    %53 = arith.addf %49, %52 : vector<144x16xf32>
    %54 = vector.extract_strided_slice %20 {offsets = [38, 0], sizes = [144, 8], strides = [1, 1]} : vector<184x8xbf16> to vector<144x8xbf16>
    %c64 = arith.constant 64 : index
    %c0_32 = arith.constant 0 : index
    %55 = vector.load %arg7[%c64, %c0_32] : memref<72x16xbf16, #tpu.memory_space<vmem>>, vector<8x16xbf16>
    %cst_33 = arith.constant dense<0.000000e+00> : vector<144x16xf32>
    %56 = tpu.matmul %54, %55, %cst_33 {dimension_numbers = #tpu.dot_dimension_numbers<[1], [0], [0], [1], [0, 0, 1, 1], [], []>} : vector<144x8xbf16>, vector<8x16xbf16>, vector<144x16xf32> -> vector<144x16xf32>
    %57 = arith.addf %53, %56 : vector<144x16xf32>
    %c0_34 = arith.constant 0 : index
    %c0_35 = arith.constant 0 : index
    %c0_36 = arith.constant 0 : index
    %c0_37 = arith.constant 0 : index
    %58 = vector.load %arg4[%c0_34, %c0_35, %c0_36, %c0_37] : memref<1x1x144x1xf32, #tpu.memory_space<vmem>>, vector<1x1x144x1xf32>
    %59 = vector.shape_cast %58 : vector<1x1x144x1xf32> to vector<144x1xf32>
    %60 = vector.broadcast %59 : vector<144x1xf32> to vector<144x16xf32>
    %61 = arith.addf %57, %60 : vector<144x16xf32>
    %c0_38 = arith.constant 0 : index
    %c0_39 = arith.constant 0 : index
    %62 = vector.load %arg8[%c0_38, %c0_39] : memref<1x16xf32, #tpu.memory_space<vmem>>, vector<1x16xf32>
    %63 = vector.broadcast %62 : vector<1x16xf32> to vector<144x16xf32>
    %64 = arith.addf %61, %63 : vector<144x16xf32>
    %cst_40 = arith.constant 0.000000e+00 : f32
    %65 = vector.broadcast %cst_40 : f32 to vector<144x16xf32>
    %66 = arith.cmpf oge, %64, %65 : vector<144x16xf32>
    %cst_41 = arith.constant 2.000000e-01 : f32
    %67 = vector.broadcast %cst_41 : f32 to vector<144x16xf32>
    %68 = arith.mulf %67, %64 : vector<144x16xf32>
    %69 = arith.select %66, %64, %68 : vector<144x16xi1>, vector<144x16xf32>
    %cst_42 = arith.constant 1.41421354 : f32
    %70 = vector.broadcast %cst_42 : f32 to vector<144x16xf32>
    %71 = arith.mulf %69, %70 : vector<144x16xf32>
    %c0_43 = arith.constant 0 : index
    %c0_44 = arith.constant 0 : index
    %c0_45 = arith.constant 0 : index
    %c0_46 = arith.constant 0 : index
    %72 = vector.load %arg9[%c0_43, %c0_44, %c0_45, %c0_46] : memref<1x1x144x16xf32, #tpu.memory_space<vmem>>, vector<1x1x144x16xf32>
    %73 = vector.shape_cast %72 : vector<1x1x144x16xf32> to vector<144x16xf32>
    %74 = vector.shape_cast %71 : vector<144x16xf32> to vector<1x1x144x16xf32>
    tpu.vector_store %arg9[%c0_43, %c0_44, %c0_45, %c0_46], %74 {strides = array<i32>} : memref<1x1x144x16xf32, #tpu.memory_space<vmem>>, vector<1x1x144x16xf32>,
    return
  }
  func.func @transform_0(%arg0: i32, %arg1: i32) -> (i32, i32, i32, i32) {
    %c0_i32 = arith.constant 0 : i32
    %c0_i32_0 = arith.constant 0 : i32
    %c0_i32_1 = arith.constant 0 : i32
    return %arg0, %arg1, %c0_i32, %c0_i32_0 : i32, i32, i32, i32
  }
  func.func @transform_1(%arg0: i32, %arg1: i32) -> (i32, i32, i32, i32) {
    %c0_i32 = arith.constant 0 : i32
    %c0_i32_0 = arith.constant 0 : i32
    %c0_i32_1 = arith.constant 0 : i32
    return %arg0, %arg1, %c0_i32, %c0_i32_0 : i32, i32, i32, i32
  }
  func.func @transform_2(%arg0: i32, %arg1: i32) -> (i32, i32, i32, i32) {
    %c0_i32 = arith.constant 0 : i32
    %c0_i32_0 = arith.constant 0 : i32
    %c0_i32_1 = arith.constant 0 : i32
    return %arg0, %arg1, %c0_i32, %c0_i32_0 : i32, i32, i32, i32
  }
  func.func @transform_3(%arg0: i32, %arg1: i32) -> (i32, i32) {
    %c0_i32 = arith.constant 0 : i32
    %c0_i32_0 = arith.constant 0 : i32
    %c0_i32_1 = arith.constant 0 : i32
    return %c0_i32, %c0_i32_0 : i32, i32
  }
  func.func @transform_4(%arg0: i32, %arg1: i32) -> (i32, i32) {
    %c0_i32 = arith.constant 0 : i32
    %c0_i32_0 = arith.constant 0 : i32
    %c0_i32_1 = arith.constant 0 : i32
    return %c0_i32, %c0_i32_0 : i32, i32
  }
  func.func @transform_5(%arg0: i32, %arg1: i32) -> (i32, i32) {
    %c0_i32 = arith.constant 0 : i32
    %c0_i32_0 = arith.constant 0 : i32
    %c0_i32_1 = arith.constant 0 : i32
    return %c0_i32, %c0_i32_0 : i32, i32
  }
  func.func @transform_6(%arg0: i32, %arg1: i32) -> (i32, i32) {
    %c0_i32 = arith.constant 0 : i32
    %c0_i32_0 = arith.constant 0 : i32
    %c0_i32_1 = arith.constant 0 : i32
    return %c0_i32, %c0_i32_0 : i32, i32
  }
  func.func @transform_7(%arg0: i32, %arg1: i32) -> (i32, i32, i32, i32) {
    %c0_i32 = arith.constant 0 : i32
    %c0_i32_0 = arith.constant 0 : i32
    %c0_i32_1 = arith.constant 0 : i32
    return %arg0, %arg1, %c0_i32, %c0_i32_0 : i32, i32, i32, i32
  }
}

module attributes {stable_mosaic.version = 11 : i64} {
  func.func @kernel(%arg0: i32, %arg1: i32, %arg2: memref<1x1x184x32xbf16, #tpu.memory_space<vmem>>, %arg3: memref<1x1x184x8xf32, #tpu.memory_space<vmem>>, %arg4: memref<1x1x144x1xf32, #tpu.memory_space<vmem>>, %arg5: memref<32x8xbf16, #tpu.memory_space<vmem>>, %arg6: memref<1x8xf32, #tpu.memory_space<vmem>>, %arg7: memref<72x16xbf16, #tpu.memory_space<vmem>>, %arg8: memref<1x16xf32, #tpu.memory_space<vmem>>, %arg9: memref<1x1x144x16xf32, #tpu.memory_space<vmem>>) attributes {dimension_semantics = [#tpu.dimension_semantics<parallel>, #tpu.dimension_semantics<parallel>], iteration_bounds = array<i64: 2, 2>, scalar_prefetch = 0 : i64, scratch_operands = 0 : i64, tpu.core_type = #tpu.core_type<tc>, window_params = [{transform_indices = @transform_0, window_bounds = array<i64: 1, 1, 184, 32>}, {transform_indices = @transform_1, window_bounds = array<i64: 1, 1, 184, 8>}, {transform_indices = @transform_2, window_bounds = array<i64: 1, 1, 144, 1>}, {pipeline_mode = #tpu.pipeline_mode<synchronous>, transform_indices = @transform_3, window_bounds = array<i64: 32, 8>}, {pipeline_mode = #tpu.pipeline_mode<synchronous>, transform_indices = @transform_4, window_bounds = array<i64: 1, 8>}, {pipeline_mode = #tpu.pipeline_mode<synchronous>, transform_indices = @transform_5, window_bounds = array<i64: 72, 16>}, {pipeline_mode = #tpu.pipeline_mode<synchronous>, transform_indices = @transform_6, window_bounds = array<i64: 1, 16>}, {transform_indices = @transform_7, window_bounds = array<i64: 1, 1, 144, 16>}]} {
    %c0 = arith.constant 0 : index
    %c0_0 = arith.constant 0 : index
    %c0_1 = arith.constant 0 : index
    %c0_2 = arith.constant 0 : index
    %0 = vector.load %arg2[%c0, %c0_0, %c0_1, %c0_2] : memref<1x1x184x32xbf16, #tpu.memory_space<vmem>>, vector<1x1x184x32xbf16>
    %1 = vector.shape_cast %0 : vector<1x1x184x32xbf16> to vector<184x32xbf16>
    %c0_3 = arith.constant 0 : index
    %c0_4 = arith.constant 0 : index
    %2 = vector.load %arg5[%c0_3, %c0_4] : memref<32x8xbf16, #tpu.memory_space<vmem>>, vector<32x8xbf16>
    %cst = arith.constant dense<0.000000e+00> : vector<184x8xf32>
    %3 = tpu.matmul %1, %2, %cst {dimension_numbers = #tpu.dot_dimension_numbers<[1], [0], [0], [1], [0, 0, 1, 1], [], []>} : vector<184x32xbf16>, vector<32x8xbf16>, vector<184x8xf32> -> vector<184x8xf32>
    %c0_5 = arith.constant 0 : index
    %c0_6 = arith.constant 0 : index
    %4 = vector.load %arg6[%c0_5, %c0_6] : memref<1x8xf32, #tpu.memory_space<vmem>>, vector<1x8xf32>
    %5 = vector.broadcast %4 : vector<1x8xf32> to vector<184x8xf32>
    %6 = arith.addf %3, %5 : vector<184x8xf32>
    %7 = arith.mulf %6, %6 : vector<184x8xf32>
    %cst_7 = arith.constant dense<0.000000e+00> : vector<184xf32>
    %8 = vector.multi_reduction <add>, %7, %cst_7 [1] : vector<184x8xf32> to vector<184xf32>
    %9 = vector.shape_cast %8 : vector<184xf32> to vector<184x1xf32>
    %cst_8 = arith.constant 8.000000e+00 : f32
    %10 = vector.broadcast %cst_8 : f32 to vector<184x1xf32>
    %11 = arith.divf %9, %10 : vector<184x1xf32>
    %cst_9 = arith.constant 9.99999993E-9 : f32
    %12 = vector.broadcast %cst_9 : f32 to vector<184x1xf32>
    %13 = arith.addf %11, %12 : vector<184x1xf32>
    %14 = math.rsqrt %13 : vector<184x1xf32>
    %15 = vector.broadcast %14 : vector<184x1xf32> to vector<184x8xf32>
    %16 = arith.mulf %6, %15 : vector<184x8xf32>
    %c0_10 = arith.constant 0 : index
    %c0_11 = arith.constant 0 : index
    %c0_12 = arith.constant 0 : index
    %c0_13 = arith.constant 0 : index
    %17 = vector.load %arg3[%c0_10, %c0_11, %c0_12, %c0_13] : memref<1x1x184x8xf32, #tpu.memory_space<vmem>>, vector<1x1x184x8xf32>
    %18 = vector.shape_cast %17 : vector<1x1x184x8xf32> to vector<184x8xf32>
    %19 = arith.mulf %18, %16 : vector<184x8xf32>
    %20 = arith.truncf %19 : vector<184x8xf32> to vector<184x8xbf16>
    %cst_14 = arith.constant 0.000000e+00 : f32
    %21 = vector.broadcast %cst_14 : f32 to vector<144x16xf32>
    %22 = vector.extract_strided_slice %20 {offsets = [0, 0], sizes = [144, 8], strides = [1, 1]} : vector<184x8xbf16> to vector<144x8xbf16>
    %c0_15 = arith.constant 0 : index
    %c0_16 = arith.constant 0 : index
    %23 = vector.load %arg7[%c0_15, %c0_16] : memref<72x16xbf16, #tpu.memory_space<vmem>>, vector<8x16xbf16>
    %cst_17 = arith.constant dense<0.000000e+00> : vector<144x16xf32>
    %24 = tpu.matmul %22, %23, %cst_17 {dimension_numbers = #tpu.dot_dimension_numbers<[1], [0], [0], [1], [0, 0, 1, 1], [], []>} : vector<144x8xbf16>, vector<8x16xbf16>, vector<144x16xf32> -> vector<144x16xf32>
    %25 = arith.addf %21, %24 : vector<144x16xf32>
    %26 = vector.extract_strided_slice %20 {offsets = [1, 0], sizes = [144, 8], strides = [1, 1]} : vector<184x8xbf16> to vector<144x8xbf16>
    %c8 = arith.constant 8 : index
    %c0_18 = arith.constant 0 : index
    %27 = vector.load %arg7[%c8, %c0_18] : memref<72x16xbf16, #tpu.memory_space<vmem>>, vector<8x16xbf16>
    %cst_19 = arith.constant dense<0.000000e+00> : vector<144x16xf32>
    %28 = tpu.matmul %26, %27, %cst_19 {dimension_numbers = #tpu.dot_dimension_numbers<[1], [0], [0], [1], [0, 0, 1, 1], [], []>} : vector<144x8xbf16>, vector<8x16xbf16>, vector<144x16xf32> -> vector<144x16xf32>
    %29 = arith.addf %25, %28 : vector<144x16xf32>
    %30 = vector.extract_strided_slice %20 {offsets = [2, 0], sizes = [144, 8], strides = [1, 1]} : vector<184x8xbf16> to vector<144x8xbf16>
    %c16 = arith.constant 16 : index
    %c0_20 = arith.constant 0 : index
    %31 = vector.load %arg7[%c16, %c0_20] : memref<72x16xbf16, #tpu.memory_space<vmem>>, vector<8x16xbf16>
    %cst_21 = arith.constant dense<0.000000e+00> : vector<144x16xf32>
    %32 = tpu.matmul %30, %31, %cst_21 {dimension_numbers = #tpu.dot_dimension_numbers<[1], [0], [0], [1], [0, 0, 1, 1], [], []>} : vector<144x8xbf16>, vector<8x16xbf16>, vector<144x16xf32> -> vector<144x16xf32>
    %33 = arith.addf %29, %32 : vector<144x16xf32>
    %34 = vector.extract_strided_slice %20 {offsets = [18, 0], sizes = [144, 8], strides = [1, 1]} : vector<184x8xbf16> to vector<144x8xbf16>
    %c24 = arith.constant 24 : index
    %c0_22 = arith.constant 0 : index
    %35 = vector.load %arg7[%c24, %c0_22] : memref<72x16xbf16, #tpu.memory_space<vmem>>, vector<8x16xbf16>
    %cst_23 = arith.constant dense<0.000000e+00> : vector<144x16xf32>
    %36 = tpu.matmul %34, %35, %cst_23 {dimension_numbers = #tpu.dot_dimension_numbers<[1], [0], [0], [1], [0, 0, 1, 1], [], []>} : vector<144x8xbf16>, vector<8x16xbf16>, vector<144x16xf32> -> vector<144x16xf32>
    %37 = arith.addf %33, %36 : vector<144x16xf32>
    %38 = vector.extract_strided_slice %20 {offsets = [19, 0], sizes = [144, 8], strides = [1, 1]} : vector<184x8xbf16> to vector<144x8xbf16>
    %c32 = arith.constant 32 : index
    %c0_24 = arith.constant 0 : index
    %39 = vector.load %arg7[%c32, %c0_24] : memref<72x16xbf16, #tpu.memory_space<vmem>>, vector<8x16xbf16>
    %cst_25 = arith.constant dense<0.000000e+00> : vector<144x16xf32>
    %40 = tpu.matmul %38, %39, %cst_25 {dimension_numbers = #tpu.dot_dimension_numbers<[1], [0], [0], [1], [0, 0, 1, 1], [], []>} : vector<144x8xbf16>, vector<8x16xbf16>, vector<144x16xf32> -> vector<144x16xf32>
    %41 = arith.addf %37, %40 : vector<144x16xf32>
    %42 = vector.extract_strided_slice %20 {offsets = [20, 0], sizes = [144, 8], strides = [1, 1]} : vector<184x8xbf16> to vector<144x8xbf16>
    %c40 = arith.constant 40 : index
    %c0_26 = arith.constant 0 : index
    %43 = vector.load %arg7[%c40, %c0_26] : memref<72x16xbf16, #tpu.memory_space<vmem>>, vector<8x16xbf16>
    %cst_27 = arith.constant dense<0.000000e+00> : vector<144x16xf32>
    %44 = tpu.matmul %42, %43, %cst_27 {dimension_numbers = #tpu.dot_dimension_numbers<[1], [0], [0], [1], [0, 0, 1, 1], [], []>} : vector<144x8xbf16>, vector<8x16xbf16>, vector<144x16xf32> -> vector<144x16xf32>
    %45 = arith.addf %41, %44 : vector<144x16xf32>
    %46 = vector.extract_strided_slice %20 {offsets = [36, 0], sizes = [144, 8], strides = [1, 1]} : vector<184x8xbf16> to vector<144x8xbf16>
    %c48 = arith.constant 48 : index
    %c0_28 = arith.constant 0 : index
    %47 = vector.load %arg7[%c48, %c0_28] : memref<72x16xbf16, #tpu.memory_space<vmem>>, vector<8x16xbf16>
    %cst_29 = arith.constant dense<0.000000e+00> : vector<144x16xf32>
    %48 = tpu.matmul %46, %47, %cst_29 {dimension_numbers = #tpu.dot_dimension_numbers<[1], [0], [0], [1], [0, 0, 1, 1], [], []>} : vector<144x8xbf16>, vector<8x16xbf16>, vector<144x16xf32> -> vector<144x16xf32>
    %49 = arith.addf %45, %48 : vector<144x16xf32>
    %50 = vector.extract_strided_slice %20 {offsets = [37, 0], sizes = [144, 8], strides = [1, 1]} : vector<184x8xbf16> to vector<144x8xbf16>
    %c56 = arith.constant 56 : index
    %c0_30 = arith.constant 0 : index
    %51 = vector.load %arg7[%c56, %c0_30] : memref<72x16xbf16, #tpu.memory_space<vmem>>, vector<8x16xbf16>
    %cst_31 = arith.constant dense<0.000000e+00> : vector<144x16xf32>
    %52 = tpu.matmul %50, %51, %cst_31 {dimension_numbers = #tpu.dot_dimension_numbers<[1], [0], [0], [1], [0, 0, 1, 1], [], []>} : vector<144x8xbf16>, vector<8x16xbf16>, vector<144x16xf32> -> vector<144x16xf32>
    %53 = arith.addf %49, %52 : vector<144x16xf32>
    %54 = vector.extract_strided_slice %20 {offsets = [38, 0], sizes = [144, 8], strides = [1, 1]} : vector<184x8xbf16> to vector<144x8xbf16>
    %c64 = arith.constant 64 : index
    %c0_32 = arith.constant 0 : index
    %55 = vector.load %arg7[%c64, %c0_32] : memref<72x16xbf16, #tpu.memory_space<vmem>>, vector<8x16xbf16>
    %cst_33 = arith.constant dense<0.000000e+00> : vector<144x16xf32>
    %56 = tpu.matmul %54, %55, %cst_33 {dimension_numbers = #tpu.dot_dimension_numbers<[1], [0], [0], [1], [0, 0, 1, 1], [], []>} : vector<144x8xbf16>, vector<8x16xbf16>, vector<144x16xf32> -> vector<144x16xf32>
    %57 = arith.addf %53, %56 : vector<144x16xf32>
    %c0_34 = arith.constant 0 : index
    %c0_35 = arith.constant 0 : index
    %c0_36 = arith.constant 0 : index
    %c0_37 = arith.constant 0 : index
    %58 = vector.load %arg4[%c0_34, %c0_35, %c0_36, %c0_37] : memref<1x1x144x1xf32, #tpu.memory_space<vmem>>, vector<1x1x144x1xf32>
    %59 = vector.shape_cast %58 : vector<1x1x144x1xf32> to vector<144x1xf32>
    %60 = vector.broadcast %59 : vector<144x1xf32> to vector<144x16xf32>
    %61 = arith.addf %57, %60 : vector<144x16xf32>
    %c0_38 = arith.constant 0 : index
    %c0_39 = arith.constant 0 : index
    %62 = vector.load %arg8[%c0_38, %c0_39] : memref<1x16xf32, #tpu.memory_space<vmem>>, vector<1x16xf32>
    %63 = vector.broadcast %62 : vector<1x16xf32> to vector<144x16xf32>
    %64 = arith.addf %61, %63 : vector<144x16xf32>
    %cst_40 = arith.constant 0.000000e+00 : f32
    %65 = vector.broadcast %cst_40 : f32 to vector<144x16xf32>
    %66 = arith.cmpf oge, %64, %65 : vector<144x16xf32>
    %cst_41 = arith.constant 2.000000e-01 : f32
    %67 = vector.broadcast %cst_41 : f32 to vector<144x16xf32>
    %68 = arith.mulf %67, %64 : vector<144x16xf32>
    %69 = arith.select %66, %64, %68 : vector<144x16xi1>, vector<144x16xf32>
    %cst_42 = arith.constant 1.41421354 : f32
    %70 = vector.broadcast %cst_42 : f32 to vector<144x16xf32>
    %71 = arith.mulf %69, %70 : vector<144x16xf32>
    %c0_43 = arith.constant 0 : index
    %c0_44 = arith.constant 0 : index
    %c0_45 = arith.constant 0 : index
    %c0_46 = arith.constant 0 : index
    %72 = vector.load %arg9[%c0_43, %c0_44, %c0_45, %c0_46] : memref<1x1x144x16xf32, #tpu.memory_space<vmem>>, vector<1x1x144x16xf32>
    %73 = vector.shape_cast %72 : vector<1x1x144x16xf32> to vector<144x16xf32>
    %74 = vector.shape_cast %71 : vector<144x16xf32> to vector<1x1x144x16xf32>
    tpu.vector_store %arg9[%c0_43, %c0_44, %c0_45, %c0_46], %74 {strides = array<i32>} : memref<1x1x144x16xf32, #tpu.memory_space<vmem>>, vector<1x1x144x16xf32>,
    return
  }
  func.func @transform_0(%arg0: i32, %arg1: i32) -> (i32, i32, i32, i32) {
    %c0_i32 = arith.constant 0 : i32
    %c0_i32_0 = arith.constant 0 : i32
    %c0_i32_1 = arith.constant 0 : i32
    return %arg0, %arg1, %c0_i32, %c0_i32_0 : i32, i32, i32, i32
  }
  func.func @transform_1(%arg0: i32, %arg1: i32) -> (i32, i32, i32, i32) {
    %c0_i32 = arith.constant 0 : i32
    %c0_i32_0 = arith.constant 0 : i32
    %c0_i32_1 = arith.constant 0 : i32
    return %arg0, %arg1, %c0_i32, %c0_i32_0 : i32, i32, i32, i32
  }
  func.func @transform_2(%arg0: i32, %arg1: i32) -> (i32, i32, i32, i32) {
    %c0_i32 = arith.constant 0 : i32
    %c0_i32_0 = arith.constant 0 : i32
    %c0_i32_1 = arith.constant 0 : i32
    return %arg0, %arg1, %c0_i32, %c0_i32_0 : i32, i32, i32, i32
  }
  func.func @transform_3(%arg0: i32, %arg1: i32) -> (i32, i32) {
    %c0_i32 = arith.constant 0 : i32
    %c0_i32_0 = arith.constant 0 : i32
    %c0_i32_1 = arith.constant 0 : i32
    return %c0_i32, %c0_i32_0 : i32, i32
  }
  func.func @transform_4(%arg0: i32, %arg1: i32) -> (i32, i32) {
    %c0_i32 = arith.constant 0 : i32
    %c0_i32_0 = arith.constant 0 : i32
    %c0_i32_1 = arith.constant 0 : i32
    return %c0_i32, %c0_i32_0 : i32, i32
  }
  func.func @transform_5(%arg0: i32, %arg1: i32) -> (i32, i32) {
    %c0_i32 = arith.constant 0 : i32
    %c0_i32_0 = arith.constant 0 : i32
    %c0_i32_1 = arith.constant 0 : i32
    return %c0_i32, %c0_i32_0 : i32, i32
  }
  func.func @transform_6(%arg0: i32, %arg1: i32) -> (i32, i32) {
    %c0_i32 = arith.constant 0 : i32
    %c0_i32_0 = arith.constant 0 : i32
    %c0_i32_1 = arith.constant 0 : i32
    return %c0_i32, %c0_i32_0 : i32, i32
  }
  func.func @transform_7(%arg0: i32, %arg1: i32) -> (i32, i32, i32, i32) {
    %c0_i32 = arith.constant 0 : i32
    %c0_i32_0 = arith.constant 0 : i32
    %c0_i32_1 = arith.constant 0 : i32
    return %arg0, %arg1, %c0_i32, %c0_i32_0 : i32, i32, i32, i32
  }
}

</mosaic_0001>

<bundles_post_ra>
// kernel: tpu_custom_call.1
= control target key start
LH: loop header
LB: loop body
LE: loop exit
PB: predicated region body
PF: predicated region fallthrough
CT: control target
= control target key end

     0   :  { %s2932_s24 = smov 0   ;;  %s2934_s25 = smov 0   ;;  %s4477_s0 = inlined_call_operand.vmem [shape: bf16[2,2,184,32], index: 0, kind: input, shape index: {}]   ;;  %s4478_s1 = inlined_call_operand.vmem [shape: f32[2,2,184,8], index: 1, kind: input, shape index: {}]   ;;  %s4479_s2 = inlined_call_operand.vmem [shape: f32[2,2,144,1], index: 2, kind: input, shape index: {}]   ;;  %s4480_s3 = inlined_call_operand.vmem [shape: bf16[32,8], index: 3, kind: input, shape index: {}]   ;;  %s4481_s4 = inlined_call_operand.vmem [shape: f32[1,8], index: 4, kind: input, shape index: {}]   ;;  %s4482_s5 = inlined_call_operand.vmem [shape: bf16[72,16], index: 5, kind: input, shape index: {}]   ;;  %s4483_s6 = inlined_call_operand.vmem [shape: f32[1,16], index: 6, kind: input, shape index: {}]   ;;  %s4484_s7 = inlined_call_operand.vmem [shape: f32[2,2,144,16], index: 7, kind: output, shape index: {}]  }
   0x1   :  { %s2936_s26 = smov 0   ;;  %s2938_s27 = smov 0  }
   0x2   :  { %s2940_s28 = smov 0  }
   0x3 LB: > { %s26_s29 = sadd.s32 1, %s2880_s26  ;;  %s29_s30 = sadd.s32 1, %s2884_s27  ;;  %s2888_s28 = sphi %s2940_s28, %s17_s28   ;;  %s2884_s27 = sphi %s2938_s27, %s4552_s27   ;;  %s2880_s26 = sphi %s2936_s26, %s4551_s26   ;;  %s2876_s25 = sphi %s2934_s25, %s4550_s25   ;;  %s2872_s24 = sphi %s2932_s24, %s4549_s24  }
   0x4   : > { %p27_p0 = scmp.ge.s32.totalorder %s26_s29, 2  ;;  %p2584_p1 = scmp.ge.s32.totalorder %s2888_s28, 1 }
   0x5   : > { %p289_p2 = scmp.lt.s32.totalorder %s2888_s28, 5 }
   0x6   : > { %s4554_s29 = smov (%p27_p0, %s26_s29), 0  ;;  %s4556_s30 = smov (!%p27_p0, %s29_s30), %s2884_s27 }
   0x7   : > { %p290_p3 = pnand %p2584_p1, %p289_p2  ;;  %p31_p4 = scmp.ge.s32.totalorder %s4556_s30, 2 }
   0x9   : > { %s4558_s30 = smov (%p31_p4, %s4556_s30), 0  ;;  %293 = sbr.rel (%p290_p3) target bundleno = 970 (0x3ca), region = 48 }
   0xe   : > { %v2748_v0 = vld [vmem:[%s4480_s3 + $0x8] sm:$0xff]  ;;  %p347_p5 = scmp.lt.s32.totalorder %s2876_s25, 1  ;;  %p349_p6 = scmp.lt.s32.totalorder %s2872_s24, 1  ;;  %v2747_v1 = vld [vmem:[%s4480_s3] sm:$0xff]  ;;  %vm485_vm0 = vcmask 261120   ;;  %vm613_vm1 = vcmask 64512  }
   0xf   : > { %528 = vmatpush.bf16.msra.mxu0 %v2748_v0  ;;  %v3001_v10 = vld [vmem:[%s4481_s4] ss:$0 sm:$0xff]  ;;  %v2890_v35 = vmov 8.0   ;;  %vm1212_vm3 = vcmask 1043456  }
  0x10   : > { %s4560_s25 = smov (!%p347_p5, %s2876_s25), 1  ;;  %s4562_s24 = smov (!%p349_p6, %s2872_s24), 1  ;;  %2802 = vrcp.f32 %v2890_v35 }
  0x11   : > { %s2752_s12 = smul.u32 46, %s4560_s25 }
  0x12   : > { %s2751_s13 = smul.u32 23, %s4562_s24 }
  0x13   : > { %529 = vmatpush.bf16.msra.mxu0 %v2747_v1  ;;  %v1058_v1 = vld [vmem:[%s4482_s5] sm:$0xf] }
  0x14   : > { %s2974_s14 = sadd.s32 %s2752_s12, %s2751_s13  ;;  %s2754_s12 = smul.u32 36, %s4560_s25 }
  0x15   : > { %s2585_s15 = sshll.u32 %s2974_s14, 2  ;;  %s2586_s23 = sshll.u32 %s2974_s14, 3 }
  0x16   : > { %s2980_s18 = scalar_lea.vmem %s4477_s0, %s2585_s15  ;;  %v2803_v39 = vpop.eup %2802  ;;  %s3121_s10 = scalar_lea.vmem %s4478_s1, %s2586_s23 }
  0x17   : > { %v2736_v2 = vld [vmem:[%s2980_s18] sm:$0xff]  ;;  %v2737_v3 = vld [vmem:[%s2980_s18 + $0x8] sm:$0xff]  ;;  %v2738_v4 = vld [vmem:[%s2980_s18 + $0x10] sm:$0xff]  ;;  %v684_v41 = vmul.f32 8.0, %v2803_v39  ;;  %vm688_vm2 = vweird.f32 %v2803_v39 }
  0x18   : > { %2641 = vmatmul.msk.bf16.vlgmr.msra.gmra.mxu0 %vm485_vm0, %v2736_v2  ;;  %v2739_v5 = vld [vmem:[%s2980_s18 + $0x18] sm:$0xff]  ;;  %v2740_v6 = vld [vmem:[%s2980_s18 + $0x20] sm:$0xff]  ;;  %v2741_v7 = vld [vmem:[%s2980_s18 + $0x28] sm:$0xff]  ;;  %v3077_v2 = vsel %vm1212_vm3, %v1058_v1, 0 }
  0x19   : > { %v2742_v8 = vld [vmem:[%s2980_s18 + $0x30] sm:$0xff]  ;;  %v2743_v9 = vld [vmem:[%s2980_s18 + $0x38] sm:$0xff]  ;;  %v2744_v11 = vld [vmem:[%s2980_s18 + $0x40] sm:$0xff]  ;;  %v685_v45 = vsub.f32 1.0, %v684_v41  ;;  %1298 = vmatpush.bf16.msra.mxu2 %v3077_v2 }
  0x1a   : > { %v2745_v20 = vld [vmem:[%s2980_s18 + $0x48] sm:$0xff]  ;;  %v2746_v23 = vld [vmem:[%s2980_s18 + $0x50] sm:$0xff]  ;;  %v406_v26 = vld [vmem:[%s2980_s18 + $0x58] sm:$0xf] }
  0x1b   : > { %v460_v27 = vunpack.c.l.b16 %v406_v26  ;;  %v686_v48 = vmul.f32 %v2803_v39, %v685_v45 }
  0x1d   : > { %v472_v29 = vpack.c.b16 %v460_v27, %v460_v27  ;;  %v687_v53 = vadd.f32 %v2803_v39, %v686_v48 }
  0x1f   : > { %v3061_v56 = vsel %vm688_vm2, %v2803_v39, %v687_v53  ;;  %v989_v53 = vld [vmem:[%s3121_s10] sm:$0xff] }
  0x28   : > { %2642 = vmatmul.msk.bf16.gmra.mxu0 %vm485_vm0, %v2737_v3 }
  0x38   : > { %2643 = vmatmul.msk.bf16.gmra.mxu0 %vm485_vm0, %v2738_v4 }
  0x48   : > { %2644 = vmatmul.msk.bf16.gmra.mxu0 %vm485_vm0, %v2739_v5 }
  0x58   : > { %2645 = vmatmul.msk.bf16.gmra.mxu0 %vm485_vm0, %v2740_v6 }
  0x68   : > { %2646 = vmatmul.msk.bf16.gmra.mxu0 %vm485_vm0, %v2741_v7 }
  0x78   : > { %2647 = vmatmul.msk.bf16.gmra.mxu0 %vm485_vm0, %v2742_v8 }
  0x88   : > { %2648 = vmatmul.msk.bf16.gmra.mxu0 %vm485_vm0, %v2743_v9 }
  0x95   : > { %v531_v12 = vpop.f32.mrf.mxu0 }
  0x96   : > { %v3005_v13 = vadd.f32 %v3001_v10, %v531_v12 }
  0x98   : > { %2649 = vmatmul.msk.bf16.gmra.mxu0 %vm485_vm0, %v2744_v11  ;;  %v590_v14 = vmul.f32 %v3005_v13, %v3005_v13 }
  0x9a   : > { %v614_v15 = vsel %vm613_vm1, %v590_v14, 0.0 }
  0x9b   : > { %615 = vadd.xlane.f32.xlu2 %v614_v15 }
  0x9d   : > { %v533_v16 = vpop.f32.mrf.mxu0 }
  0x9e   : > { %v3012_v17 = vadd.f32 %v3001_v10, %v533_v16 }
  0xa0   : > { %v591_v18 = vmul.f32 %v3012_v17, %v3012_v17 }
  0xa2   : > { %v617_v19 = vsel %vm613_vm1, %v591_v18, 0.0 }
  0xa3   : > { %618 = vadd.xlane.f32.xlu2 %v617_v19 }
  0xa5   : > { %v536_v21 = vpop.f32.mrf.mxu0 }
  0xa6   : > { %v3049_v46 = vadd.f32 %v3001_v10, %v536_v21 }
  0xa8   : > { %2650 = vmatmul.msk.bf16.gmra.mxu0 %vm485_vm0, %v2745_v20  ;;  %v592_v51 = vmul.f32 %v3049_v46, %v3049_v46 }
  0xaa   : > { %v620_v55 = vsel %vm613_vm1, %v592_v51, 0.0 }
  0xad   : > { %v538_v22 = vpop.f32.mrf.mxu0 }
  0xae   : > { %v3070_v63 = vadd.f32 %v3001_v10, %v538_v22 }
  0xb0   : > { %v593_v6 = vmul.f32 %v3070_v63, %v3070_v63 }
  0xb2   : > { %v623_v15 = vsel %vm613_vm1, %v593_v6, 0.0 }
  0xb5   : > { %v541_v24 = vpop.f32.mrf.mxu0 }
  0xb6   : > { %v3089_v11 = vadd.f32 %v3001_v10, %v541_v24 }
  0xb8   : > { %2651 = vmatmul.msk.bf16.gmra.mxu0 %vm485_vm0, %v2746_v23  ;;  %v594_v21 = vmul.f32 %v3089_v11, %v3089_v11 }
  0xba   : > { %v626_v35 = vsel %vm613_vm1, %v594_v21, 0.0 }
  0xbd   : > { %v3021_v25 = vpop.f32.mrf.mxu0 }
  0xbe   : > { %v3095_v18 = vadd.f32 %v3001_v10, %v3021_v25 }
  0xc0   : > { %v595_v24 = vmul.f32 %v3095_v18, %v3095_v18 }
  0xc2   : > { %v629_v41 = vsel %vm613_vm1, %v595_v24, 0.0 }
  0xc5   : > { %v3024_v28 = vpop.f32.mrf.mxu0 }
  0xc8   : > { %2652 = vmatmul.msk.bf16.gmra.mxu0 %vm485_vm0, %v472_v29  ;;  %v3108_v29 = vadd.f32 %v3001_v10, %v3024_v28 }
  0xca   : > { %v596_v45 = vmul.f32 %v3108_v29, %v3108_v29 }
  0xcd   : > { %v3027_v30 = vpop.f32.mrf.mxu0 }
  0xd5   : > { %v3029_v31 = vpop.f32.mrf.mxu0 }
  0xdd   : > { %v3031_v32 = vpop.f32.mrf.mxu0 }
  0xe5   : > { %v3033_v33 = vpop.f32.mrf.mxu0 }
  0xed   : > { %v3035_v34 = vpop.f32.mrf.mxu0 }
  0xf5   : > { %v561_v36 = vpop.f32.mrf.mxu0 }
  0xf6   : > { %v3038_v37 = vadd.f32 %v3001_v10, %v561_v36 }
  0xf8   : > { %v602_v38 = vmul.f32 %v3038_v37, %v3038_v37 }
  0xfa   : > { %v650_v40 = vsel %vm613_vm1, %v602_v38, 0.0 }
  0xfb   : > { %651 = vadd.xlane.f32.xlu0 %v650_v40  ;;  %v3115_v40 = vadd.f32 %v3001_v10, %v3027_v30 }
  0xfd   : > { %v563_v42 = vpop.f32.mrf.mxu0 }
  0xfe   : > { %v3044_v43 = vadd.f32 %v3001_v10, %v563_v42 }
 0x100   : > { %v603_v44 = vmul.f32 %v3044_v43, %v3044_v43 }
 0x102   : > { %v653_v47 = vsel %vm613_vm1, %v603_v44, 0.0 }
 0x103   : > { %654 = vadd.xlane.f32.xlu0 %v653_v47 }
 0x105   : > { %v566_v49 = vpop.f32.mrf.mxu0 }
 0x106   : > { %v3053_v50 = vadd.f32 %v3001_v10, %v566_v49  ;;  %v597_v49 = vmul.f32 %v3115_v40, %v3115_v40 }
 0x108   : > { %v604_v52 = vmul.f32 %v3053_v50, %v3053_v50 }
 0x10a   : > { %v656_v54 = vsel %vm613_vm1, %v604_v52, 0.0 }
 0x10b   : > { %657 = vadd.xlane.f32.xlu1 %v656_v54  ;;  %621 = vadd.xlane.f32.xlu0 %v620_v55  ;;  %v3136_v54 = vadd.f32 %v3001_v10, %v3029_v31  ;;  %v632_v55 = vsel %vm613_vm1, %v596_v45, 0.0  ;;  %v635_v31 = vsel %vm613_vm1, %v597_v49, 0.0 }
 0x10d   : > { %v568_v57 = vpop.f32.mrf.mxu0 }
 0x10e   : > { %v3064_v58 = vadd.f32 %v3001_v10, %v568_v57  ;;  %v616_v59 = vpop.xlane.xlu2 %615  ;;  %v3141_v57 = vadd.f32 %v3001_v10, %v3031_v32 }
 0x10f   : > { %v690_v60 = vmul.f32 %v3061_v56, %v616_v59 }
 0x110   : > { %v605_v61 = vmul.f32 %v3064_v58, %v3064_v58 }
 0x111   : > { %v713_v62 = vadd.f32 1e-08, %v690_v60  ;;  %v3146_v60 = vadd.f32 %v3001_v10, %v3033_v33 }
 0x112   : > { %v659_v0 = vsel %vm613_vm1, %v605_v61, 0.0 }
 0x113   : > { %2804 = vrsqrt.f32 %v713_v62  ;;  %660 = vadd.xlane.f32.xlu1 %v659_v0  ;;  %vm742_vm5 = vweird.f32 %v713_v62  ;;  %v990_v0 = vld [vmem:[%s3121_s10 + $0x8] sm:$0xff]  ;;  %v600_v33 = vmul.f32 %v3146_v60, %v3146_v60 }
 0x115   : > { %v571_v3 = vpop.f32.mrf.mxu0 }
 0x116   : > { %v3081_v4 = vadd.f32 %v3001_v10, %v571_v3  ;;  %v619_v5 = vpop.xlane.xlu2 %618  ;;  %v599_v3 = vmul.f32 %v3141_v57, %v3141_v57 }
 0x117   : > { %v691_v7 = vmul.f32 %v3061_v56, %v619_v5  ;;  %v598_v5 = vmul.f32 %v3136_v54, %v3136_v54 }
 0x118   : > { %v606_v8 = vmul.f32 %v3081_v4, %v3081_v4 }
 0x119   : > { %v2805_v9 = vpop.eup %2804  ;;  %v714_v12 = vadd.f32 1e-08, %v691_v7 }
 0x11a   : > { %v737_v14 = vmul.f32 %v2805_v9, %v713_v62  ;;  %v662_v16 = vsel %vm613_vm1, %v606_v8, 0.0  ;;  %vm743_vm4 = vweird.f32 %v2805_v9 }
 0x11b   : > { %2806 = vrsqrt.f32 %v714_v12  ;;  %624 = vadd.xlane.f32.xlu1 %v623_v15  ;;  %663 = vadd.xlane.f32.xlu2 %v662_v16  ;;  %vm744_vm6 = vmor %vm742_vm5, %vm743_vm4  ;;  %vm752_vm8 = vweird.f32 %v714_v12  ;;  %v644_v15 = vsel %vm613_vm1, %v600_v33, 0.0 }
 0x11c   : > { %v738_v19 = vmul.f32 %v2805_v9, %v737_v14  ;;  %v638_v14 = vsel %vm613_vm1, %v598_v5, 0.0 }
 0x11d   : > { %v573_v20 = vpop.f32.mrf.mxu0 }
 0x11e   : > { %v739_v22 = vmul.f32 0.5, %v738_v19  ;;  %v3100_v23 = vadd.f32 %v3001_v10, %v573_v20 }
 0x120   : > { %v740_v26 = vsub.f32 1.5, %v739_v22  ;;  %v607_v25 = vmul.f32 %v3100_v23, %v3100_v23 }
 0x121   : > { %v2807_v27 = vpop.eup %2806 }
 0x122   : > { %v741_v36 = vmul.f32 %v2805_v9, %v740_v26  ;;  %v747_v38 = vmul.f32 %v2807_v27, %v714_v12  ;;  %v665_v39 = vsel %vm613_vm1, %v607_v25, 0.0  ;;  %vm753_vm7 = vweird.f32 %v2807_v27 }
 0x123   : > { %627 = vadd.xlane.f32.xlu1 %v626_v35  ;;  %666 = vadd.xlane.f32.xlu0 %v665_v39  ;;  %vm754_vm9 = vmor %vm752_vm8, %vm753_vm7 }
 0x124   : > { %v745_v42 = vsel %vm744_vm6, %v2805_v9, %v741_v36  ;;  %v748_v28 = vmul.f32 %v2807_v27, %v747_v38  ;;  %630 = vadd.xlane.f32.xlu2 %v629_v41  ;;  %v3159_v9 = vadd.f32 %v3001_v10, %v3035_v34 }
 0x125   : > { %v576_v44 = vpop.f32.mrf.mxu0  ;;  %v966_v48 = vmul.f32 %v745_v42, %v3005_v13 }
 0x126   : > { %v749_v30 = vmul.f32 0.5, %v748_v28  ;;  %v3126_v47 = vadd.f32 %v3001_v10, %v576_v44  ;;  %v601_v24 = vmul.f32 %v3159_v9, %v3159_v9 }
 0x127   : > { %v1012_v61 = vmul.f32 %v989_v53, %v966_v48 }
 0x128   : > { %v750_v51 = vsub.f32 1.5, %v749_v30  ;;  %v608_v52 = vmul.f32 %v3126_v47, %v3126_v47 }
 0x129   : > { %v1035_v7 = vpack.c.bf16 %v1012_v61, %v1012_v61 }
 0x12a   : > { %v751_v13 = vmul.f32 %v2807_v27, %v750_v51  ;;  %v668_v59 = vsel %vm613_vm1, %v608_v52, 0.0 }
 0x12b   : > { %633 = vadd.xlane.f32.xlu1 %v632_v55  ;;  %669 = vadd.xlane.f32.xlu0 %v668_v59  ;;  %v1079_v16 = vunpack.c.l.b16 %v1035_v7 }
 0x12c   : > { %v755_v62 = vsel %vm754_vm9, %v2807_v27, %v751_v13  ;;  %636 = vadd.xlane.f32.xlu2 %v635_v31  ;;  %v647_v27 = vsel %vm613_vm1, %v601_v24, 0.0 }
 0x12d   : > { %v967_v32 = vmul.f32 %v755_v62, %v3012_v17  ;;  %v578_v1 = vpop.f32.mrf.mxu0  ;;  %v641_v17 = vsel %vm613_vm1, %v599_v3, 0.0 }
 0x12e   : > { %v3162_v12 = vadd.f32 %v3001_v10, %v578_v1 }
 0x12f   : > { %v1013_v6 = vmul.f32 %v990_v0, %v967_v32 }
 0x130   : > { %v609_v22 = vmul.f32 %v3162_v12, %v3162_v12 }
 0x131   : > { %v1036_v8 = vpack.c.bf16 %v1013_v6, %v1013_v6 }
 0x132   : > { %v671_v25 = vsel %vm613_vm1, %v609_v22, 0.0 }
 0x133   : > { %642 = vadd.xlane.f32.xlu1 %v641_v17  ;;  %639 = vadd.xlane.f32.xlu0 %v638_v14  ;;  %v1080_v19 = vunpack.c.l.b16 %v1036_v8 }
 0x134   : > { %645 = vadd.xlane.f32.xlu2 %v644_v15 }
 0x135   : > { %v581_v20 = vpop.f32.mrf.mxu0  ;;  %v3167_v21 = vpack.c.b16 %v1080_v19, %v1079_v16 }
 0x136   : > { %v3170_v34 = vadd.f32 %v3001_v10, %v581_v20 }
 0x137   : > { %2662 = vmatmul.msk.bf16.vlgmr.msra.gmra.mxu2 %vm613_vm1, %v3167_v21 }
 0x138   : > { %v610_v26 = vmul.f32 %v3170_v34, %v3170_v34 }
 0x13a   : > { %v674_v35 = vsel %vm613_vm1, %v610_v26, 0.0 }
 0x13b   : > { %672 = vadd.xlane.f32.xlu1 %v671_v25  ;;  %648 = vadd.xlane.f32.xlu0 %v647_v27 }
 0x13c   : > { %675 = vadd.xlane.f32.xlu2 %v674_v35 }
 0x13d   : > { %v583_v36 = vpop.f32.mrf.mxu0 }
 0x13e   : > { %v3184_v38 = vadd.f32 %v3001_v10, %v583_v36 }
 0x140   : > { %v611_v39 = vmul.f32 %v3184_v38, %v3184_v38 }
 0x142   : > { %v677_v41 = vsel %vm613_vm1, %v611_v39, 0.0 }
 0x143   : > { %678 = vadd.xlane.f32.xlu0 %v677_v41 }
 0x145   : > { %v586_v42 = vpop.f32.mrf.mxu0 }
 0x146   : > { %v3190_v28 = vadd.f32 %v3001_v10, %v586_v42 }
 0x148   : > { %v612_v44 = vmul.f32 %v3190_v28, %v3190_v28 }
 0x14a   : > { %v680_v45 = vsel %vm613_vm1, %v612_v44, 0.0 }
 0x14b   : > { %681 = vadd.xlane.f32.xlu1 %v680_v45 }
 0x14d   : > { %v588_v30 = vpop.f32.mrf.mxu0 }
 0x16e   : > { %v652_v48 = vpop.xlane.xlu0 %651 }
 0x16f   : > { %v702_v49 = vmul.f32 %v3061_v56, %v652_v48 }
 0x171   : > { %v725_v51 = vadd.f32 1e-08, %v702_v49 }
 0x173   : > { %2808 = vrsqrt.f32 %v725_v51  ;;  %vm862_vm13 = vweird.f32 %v725_v51 }
 0x176   : > { %v655_v52 = vpop.xlane.xlu0 %654 }
 0x177   : > { %v703_v53 = vmul.f32 %v3061_v56, %v655_v52 }
 0x179   : > { %v726_v55 = vadd.f32 1e-08, %v703_v53  ;;  %v2809_v13 = vpop.eup %2808 }
 0x17a   : > { %v857_v62 = vmul.f32 %v2809_v13, %v725_v51  ;;  %vm863_vm10 = vweird.f32 %v2809_v13 }
 0x17b   : > { %2810 = vrsqrt.f32 %v726_v55  ;;  %vm872_vm12 = vweird.f32 %v726_v55  ;;  %vm3230_vm15 = vmor %vm862_vm13, %vm863_vm10 }
 0x17c   : > { %v858_v5 = vmul.f32 %v2809_v13, %v857_v62 }
 0x17e   : > { %v658_v10 = vpop.xlane.xlu1 %657  ;;  %v622_v59 = vpop.xlane.xlu0 %621  ;;  %v859_v8 = vmul.f32 0.5, %v858_v5 }
 0x17f   : > { %v704_v31 = vmul.f32 %v3061_v56, %v658_v10  ;;  %v692_v61 = vmul.f32 %v3061_v56, %v622_v59 }
 0x180   : > { %v860_v20 = vsub.f32 1.5, %v859_v8  ;;  %v1002_v8 = vld [vmem:[%s3121_s10 + $0x68] sm:$0xff] }
 0x181   : > { %v2811_v0 = vpop.eup %2810  ;;  %v3199_v32 = vadd.f32 1e-08, %v704_v31  ;;  %v3201_v1 = vadd.f32 1e-08, %v692_v61 }
 0x182   : > { %v867_v3 = vmul.f32 %v2811_v0, %v726_v55  ;;  %v861_v39 = vmul.f32 %v2809_v13, %v860_v20  ;;  %vm873_vm11 = vweird.f32 %v2811_v0 }
 0x183   : > { %2812 = vrsqrt.f32 %v3199_v32  ;;  %vm874_vm14 = vmor %vm872_vm12, %vm873_vm11  ;;  %vm882_vm2 = vweird.f32 %v3199_v32  ;;  %vm762_vm7 = vweird.f32 %v3201_v1 }
 0x184   : > { %v868_v33 = vmul.f32 %v2811_v0, %v867_v3  ;;  %2814 = vrsqrt.f32 %v3201_v1  ;;  %v865_v55 = vsel %vm3230_vm15, %v2809_v13, %v861_v39  ;;  %v1059_v3 = vld [vmem:[%s4482_s5 + $0x4] sm:$0xf] }
 0x185   : > { %v978_v13 = vmul.f32 %v865_v55, %v3038_v37 }
 0x186   : > { %v661_v6 = vpop.xlane.xlu1 %660  ;;  %v869_v17 = vmul.f32 0.5, %v868_v33 }
 0x187   : > { %v705_v7 = vmul.f32 %v3061_v56, %v661_v6 }
 0x188   : > { %v870_v22 = vsub.f32 1.5, %v869_v17 }
 0x189   : > { %v3206_v14 = vpop.eup %2812  ;;  %v3208_v15 = vadd.f32 1e-08, %v705_v7  ;;  %v1214_v7 = vsel %vm1212_vm3, %v1059_v3, 0 }
 0x18a   : > { %v3210_v16 = vpop.eup %2814  ;;  %v877_v19 = vmul.f32 %v3206_v14, %v3199_v32  ;;  %v871_v41 = vmul.f32 %v2811_v0, %v870_v22  ;;  %vm883_vm0 = vweird.f32 %v3206_v14  ;;  %2749 = vmatpush.bf16.msra.mxu3 %v1214_v7  ;;  %1223 = vmatpush.bf16.msra.mxu1 %v1214_v7  ;;  %v1003_v7 = vld [vmem:[%s3121_s10 + $0x70] sm:$0xff] }
 0x18b   : > { %2816 = vrsqrt.f32 %v3208_v15  ;;  %v757_v26 = vmul.f32 %v3210_v16, %v3201_v1  ;;  %vm3268_vm4 = vmor %vm882_vm2, %vm883_vm0  ;;  %vm763_vm5 = vweird.f32 %v3210_v16  ;;  %vm892_vm9 = vweird.f32 %v3208_v15 }
 0x18c   : > { %v878_v24 = vmul.f32 %v3206_v14, %v877_v19  ;;  %v875_v53 = vsel %vm874_vm14, %v2811_v0, %v871_v41  ;;  %v1001_v19 = vld [vmem:[%s3121_s10 + $0x60] sm:$0xff]  ;;  %vm3289_vm8 = vmor %vm762_vm7, %vm763_vm5  ;;  %v1110_v1 = vshrl.u32 %v3167_v21, 16 }
 0x18d   : > { %v758_v45 = vmul.f32 %v3210_v16, %v757_v26  ;;  %v979_v0 = vmul.f32 %v875_v53, %v3044_v43  ;;  %v1024_v39 = vmul.f32 %v1001_v19, %v978_v13 }
 0x18e   : > { %v625_v25 = vpop.xlane.xlu1 %624  ;;  %v664_v27 = vpop.xlane.xlu2 %663  ;;  %v879_v44 = vmul.f32 0.5, %v878_v24  ;;  %2750 = vmatpush.bf16.msrb.mxu3 %v3077_v2  ;;  %v991_v2 = vld [vmem:[%s3121_s10 + $0x10] sm:$0xff] }
 0x18f   : > { %v693_v35 = vmul.f32 %v3061_v56, %v625_v25  ;;  %v706_v36 = vmul.f32 %v3061_v56, %v664_v27  ;;  %v759_v31 = vmul.f32 0.5, %v758_v45  ;;  %v1047_v3 = vpack.c.bf16 %v1024_v39, %v1024_v39 }
 0x190   : > { %v880_v59 = vsub.f32 1.5, %v879_v44 }
 0x191   : > { %v3220_v42 = vpop.eup %2816  ;;  %v3223_v30 = vadd.f32 1e-08, %v693_v35  ;;  %v3225_v48 = vadd.f32 1e-08, %v706_v36  ;;  %v760_v43 = vsub.f32 1.5, %v759_v31  ;;  %v1025_v35 = vmul.f32 %v1002_v8, %v979_v0 }
 0x192   : > { %v887_v49 = vmul.f32 %v3220_v42, %v3208_v15  ;;  %v881_v20 = vmul.f32 %v3206_v14, %v880_v59  ;;  %vm893_vm6 = vweird.f32 %v3220_v42  ;;  %v1112_v31 = vshll.u32 %v3167_v21, 16 }
 0x193   : > { %2818 = vrsqrt.f32 %v3223_v30  ;;  %v761_v44 = vmul.f32 %v3210_v16, %v760_v43  ;;  %v1048_v55 = vpack.c.bf16 %v1025_v35, %v1025_v35  ;;  %vm3305_vm10 = vmor %vm892_vm9, %vm893_vm6  ;;  %vm772_vm11 = vweird.f32 %v3223_v30 }
 0x194   : > { %v888_v10 = vmul.f32 %v3220_v42, %v887_v49  ;;  %2820 = vrsqrt.f32 %v3225_v48  ;;  %v885_v32 = vsel %vm3268_vm4, %v3206_v14, %v881_v20  ;;  %vm902_vm13 = vweird.f32 %v3225_v48 }
 0x195   : > { %v980_v0 = vmul.f32 %v885_v32, %v3053_v50  ;;  %v1092_v20 = vunpack.c.l.b16 %v1048_v55 }
 0x196   : > { %v889_v51 = vmul.f32 0.5, %v888_v10  ;;  %v628_v61 = vpop.xlane.xlu1 %627  ;;  %v667_v62 = vpop.xlane.xlu0 %666 }
 0x197   : > { %v694_v5 = vmul.f32 %v3061_v56, %v628_v61  ;;  %v707_v33 = vmul.f32 %v3061_v56, %v667_v62  ;;  %v631_v6 = vpop.xlane.xlu2 %630  ;;  %v1026_v39 = vmul.f32 %v1003_v7, %v980_v0 }
 0x198   : > { %v890_v37 = vsub.f32 1.5, %v889_v51  ;;  %v695_v27 = vmul.f32 %v3061_v56, %v631_v6 }
 0x199   : > { %v3248_v17 = vpop.eup %2818  ;;  %v3252_v22 = vadd.f32 1e-08, %v694_v5  ;;  %v3254_v24 = vadd.f32 1e-08, %v707_v33  ;;  %v765_v5 = vsel %vm3289_vm8, %v3210_v16, %v761_v44  ;;  %v1004_v44 = vld [vmem:[%s3121_s10 + $0x78] sm:$0xff] }
 0x19a   : > { %v3257_v26 = vpop.eup %2820  ;;  %v767_v25 = vmul.f32 %v3248_v17, %v3223_v30  ;;  %v891_v45 = vmul.f32 %v3220_v42, %v890_v37  ;;  %v3282_v53 = vadd.f32 1e-08, %v695_v27  ;;  %v3322_v37 = vrot.slane %v1112_v31, 1 }
 0x19b   : > { %v897_v36 = vmul.f32 %v3257_v26, %v3225_v48  ;;  %2822 = vrsqrt.f32 %v3252_v22  ;;  %vm773_vm12 = vweird.f32 %v3248_v17  ;;  %vm903_vm15 = vweird.f32 %v3257_v26 }
 0x19c   : > { %v768_v41 = vmul.f32 %v3248_v17, %v767_v25  ;;  %2824 = vrsqrt.f32 %v3254_v24  ;;  %v895_v13 = vsel %vm3305_vm10, %v3220_v42, %v891_v45  ;;  %v968_v25 = vmul.f32 %v765_v5, %v3049_v46  ;;  %vm3354_vm14 = vmor %vm772_vm11, %vm773_vm12 }
 0x19d   : > { %v898_v52 = vmul.f32 %v3257_v26, %v897_v36  ;;  %2826 = vrsqrt.f32 %v3282_v53  ;;  %v1091_v36 = vunpack.c.l.b16 %v1047_v3  ;;  %vm3383_vm0 = vmor %vm902_vm13, %vm903_vm15  ;;  %vm782_vm5 = vweird.f32 %v3252_v22 }
 0x19e   : > { %v769_v49 = vmul.f32 0.5, %v768_v41  ;;  %v634_v10 = vpop.xlane.xlu1 %633  ;;  %v670_v6 = vpop.xlane.xlu0 %669  ;;  %v981_v41 = vmul.f32 %v895_v13, %v3064_v58  ;;  %v3343_v58 = vmul.f32 %v991_v2, %v968_v25  ;;  %vm912_vm7 = vweird.f32 %v3254_v24 }
 0x19f   : > { %v696_v14 = vmul.f32 %v3061_v56, %v634_v10  ;;  %v637_v59 = vpop.xlane.xlu2 %636  ;;  %v899_v8 = vmul.f32 0.5, %v898_v52  ;;  %v708_v35 = vmul.f32 %v3061_v56, %v670_v6  ;;  %v3338_v10 = vpack.c.b16 %v1092_v20, %v1091_v36 }
 0x1a0   : > { %v697_v61 = vmul.f32 %v3061_v56, %v637_v59  ;;  %v770_v50 = vsub.f32 1.5, %v769_v49  ;;  %v1027_v3 = vmul.f32 %v1004_v44, %v981_v41  ;;  %v1037_v25 = vpack.c.bf16 %v3343_v58, %v3343_v58  ;;  %v992_v41 = vld [vmem:[%s3121_s10 + $0x18] sm:$0xff]  ;;  %v1560_v58 = vld [vmem:[%s4482_s5 + $0x10] sm:$0xf] }
 0x1a1   : > { %v3297_v62 = vpop.eup %2822  ;;  %v3309_v15 = vadd.f32 1e-08, %v696_v14  ;;  %v900_v46 = vsub.f32 1.5, %v899_v8  ;;  %v3346_v31 = vadd.f32 1e-08, %v708_v35  ;;  %v3368_v20 = vshll.u32 %v3338_v10, 16 }
 0x1a2   : > { %v777_v16 = vmul.f32 %v3297_v62, %v3252_v22  ;;  %v3317_v19 = vpop.eup %2824  ;;  %v3320_v43 = vadd.f32 1e-08, %v697_v61  ;;  %v771_v45 = vmul.f32 %v3248_v17, %v770_v50  ;;  %v1049_v61 = vpack.c.bf16 %v1026_v39, %v1026_v39 }
 0x1a3   : > { %2828 = vrsqrt.f32 %v3309_v15  ;;  %v907_v42 = vmul.f32 %v3317_v19, %v3254_v24  ;;  %v3332_v32 = vpop.eup %2826  ;;  %v901_v7 = vmul.f32 %v3257_v26, %v900_v46  ;;  %v1050_v36 = vpack.c.bf16 %v1027_v3, %v1027_v3 }
 0x1a4   : > { %v778_v27 = vmul.f32 %v3297_v62, %v777_v16  ;;  %v787_v14 = vmul.f32 %v3332_v32, %v3282_v53  ;;  %2830 = vrsqrt.f32 %v3320_v43  ;;  %v775_v6 = vsel %vm3354_vm14, %v3248_v17, %v771_v45 }
 0x1a5   : > { %v908_v49 = vmul.f32 %v3317_v19, %v907_v42  ;;  %2832 = vrsqrt.f32 %v3346_v31  ;;  %v1093_v35 = vunpack.c.l.b16 %v1049_v61  ;;  %v969_v39 = vmul.f32 %v775_v6, %v3070_v63 }
 0x1a6   : > { %v643_v52 = vpop.xlane.xlu1 %642  ;;  %v779_v55 = vmul.f32 0.5, %v778_v27  ;;  %v788_v5 = vmul.f32 %v3332_v32, %v787_v14  ;;  %v640_v16 = vpop.xlane.xlu0 %639  ;;  %vm783_vm2 = vweird.f32 %v3297_v62  ;;  %v905_v44 = vsel %vm3383_vm0, %v3257_v26, %v901_v7 }
 0x1a7   : > { %v909_v59 = vmul.f32 0.5, %v908_v49  ;;  %v699_v33 = vmul.f32 %v3061_v56, %v643_v52  ;;  %v698_v63 = vmul.f32 %v3061_v56, %v640_v16  ;;  %vm913_vm4 = vweird.f32 %v3317_v19  ;;  %vm3404_vm6 = vmor %vm782_vm5, %vm783_vm2  ;;  %v646_v3 = vpop.xlane.xlu2 %645 }
 0x1a8   : > { %v780_v30 = vsub.f32 1.5, %v779_v55  ;;  %v789_v8 = vmul.f32 0.5, %v788_v5  ;;  %v1015_v26 = vmul.f32 %v992_v41, %v969_v39  ;;  %vm792_vm8 = vweird.f32 %v3282_v53  ;;  %v1005_v5 = vld [vmem:[%s3121_s10 + $0x80] sm:$0xff]  ;;  %vm3415_vm9 = vmor %vm912_vm7, %vm913_vm4 }
 0x1a9   : > { %v3348_v51 = vpop.eup %2828  ;;  %v910_v50 = vsub.f32 1.5, %v909_v59  ;;  %v3374_v27 = vadd.f32 1e-08, %v699_v33  ;;  %v982_v59 = vmul.f32 %v905_v44, %v3081_v4  ;;  %v1094_v0 = vunpack.c.l.b16 %v1050_v36  ;;  %v1006_v44 = vld [vmem:[%s3121_s10 + $0x88] sm:$0xff] }
 0x1aa   : > { %v797_v13 = vmul.f32 %v3348_v51, %v3309_v15  ;;  %v3376_v42 = vpop.eup %2830  ;;  %v781_v49 = vmul.f32 %v3297_v62, %v780_v30  ;;  %v790_v52 = vsub.f32 1.5, %v789_v8  ;;  %vm793_vm10 = vweird.f32 %v3332_v32  ;;  %v994_v33 = vld [vmem:[%s3121_s10 + $0x28] sm:$0xff] }
 0x1ab   : > { %v807_v46 = vmul.f32 %v3376_v42, %v3320_v43  ;;  %v911_v48 = vmul.f32 %v3317_v19, %v910_v50  ;;  %2834 = vrsqrt.f32 %v3374_v27  ;;  %v3410_v22 = vpop.eup %2832  ;;  %v3420_v6 = vadd.f32 1e-08, %v698_v63  ;;  %vm3445_vm14 = vmor %vm792_vm8, %vm793_vm10 }
 0x1ac   : > { %v798_v17 = vmul.f32 %v3348_v51, %v797_v13  ;;  %v785_v24 = vsel %vm3404_vm6, %v3297_v62, %v781_v49  ;;  %v791_v13 = vmul.f32 %v3332_v32, %v790_v52  ;;  %vm803_vm11 = vweird.f32 %v3348_v51 }
 0x1ad   : > { %v808_v14 = vmul.f32 %v3376_v42, %v807_v46  ;;  %v915_v7 = vsel %vm3415_vm9, %v3317_v19, %v911_v48  ;;  %vm1108_vm12 = vsmask.f32 7424  ;;  %2836 = vrsqrt.f32 %v3420_v6  ;;  %v993_v46 = vld [vmem:[%s3121_s10 + $0x20] sm:$0xff] }
 0x1ae   : > { %v799_v45 = vmul.f32 0.5, %v798_v17  ;;  %v700_v8 = vmul.f32 %v3061_v56, %v646_v3  ;;  %v1038_v16 = vpack.c.bf16 %v1015_v26, %v1015_v26  ;;  %v1028_v62 = vmul.f32 %v1005_v5, %v982_v59 }
 0x1af   : > { %v809_v4 = vmul.f32 0.5, %v808_v14  ;;  %vm802_vm13 = vweird.f32 %v3309_v15  ;;  %v917_v19 = vmul.f32 %v3410_v22, %v3346_v31  ;;  %v3438_v36 = vpack.c.b16 %v1094_v0, %v1093_v35  ;;  %v649_v14 = vpop.xlane.xlu0 %648  ;;  %v673_v0 = vpop.xlane.xlu1 %672 }
 0x1b0   : > { %v800_v55 = vsub.f32 1.5, %v799_v45  ;;  %v983_v39 = vmul.f32 %v915_v7, %v3100_v23  ;;  %vm813_vm15 = vweird.f32 %v3376_v42  ;;  %v970_v15 = vmul.f32 %v785_v24, %v3089_v11  ;;  %vm3458_vm0 = vmor %vm802_vm13, %vm803_vm11 }
 0x1b1   : > { %v810_v50 = vsub.f32 1.5, %v809_v4  ;;  %v3436_v17 = vpop.eup %2834  ;;  %v795_v35 = vsel %vm3445_vm14, %v3332_v32, %v791_v13  ;;  %v4485_v45 = vrot.slane %v3368_v20, 1  ;;  %vm812_vm2 = vweird.f32 %v3320_v43 }
 0x1b2   : > { %v801_v30 = vmul.f32 %v3348_v51, %v800_v55  ;;  %v827_v53 = vmul.f32 %v3436_v17, %v3374_v27  ;;  %v3470_v32 = vadd.f32 1e-08, %v700_v8  ;;  %v3473_v63 = vshrl.u32 %v3338_v10, 16  ;;  %vm3478_vm4 = vmor %vm812_vm2, %vm813_vm15 }
 0x1b3   : > { %v811_v41 = vmul.f32 %v3376_v42, %v810_v50  ;;  %v1082_v49 = vunpack.c.l.b16 %v1038_v16  ;;  %v1051_v48 = vpack.c.bf16 %v1028_v62, %v1028_v62  ;;  %v918_v52 = vmul.f32 %v3410_v22, %v917_v19  ;;  %v3483_v43 = vpop.eup %2836 }
 0x1b4   : > { %v805_v11 = vsel %vm3458_vm0, %v3348_v51, %v801_v30  ;;  %v828_v51 = vmul.f32 %v3436_v17, %v827_v53  ;;  %v1029_v26 = vmul.f32 %v1006_v44, %v983_v39  ;;  %v971_v59 = vmul.f32 %v795_v35, %v3095_v18  ;;  %v995_v30 = vld [vmem:[%s3121_s10 + $0x30] sm:$0xff]  ;;  %v996_v39 = vld [vmem:[%s3121_s10 + $0x38] sm:$0xff] }
 0x1b5   : > { %v815_v61 = vsel %vm3478_vm4, %v3376_v42, %v811_v41  ;;  %v3490_v3 = vshll.u32 %v3438_v36, 16  ;;  %v1016_v5 = vmul.f32 %v993_v46, %v970_v15  ;;  %v972_v4 = vmul.f32 %v805_v11, %v3108_v29  ;;  %v676_v11 = vpop.xlane.xlu2 %675 }
 0x1b6   : > { %v829_v24 = vmul.f32 0.5, %v828_v51  ;;  %v817_v7 = vmul.f32 %v3483_v43, %v3420_v6  ;;  %2838 = vrsqrt.f32 %v3470_v32  ;;  %v1163_v18 = vor.u32 %v3473_v63, %v4485_v45 }
 0x1b7   : > { %v1167_v42 = vrot.slane %v3490_v3, 1  ;;  %v701_v13 = vmul.f32 %v3061_v56, %v649_v14  ;;  %v919_v50 = vmul.f32 0.5, %v918_v52  ;;  %v973_v8 = vmul.f32 %v815_v61, %v3115_v40 }
 0x1b8   : > { %v818_v29 = vmul.f32 %v3483_v43, %v817_v7  ;;  %v709_v16 = vmul.f32 %v3061_v56, %v673_v0  ;;  %v1052_v62 = vpack.c.bf16 %v1029_v26, %v1029_v26  ;;  %v1017_v19 = vmul.f32 %v994_v33, %v971_v59 }
 0x1b9   : > { %v1168_v2 = vsel %vm1108_vm12, %v1163_v18, %v1167_v42  ;;  %v3510_v41 = vadd.f32 1e-08, %v701_v13  ;;  %v1081_v15 = vunpack.c.l.b16 %v1037_v25  ;;  %v830_v44 = vsub.f32 1.5, %v829_v24  ;;  %v1468_v25 = vld [vmem:[%s4482_s5 + $0xc] sm:$0xf] }
 0x1ba   : > { %v819_v35 = vmul.f32 0.5, %v818_v29  ;;  %2659 = vmatmul.msk.bf16.vlgmr.msra.gmra.mxu3 %vm613_vm1, %v1168_v2  ;;  %v1115_v40 = vor.u32 %v3322_v37, %v1110_v1  ;;  %v1095_v23 = vunpack.c.l.b16 %v1051_v48  ;;  %v1039_v53 = vpack.c.bf16 %v1016_v5, %v1016_v5  ;;  %v679_v2 = vpop.xlane.xlu0 %678 }
 0x1bb   : > { %v1018_v46 = vmul.f32 %v995_v30, %v972_v4  ;;  %vm922_vm5 = vweird.f32 %v3346_v31  ;;  %2840 = vrsqrt.f32 %v3510_v41  ;;  %v920_v52 = vsub.f32 1.5, %v919_v50 }
 0x1bc   : > { %v1019_v55 = vmul.f32 %v996_v39, %v973_v8  ;;  %v820_v51 = vsub.f32 1.5, %v819_v35  ;;  %v3527_v1 = vadd.f32 1e-08, %v709_v16  ;;  %v3529_v37 = vpop.eup %2838  ;;  %v1096_v48 = vunpack.c.l.b16 %v1052_v62 }
 0x1bd   : > { %v1040_v14 = vpack.c.bf16 %v1017_v19, %v1017_v19  ;;  %vm833_vm6 = vweird.f32 %v3436_v17  ;;  %v3532_v26 = vpack.c.b16 %v1082_v49, %v1081_v15  ;;  %v831_v59 = vmul.f32 %v3436_v17, %v830_v44 }
 0x1be   : > { %v710_v61 = vmul.f32 %v3061_v56, %v676_v11  ;;  %v1639_v0 = vsel %vm1212_vm3, %v1560_v58, 0  ;;  %v1486_v5 = vsel %vm1212_vm3, %v1468_v25, 0  ;;  %v1041_v33 = vpack.c.bf16 %v1018_v46, %v1018_v46  ;;  %v998_v58 = vld [vmem:[%s3121_s10 + $0x48] sm:$0xff] }
 0x1bf   : > { %v821_v4 = vmul.f32 %v3483_v43, %v820_v51  ;;  %vm823_vm7 = vweird.f32 %v3483_v43  ;;  %2663 = vmatmul.msk.bf16.gmra.mxu2 %vm613_vm1, %v3532_v26  ;;  %v4487_v24 = vshll.u32 %v3532_v26, 16  ;;  %1495 = vmatpush.bf16.msrb.mxu1 %v1486_v5  ;;  %v1042_v49 = vpack.c.bf16 %v1019_v55, %v1019_v55 }
 0x1c0   : > { %vm832_vm8 = vweird.f32 %v3374_v27  ;;  %v837_v7 = vmul.f32 %v3529_v37, %v3470_v32  ;;  %2842 = vrsqrt.f32 %v3527_v1  ;;  %1648 = vmatpush.bf16.msrb.mxu2 %v1639_v0  ;;  %v1083_v13 = vunpack.c.l.b16 %v1039_v53 }
 0x1c1   : > { %v3547_v18 = vpop.eup %2840  ;;  %vm923_vm9 = vweird.f32 %v3410_v22  ;;  %vm3552_vm10 = vmor %vm832_vm8, %vm833_vm6  ;;  %vm822_vm11 = vweird.f32 %v3420_v6  ;;  %v3559_v27 = vrot.slane %v4487_v24, 1  ;;  %v921_v50 = vmul.f32 %v3410_v22, %v920_v52  ;;  %v997_v52 = vld [vmem:[%s3121_s10 + $0x40] sm:$0xff] }
 0x1c2   : > { %v835_v8 = vsel %vm3552_vm10, %v3436_v17, %v831_v59  ;;  %vm3567_vm13 = vmor %vm822_vm11, %vm823_vm7  ;;  %v847_v16 = vmul.f32 %v3547_v18, %v3510_v41  ;;  %v3573_v6 = vadd.f32 1e-08, %v710_v61  ;;  %v3575_v62 = vpack.c.b16 %v1096_v48, %v1095_v23  ;;  %v1836_v23 = vld [vmem:[%s4482_s5 + $0x18] sm:$0xf] }
 0x1c3   : > { %v1084_v19 = vunpack.c.l.b16 %v1040_v14  ;;  %v1085_v39 = vunpack.c.l.b16 %v1041_v33  ;;  %v825_v17 = vsel %vm3567_vm13, %v3483_v43, %v821_v4  ;;  %v1086_v15 = vunpack.c.l.b16 %v1042_v49  ;;  %vm3595_vm14 = vmor %vm922_vm5, %vm923_vm9 }
 0x1c4   : > { %v838_v44 = vmul.f32 %v3529_v37, %v837_v7  ;;  %v848_v35 = vmul.f32 %v3547_v18, %v847_v16  ;;  %v1120_v53 = vsel %vm1108_vm12, %v1115_v40, %v3559_v27  ;;  %v975_v46 = vmul.f32 %v835_v8, %v3141_v57  ;;  %v1007_v16 = vld [vmem:[%s3121_s10 + $0x90] sm:$0xff] }
 0x1c5   : > { %2653 = vmatmul.msk.bf16.vlgmr.msra.gmra.mxu1 %vm613_vm1, %v1120_v53  ;;  %v974_v40 = vmul.f32 %v825_v17, %v3136_v54  ;;  %2844 = vrsqrt.f32 %v3573_v6  ;;  %v711_v25 = vmul.f32 %v3061_v56, %v679_v2  ;;  %v925_v57 = vsel %vm3595_vm14, %v3410_v22, %v921_v50 }
 0x1c6   : > { %v3589_v11 = vpop.eup %2842  ;;  %v849_v55 = vmul.f32 0.5, %v848_v35  ;;  %v3608_v51 = vshll.u32 %v3575_v62, 16  ;;  %v1854_v31 = vsel %vm1212_vm3, %v1836_v23, 0  ;;  %v3611_v48 = vpack.c.b16 %v1084_v19, %v1083_v13 }
 0x1c7   : > { %v3613_v14 = vpack.c.b16 %v1086_v15, %v1085_v39  ;;  %v839_v54 = vmul.f32 0.5, %v838_v44  ;;  %v3616_v59 = vshrl.u32 %v3438_v36, 16  ;;  %1863 = vmatpush.bf16.msrb.mxu0 %v1854_v31  ;;  %v1021_v61 = vmul.f32 %v998_v58, %v975_v46 }
 0x1c8   : > { %v927_v22 = vmul.f32 %v3589_v11, %v3527_v1  ;;  %v1020_v0 = vmul.f32 %v997_v52, %v974_v40  ;;  %v3620_v5 = vadd.f32 1e-08, %v711_v25  ;;  %v1175_v4 = vrot.slane %v3608_v51, 1 }
 0x1c9   : > { %v1171_v33 = vor.u32 %v3616_v59, %v1167_v42  ;;  %v984_v49 = vmul.f32 %v925_v57, %v3126_v47  ;;  %v850_v7 = vsub.f32 1.5, %v849_v55  ;;  %v840_v30 = vsub.f32 1.5, %v839_v54 }
 0x1ca   : > { %v1716_v8 = vrot.slane %v3611_v48, 2  ;;  %v1718_v29 = vrot.slane %v3613_v14, 2  ;;  %v1044_v19 = vpack.c.bf16 %v1021_v61, %v1021_v61  ;;  %v928_v39 = vmul.f32 %v3589_v11, %v927_v22 }
 0x1cb   : > { %v3627_v13 = vpop.eup %2844  ;;  %v1176_v50 = vsel %vm1108_vm12, %v1171_v33, %v1175_v4  ;;  %vm1714_vm15 = vcmask 1045504   ;;  %v1043_v42 = vpack.c.bf16 %v1020_v0, %v1020_v0  ;;  %2846 = vrsqrt.f32 %v3620_v5 }
 0x1cc   : > { %2660 = vmatmul.msk.bf16.gmra.mxu3 %vm613_vm1, %v1176_v50  ;;  %v3641_v47 = vsel %vm1714_vm15, %v1716_v8, %v1718_v29  ;;  %v3644_v17 = vshll.u32 %v3611_v48, 16  ;;  %v851_v2 = vmul.f32 %v3547_v18, %v850_v7  ;;  %vm853_vm0 = vweird.f32 %v3547_v18  ;;  %v999_v50 = vld [vmem:[%s3121_s10 + $0x50] sm:$0xff] }
 0x1cd   : > { %v937_v15 = vmul.f32 %v3627_v13, %v3573_v6  ;;  %2707 = vmatmul.msk.bf16.vlgmr.msrb.gmra.mxu0 %vm613_vm1, %v3641_v47  ;;  %v1030_v44 = vmul.f32 %v1007_v16, %v984_v49  ;;  %v841_v35 = vmul.f32 %v3529_v37, %v840_v30  ;;  %vm843_vm2 = vweird.f32 %v3529_v37 }
 0x1ce   : > { %v4488_v53 = vshrl.u32 %v3532_v26, 16  ;;  %v1127_v23 = vrot.slane %v3644_v17, 1  ;;  %vm842_vm4 = vweird.f32 %v3470_v32  ;;  %vm852_vm5 = vweird.f32 %v3510_v41  ;;  %v1345_v41 = vld [vmem:[%s4482_s5 + $0x8] sm:$0xf] }
 0x1cf   : > { %2664 = vmatmul.msk.bf16.gmra.mxu2 %vm613_vm1, %v3611_v48  ;;  %v1053_v46 = vpack.c.bf16 %v1030_v44, %v1030_v44  ;;  %v1088_v43 = vunpack.c.l.b16 %v1044_v19  ;;  %v1087_v58 = vunpack.c.l.b16 %v1043_v42  ;;  %v929_v40 = vmul.f32 0.5, %v928_v39  ;;  %vm854_vm6 = vmor %vm852_vm5, %vm853_vm0 }
 0x1d0   : > { %v1123_v25 = vor.u32 %v4488_v53, %v3559_v27  ;;  %vm844_vm7 = vmor %vm842_vm4, %vm843_vm2  ;;  %v855_v57 = vsel %vm854_vm6, %v3547_v18, %v851_v2  ;;  %v938_v52 = vmul.f32 %v3627_v13, %v937_v15  ;;  %v1394_v0 = vsel %vm1212_vm3, %v1345_v41, 0 }
 0x1d1   : > { %v3667_v32 = vunpack.c.l.b16 %v1053_v46  ;;  %v3672_v55 = vpop.eup %2846  ;;  %v845_v31 = vsel %vm844_vm7, %v3529_v37, %v841_v35  ;;  %v3683_v54 = vpack.c.b16 %v1088_v43, %v1087_v58  ;;  %v930_v61 = vsub.f32 1.5, %v929_v40  ;;  %v1000_v37 = vld [vmem:[%s3121_s10 + $0x58] sm:$0xff]  ;;  %1403 = vmatpush.bf16.msra.mxu3 %v1394_v0 }
 0x1d2   : > { %v1128_v27 = vsel %vm1108_vm12, %v1123_v25, %v1127_v23  ;;  %v977_v22 = vmul.f32 %v855_v57, %v3159_v9  ;;  %v976_v33 = vmul.f32 %v845_v31, %v3146_v60  ;;  %v939_v49 = vmul.f32 0.5, %v938_v52 }
 0x1d3   : > { %v3681_v18 = vpack.c.b16 %v3667_v32, %v3667_v32  ;;  %v947_v7 = vmul.f32 %v3672_v55, %v3620_v5  ;;  %v3694_v16 = vshrl.u32 %v3575_v62, 16  ;;  %vm933_vm8 = vweird.f32 %v3589_v11 }
 0x1d4   : > { %v931_v9 = vmul.f32 %v3589_v11, %v930_v61  ;;  %v1023_v39 = vmul.f32 %v1000_v37, %v977_v22  ;;  %v1720_v42 = vrot.slane %v3683_v54, 2  ;;  %v1022_v2 = vmul.f32 %v999_v50, %v976_v33  ;;  %v1008_v33 = vld [vmem:[%s3121_s10 + $0x98] sm:$0xff] }
 0x1d5   : > { %2654 = vmatmul.msk.bf16.gmra.mxu1 %vm613_vm1, %v1128_v27  ;;  %v1181_v30 = vshll.u32 %v3681_v18, 16  ;;  %v1179_v60 = vor.u32 %v3694_v16, %v1175_v4  ;;  %v940_v15 = vsub.f32 1.5, %v939_v49  ;;  %v948_v44 = vmul.f32 %v3672_v55, %v947_v7 }
 0x1d6   : > { %vm932_vm9 = vweird.f32 %v3527_v1  ;;  %v3704_v46 = vshll.u32 %v3613_v14, 16  ;;  %vm942_vm11 = vweird.f32 %v3573_v6  ;;  %vm943_vm13 = vweird.f32 %v3627_v13 }
 0x1d7   : > { %v1183_v19 = vrot.slane %v1181_v30, 1  ;;  %vm3706_vm10 = vmor %vm932_vm9, %vm933_vm8  ;;  %v1347_v4 = vrot.slane %v3167_v21, 1  ;;  %v1348_v58 = vrot.slane %v3532_v26, 1  ;;  %v1046_v40 = vpack.c.bf16 %v1023_v39, %v1023_v39 }
 0x1d8   : > { %v935_v1 = vsel %vm3706_vm10, %v3589_v11, %v931_v9  ;;  %v3723_v25 = vsel %vm1714_vm15, %v1718_v29, %v1720_v42  ;;  %v1350_v57 = vrot.slane %v3611_v48, 1  ;;  %v1045_v52 = vpack.c.bf16 %v1022_v2, %v1022_v2  ;;  %vm3746_vm0 = vmor %vm942_vm11, %vm943_vm13 }
 0x1d9   : > { %v1184_v35 = vsel %vm1108_vm12, %v1179_v60, %v1183_v19  ;;  %4525 = vst [vmem:[#allocation2_spill] sm:$0xff] %v3723_v25  ;;  %v941_v21 = vmul.f32 %v3627_v13, %v940_v15  ;;  %v949_v41 = vmul.f32 0.5, %v948_v44  ;;  %vm1346_vm14 = vcmask 1046528  }
 0x1da   : > { %v3732_v11 = vshrl.u32 %v3611_v48, 16  ;;  %v1135_v31 = vrot.slane %v3704_v46, 1  ;;  %v3736_v29 = vsel %vm1346_vm14, %v1347_v4, %v1348_v58  ;;  %v3739_v27 = vsel %vm1346_vm14, %v1348_v58, %v1350_v57  ;;  %v1009_v58 = vld [vmem:[%s3121_s10 + $0xa0] sm:$0xff] }
 0x1db   : > { %v985_v61 = vmul.f32 %v935_v1, %v3162_v12  ;;  %v1352_v0 = vrot.slane %v3613_v14, 1  ;;  %v1090_v37 = vunpack.c.l.b16 %v1046_v40  ;;  %v1581_v7 = vrot.slane %v3473_v63, 1 }
 0x1dc   : > { %2661 = vmatmul.msk.bf16.gmra.mxu3 %vm613_vm1, %v1184_v35  ;;  %v1131_v49 = vor.u32 %v3732_v11, %v1127_v23  ;;  %v1582_v12 = vrot.slane %v3368_v20, 2  ;;  %v1089_v30 = vunpack.c.l.b16 %v1045_v52  ;;  %v1585_v6 = vrot.slane %v3616_v59, 1 }
 0x1dd   : > { %2708 = vmatmul.msk.bf16.gmra.mxu0 %vm613_vm1, %v3723_v25  ;;  %v3758_v50 = vsel %vm1346_vm14, %v1350_v57, %v1352_v0  ;;  %v945_v19 = vsel %vm3746_vm0, %v3627_v13, %v941_v21  ;;  %v950_v9 = vsub.f32 1.5, %v949_v41  ;;  %v1586_v39 = vrot.slane %v3490_v3, 2 }
 0x1de   : > { %v1136_v23 = vsel %vm1108_vm12, %v1131_v49, %v1135_v31  ;;  %v1031_v60 = vmul.f32 %v1008_v33, %v985_v61  ;;  %vm952_vm2 = vweird.f32 %v3620_v5  ;;  %vm1561_vm4 = vsmask.f32 6400 }
 0x1df   : > { %2665 = vmatmul.msk.bf16.gmra.mxu2 %vm613_vm1, %v3613_v14  ;;  %v3770_v2 = vpack.c.b16 %v1090_v37, %v1089_v30  ;;  %v3772_v15 = vor.u32 %v1582_v12, %v1581_v7  ;;  %v1587_v44 = vor.u32 %v1586_v39, %v1585_v6  ;;  %v1589_v13 = vrot.slane %v3694_v16, 1  ;;  %v682_v39 = vpop.xlane.xlu1 %681 }
 0x1e0   : > { %v986_v35 = vmul.f32 %v945_v19, %v3170_v34  ;;  %vm953_vm5 = vweird.f32 %v3672_v55  ;;  %v1590_v43 = vrot.slane %v3608_v51, 2  ;;  %v1715_v4 = vrot.slane %v3532_v26, 2 }
 0x1e1   : > { %4528 = vst [vmem:[#allocation3_spill] sm:$0xff] %v3770_v2  ;;  %v951_v1 = vmul.f32 %v3672_v55, %v950_v9  ;;  %v1354_v40 = vrot.slane %v3683_v54, 1  ;;  %v3784_v57 = vsel %vm1561_vm4, %v3772_v15, %v1587_v44  ;;  %v1930_v21 = vrot.slane %v3732_v11, 2  ;;  %vm3797_vm6 = vmor %vm952_vm2, %vm953_vm5 }
 0x1e2   : > { %v3786_v52 = vor.u32 %v1590_v43, %v1589_v13  ;;  %v3791_v34 = vsel %vm1714_vm15, %v1715_v4, %v1716_v8  ;;  %v1931_v41 = vrot.slane %v3644_v17, 3  ;;  %v1054_v61 = vpack.c.bf16 %v1031_v60, %v1031_v60 }
 0x1e3   : > { %v1722_v33 = vrot.slane %v3770_v2, 2  ;;  %v3803_v37 = vshrl.u32 %v3613_v14, 16  ;;  %v3808_v8 = vsel %vm1346_vm14, %v1352_v0, %v1354_v40  ;;  %v1032_v49 = vmul.f32 %v1009_v58, %v986_v35 }
 0x1e4   : > { %v3811_v7 = vshll.u32 %v3683_v54, 16  ;;  %v3815_v5 = vsel %vm1561_vm4, %v1587_v44, %v3786_v52  ;;  %v1932_v12 = vor.u32 %v1931_v41, %v1930_v21  ;;  %v3818_v30 = vrot.slane %v3575_v62, 1 }
 0x1e5   : > { %2655 = vmatmul.msk.bf16.gmra.mxu1 %vm613_vm1, %v1136_v23  ;;  %v1364_v6 = vrot.slane %v3681_v18, 1  ;;  %v2083_v19 = vrot.slane %v3611_v48, 3  ;;  %v2084_v9 = vrot.slane %v3613_v14, 3  ;;  %v955_v0 = vsel %vm3797_vm6, %v3672_v55, %v951_v1 }
 0x1e6   : > { %vm2082_vm7 = vcmask 1044480   ;;  %v3833_v23 = vsel %vm1714_vm15, %v1720_v42, %v1722_v33  ;;  %v1933_v55 = vrot.slane %v3803_v37, 2  ;;  %v1471_v18 = vunpack.c.l.b16 %v1054_v61 }
 0x1e7   : > { %4531 = vst [vmem:[#allocation4_spill] sm:$0xff] %v3833_v23  ;;  %v3837_v48 = vsel %vm1346_vm14, %v3818_v30, %v1364_v6  ;;  %v3840_v14 = vsel %vm2082_vm7, %v2083_v19, %v2084_v9  ;;  %v1934_v42 = vrot.slane %v3704_v46, 3  ;;  %v1945_v60 = vrot.slane %v3473_v63, 2  ;;  %v1010_v19 = vld [vmem:[%s3121_s10 + $0xa8] sm:$0xff] }
 0x1e8   : > { %v1946_v44 = vrot.slane %v3368_v20, 3  ;;  %v1055_v13 = vpack.c.bf16 %v1032_v49, %v1032_v49  ;;  %v4489_v35 = vrot.slane %v3811_v7, 1  ;;  %v1949_v43 = vrot.slane %v3616_v59, 2 }
 0x1e9   : > { %v1950_v4 = vrot.slane %v3490_v3, 3  ;;  %v987_v58 = vmul.f32 %v955_v0, %v3184_v38  ;;  %v3855_v1 = vshll.u32 %v3770_v2, 16  ;;  %v3858_v21 = vshrl.u32 %v3770_v2, 16 }
 0x1ea   : > { %v1935_v41 = vor.u32 %v1934_v42, %v1933_v55  ;;  %v712_v63 = vmul.f32 %v3061_v56, %v682_v39  ;;  %v1139_v61 = vor.u32 %v3803_v37, %v1135_v31  ;;  %v3865_v22 = vshrl.u32 %v3683_v54, 16 }
 0x1eb   : > { %vm1929_vm8 = vsmask.f32 5376  ;;  %v3870_v38 = vor.u32 %v1946_v44, %v1945_v60  ;;  %v1951_v59 = vor.u32 %v1950_v4, %v1949_v43  ;;  %v1953_v49 = vrot.slane %v3694_v16, 2 }
 0x1ec   : > { %2668 = vmatmul.msk.bf16.vlgmr.msrb.gmra.mxu3 %vm613_vm1, %v3338_v10  ;;  %v3868_v3 = vsel %vm1929_vm8, %v1932_v12, %v1935_v41  ;;  %v3873_v6 = vunpack.c.l.b16 %v1055_v13  ;;  %v1144_v56 = vsel %vm1108_vm12, %v1139_v61, %v4489_v35  ;;  %v2086_v31 = vrot.slane %v3683_v54, 3 }
 0x1ed   : > { %2709 = vmatmul.msk.bf16.gmra.mxu0 %vm613_vm1, %v3833_v23  ;;  %v1954_v0 = vrot.slane %v3608_v51, 3  ;;  %v1577_v12 = vrot.slane %v3858_v21, 1  ;;  %v1578_v55 = vrot.slane %v3855_v1, 2  ;;  %v3886_v16 = vsel %vm1929_vm8, %v3870_v38, %v1951_v59 }
 0x1ee   : > { %4532 = vst [vmem:[#allocation5_spill] sm:$0xff] %v3886_v16  ;;  %v3889_v39 = vsel %vm2082_vm7, %v2084_v9, %v2086_v31  ;;  %v1937_v42 = vrot.slane %v3865_v22, 2  ;;  %v1938_v60 = vrot.slane %v3811_v7, 3  ;;  %v1033_v44 = vmul.f32 %v1010_v19, %v987_v58 }
 0x1ef   : > { %2666 = vmatmul.msk.bf16.gmra.mxu2 %vm613_vm1, %v3683_v54  ;;  %v3893_v13 = vadd.f32 1e-08, %v712_v63  ;;  %v1356_v51 = vrot.slane %v3770_v2, 1  ;;  %v3896_v43 = vor.u32 %v1954_v0, %v1953_v49  ;;  %v1474_v4 = vpack.c.b16 %v3873_v6, %v3873_v6 }
 0x1f0   : > { %v3901_v61 = vpack.c.b16 %v1471_v18, %v3667_v32  ;;  %v4486_v9 = vrot.slane %v3338_v10, 2  ;;  %v3906_v45 = vor.u32 %v1578_v55, %v1577_v12  ;;  %v1056_v32 = vpack.c.bf16 %v1033_v44, %v1033_v44 }
 0x1f1   : > { %v3911_v58 = vsel %vm1346_vm14, %v1354_v40, %v1356_v51  ;;  %v3915_v63 = vsel %vm1929_vm8, %v1951_v59, %v3896_v43  ;;  %2848 = vrsqrt.f32 %v3893_v13  ;;  %v4490_v40 = vrot.slane %v3338_v10, 1 }
 0x1f2   : > { %4533 = vst [vmem:[#allocation6_spill] sm:$0xff] %v3915_v63  ;;  %v3927_v54 = vsel %vm1714_vm15, %v1722_v33, %v4486_v9  ;;  %v1594_v18 = vshrl.u32 %v3901_v61, 16  ;;  %v1597_v59 = vshll.u32 %v3901_v61, 16  ;;  %v1603_v19 = vshrl.u32 %v1474_v4, 16 }
 0x1f3   : > { %4534 = vst [vmem:[#allocation7_spill] sm:$0xff] %v3927_v54  ;;  %v1606_v0 = vshll.u32 %v1474_v4, 16  ;;  %v3940_v33 = vsel %vm1561_vm4, %v3906_v45, %v3772_v15  ;;  %v1475_v12 = vrot.slane %v3901_v61, 1  ;;  %v1477_v55 = vrot.slane %v1474_v4, 1  ;;  %v2081_v15 = vld [vmem:[%s4482_s5 + $0x20] sm:$0xf] }
 0x1f4   : > { %v3948_v44 = vsel %vm1346_vm14, %v1356_v51, %v4490_v40  ;;  %v1596_v9 = vrot.slane %v1594_v18, 1  ;;  %v1599_v24 = vrot.slane %v1597_v59, 2  ;;  %v1605_v53 = vrot.slane %v1603_v19, 1 }
 0x1f5   : > { %2656 = vmatmul.msk.bf16.gmra.mxu1 %vm613_vm1, %v1144_v56  ;;  %v3903_v56 = vor.u32 %v1938_v60, %v1937_v42  ;;  %v1608_v35 = vrot.slane %v1606_v0, 2  ;;  %v3962_v51 = vsel %vm1346_vm14, %v1475_v12, %v1477_v55  ;;  %v1151_v40 = vrot.slane %v3855_v1, 1 }
 0x1f6   : > { %v2130_v42 = vsel %vm1212_vm3, %v2081_v15, 0  ;;  %v1600_v63 = vor.u32 %v1599_v24, %v1596_v9  ;;  %v4535_v16 = vrot.slane %v3770_v2, 3  ;;  %v4536_v23 = vrot.slane %v3811_v7, 1 }
 0x1f7   : > { %v3919_v49 = vsel %vm1929_vm8, %v1935_v41, %v3903_v56  ;;  %v1713_v41 = vld [vmem:[%s4482_s5 + $0x14] sm:$0xf]  ;;  %v3971_v19 = vpop.eup %2848  ;;  %2139 = vmatpush.bf16.msra.mxu2 %v2130_v42  ;;  %v1609_v0 = vor.u32 %v1608_v35, %v1605_v53  ;;  %v3977_v55 = vrot.slane %v3901_v61, 2  ;;  %v1839_v24 = vunpack.c.l.b16 %v1056_v32 }
 0x1f8   : > { %v1762_v60 = vsel %vm1212_vm3, %v1713_v41, 0  ;;  %v3959_v41 = vsel %vm1346_vm14, %v3818_v30, %v1475_v12  ;;  %v1147_v12 = vor.u32 %v3865_v22, %v4536_v23  ;;  %v1565_v53 = vrot.slane %v3732_v11, 1 }
 0x1f9   : > { %1771 = vmatpush.bf16.msrb.mxu3 %v1762_v60  ;;  %v3981_v60 = vsel %vm1561_vm4, %v3786_v52, %v1600_v63  ;;  %v3984_v9 = vsel %vm1561_vm4, %v1600_v63, %v1609_v0  ;;  %v957_v35 = vmul.f32 %v3971_v19, %v3893_v13  ;;  %v1566_v23 = vrot.slane %v3644_v17, 2  ;;  %v1928_v52 = vld [vmem:[%s4482_s5 + $0x1c] sm:$0xf] }
 0x1fa   : > { %v1941_v32 = vrot.slane %v3858_v21, 2  ;;  %v1942_v63 = vrot.slane %v3855_v1, 3  ;;  %v1957_v42 = vrot.slane %v1594_v18, 2  ;;  %v1958_v15 = vrot.slane %v1597_v59, 3 }
 0x1fb   : > { %v4003_v0 = vpack.c.b16 %v1839_v24, %v3873_v6  ;;  %v958_v6 = vmul.f32 %v3971_v19, %v957_v35  ;;  %v1567_v24 = vor.u32 %v1566_v23, %v1565_v53  ;;  %v4539_v23 = vrot.slane %v3338_v10, 2 }
 0x1fc   : > { %2669 = vmatmul.msk.bf16.gmra.mxu3 %vm613_vm1, %v3438_v36  ;;  %v1943_v17 = vor.u32 %v1942_v63, %v1941_v32  ;;  %v1959_v1 = vor.u32 %v1958_v15, %v1957_v42  ;;  %v1155_v15 = vor.u32 %v3858_v21, %v1151_v40  ;;  %vm963_vm9 = vweird.f32 %v3971_v19 }
 0x1fd   : > { %2710 = vmatmul.msk.bf16.gmra.mxu0 %vm613_vm1, %v3927_v54  ;;  %v3969_v54 = vsel %vm2082_vm7, %v2086_v31, %v4535_v16  ;;  %v1732_v31 = vrot.slane %v1474_v4, 2  ;;  %v1152_v16 = vsel %vm1108_vm12, %v1147_v12, %v1151_v40  ;;  %v2007_v4 = vsel %vm1212_vm3, %v1928_v52, 0 }
 0x1fe   : > { %2016 = vmatpush.bf16.msra.mxu1 %v2007_v4  ;;  %v4537_v12 = vshrl.u32 %v3532_v26, 16  ;;  %v4011_v18 = vsel %vm1929_vm8, %v3903_v56, %v1943_v17  ;;  %v4015_v59 = vsel %vm1929_vm8, %v1943_v17, %v3870_v38  ;;  %v4021_v52 = vsel %vm1929_vm8, %v3896_v43, %v1959_v1 }
 0x1ff   : > { %2667 = vmatmul.msk.bf16.gmra.mxu2 %vm613_vm1, %v3770_v2  ;;  %v4000_v11 = vsel %vm1714_vm15, %v3977_v55, %v1732_v31  ;;  %v4538_v2 = vshll.u32 %v3532_v26, 16  ;;  %v1726_v31 = vrot.slane %v3438_v36, 2  ;;  %v2096_v26 = vrot.slane %v3901_v61, 3 }
 0x200   : > { %v1962_v56 = vshrl.u32 %v4003_v0, 16  ;;  %v1965_v32 = vshll.u32 %v4003_v0, 16  ;;  %v959_v42 = vmul.f32 0.5, %v958_v6  ;;  %vm962_vm3 = vweird.f32 %v3893_v13 }
 0x201   : > { %v1563_v25 = vrot.slane %v4538_v2, 2  ;;  %v2098_v2 = vrot.slane %v4003_v0, 3  ;;  %v4038_v4 = vsel %vm1714_vm15, %v4539_v23, %v1726_v31  ;;  %v1569_v6 = vrot.slane %v3803_v37, 1  ;;  %vm964_vm10 = vmor %vm962_vm3, %vm963_vm9  ;;  %v1011_v37 = vld [vmem:[%s3121_s10 + $0xb0] sm:$0xff]  ;;  %s2753_s10 = smul.u32 18, %s4562_s24 }
 0x202   : > { %v1964_v53 = vrot.slane %v1962_v56, 2  ;;  %v1967_v43 = vrot.slane %v1965_v32, 3  ;;  %v1570_v32 = vrot.slane %v3704_v46, 2 }
 0x203   : > { %v4032_v38 = vsel %vm2082_vm7, %v2096_v26, %v2098_v2  ;;  %s4186_s13 = sadd.s32 %s2754_s12, %s2753_s10 }
 0x204   : > { %v1571_v40 = vor.u32 %v1570_v32, %v1569_v6  ;;  %s2587_s14 = sshll.u32 %s4186_s13, 3 }
 0x205   : > { %2657 = vmatmul.msk.bf16.gmra.mxu1 %vm613_vm1, %v1152_v16  ;;  %v1562_v16 = vrot.slane %v4537_v12, 1  ;;  %v960_v12 = vsub.f32 1.5, %v959_v42  ;;  %s4199_s15 = scalar_lea.vmem %s4479_s2, %s2587_s14  ;;  %s4381_s20 = scalar_lea.vmem %s4484_s7, %s2587_s14 }
 0x206   : > { %v2220_v61 = vld [vmem:[%s4199_s15 + $0x80] sm:$0xff] }
 0x207   : > { %v1564_v63 = vor.u32 %v1563_v25, %v1562_v16  ;;  %v1968_v25 = vor.u32 %v1967_v43, %v1964_v53  ;;  %v4540_v16 = vrot.slane %v3368_v20, 1  ;;  %v961_v21 = vmul.f32 %v3971_v19, %v960_v12 }
 0x209   : > { %v1568_v35 = vsel %vm1561_vm4, %v1564_v63, %v1567_v24  ;;  %v4045_v17 = vsel %vm1929_vm8, %v1959_v1, %v1968_v25  ;;  %v1160_v56 = vsel %vm1108_vm12, %v1155_v15, %v4540_v16  ;;  %v1728_v1 = vrot.slane %v3575_v62, 2 }
 0x20a   : > { %v965_v20 = vsel %vm964_vm10, %v3971_v19, %v961_v21  ;;  %v1572_v63 = vsel %vm1561_vm4, %v1567_v24, %v1571_v40  ;;  %v1843_v21 = vrot.slane %v4003_v0, 2  ;;  %vm2424_vm12 = vcmask 130048  }
 0x20b   : > { %v988_v13 = vmul.f32 %v965_v20, %v3190_v28  ;;  %v4063_v53 = vsel %vm1714_vm15, %v1726_v31, %v1728_v1  ;;  %v1574_v28 = vrot.slane %v3811_v7, 2  ;;  %v4078_v23 = vsel %vm1714_vm15, %v1728_v1, %v3977_v55 }
 0x20c   : > { %2670 = vmatmul.msk.bf16.gmra.mxu3 %vm613_vm1, %v3575_v62  ;;  %v1844_v1 = vsel %vm1714_vm15, %v3977_v55, %v1843_v21 }
 0x20d   : > { %2711 = vmatmul.msk.bf16.gmra.mxu0 %vm613_vm1, %v4038_v4  ;;  %v1034_v46 = vmul.f32 %v1011_v37, %v988_v13 }
 0x20f   : > { %2689 = vmatmul.msk.bf16.vlgmr.msrb.gmra.mxu2 %vm613_vm1, %v1568_v35  ;;  %v1057_v19 = vpack.c.bf16 %v1034_v46, %v1034_v46 }
 0x211   : > { %v1840_v43 = vunpack.c.l.b16 %v1057_v19 }
 0x213   : > { %v1842_v31 = vpack.c.b16 %v1840_v43, %v1840_v43 }
 0x215   : > { %2658 = vmatmul.msk.bf16.gmra.mxu1 %vm613_vm1, %v1160_v56  ;;  %v2100_v7 = vrot.slane %v1842_v31, 3  ;;  %v1971_v42 = vshrl.u32 %v1842_v31, 16  ;;  %v1974_v15 = vshll.u32 %v1842_v31, 16 }
 0x217   : > { %v4086_v12 = vsel %vm2082_vm7, %v2098_v2, %v2100_v7  ;;  %v1976_v16 = vrot.slane %v1974_v15, 3 }
 0x21c   : > { %2671 = vmatmul.msk.bf16.vlgmr.msra.gmra.mxu3 %vm613_vm1, %v3736_v29  ;;  %v1573_v29 = vrot.slane %v3865_v22, 1  ;;  %v4083_v22 = vpop.f32.mrf.mxu2 }
 0x21d   : > { %2712 = vmatmul.msk.bf16.gmra.mxu0 %vm613_vm1, %v4063_v53 }
 0x21e   : > { %v1575_v24 = vor.u32 %v1574_v28, %v1573_v29 }
 0x21f   : > { %2690 = vmatmul.msk.bf16.gmra.mxu2 %vm613_vm1, %v1572_v63  ;;  %v1845_v63 = vrot.slane %v1842_v31, 2 }
 0x220   : > { %v1576_v35 = vsel %vm1561_vm4, %v1571_v40, %v1575_v24  ;;  %v1580_v2 = vsel %vm1561_vm4, %v1575_v24, %v3906_v45 }
 0x221   : > { %v1846_v45 = vsel %vm1714_vm15, %v1843_v21, %v1845_v63 }
 0x224   : > { %v1302_v32 = vpop.f32.mrf.mxu2 }
 0x225   : > { %2680 = vmatmul.msk.bf16.vlgmr.msrb.gmra.mxu1 %vm613_vm1, %v3739_v27 }
 0x22c   : > { %2672 = vmatmul.msk.bf16.gmra.mxu3 %vm613_vm1, %v3739_v27  ;;  %v1973_v27 = vrot.slane %v1971_v42, 2 }
 0x22d   : > { %2713 = vmatmul.msk.bf16.gmra.mxu0 %vm613_vm1, %v4078_v23 }
 0x22e   : > { %v1977_v56 = vor.u32 %v1976_v16, %v1973_v27 }
 0x22f   : > { %2691 = vmatmul.msk.bf16.gmra.mxu2 %vm613_vm1, %v1576_v35 }
 0x230   : > { %v4091_v6 = vsel %vm1929_vm8, %v1968_v25, %v1977_v56 }
 0x235   : > { %2681 = vmatmul.msk.bf16.gmra.mxu1 %vm613_vm1, %v3758_v50 }
 0x23c   : > { %2673 = vmatmul.msk.bf16.gmra.mxu3 %vm613_vm1, %v3758_v50 }
 0x23d   : > { %v1255_v40 = vpop.f32.mrf.mxu3  ;;  %2714 = vmatmul.msk.bf16.gmra.mxu0 %vm613_vm1, %v1844_v1  ;;  %v4541_v1 = vrot.slane %v3338_v10, 1 }
 0x23f   : > { %2692 = vmatmul.msk.bf16.gmra.mxu2 %vm613_vm1, %v1580_v2 }
 0x242   : > { %v4102_v20 = vpop.f32.mrf.mxu1  ;;  %v1305_v25 = vpop.f32.mrf.mxu2 }
 0x245   : > { %2682 = vmatmul.msk.bf16.gmra.mxu1 %vm613_vm1, %v3808_v8  ;;  %v1257_v0 = vpop.f32.mrf.mxu3 }
 0x24a   : > { %v1227_v13 = vpop.f32.mrf.mxu1  ;;  %v1307_v50 = vpop.f32.mrf.mxu2 }
 0x24b   : > { %v4106_v37 = vadd.f32 %v1302_v32, %v1227_v13 }
 0x24c   : > { %2674 = vmatmul.msk.bf16.gmra.mxu3 %vm613_vm1, %v3808_v8 }
 0x24d   : > { %2715 = vmatmul.msk.bf16.gmra.mxu0 %vm613_vm1, %v1846_v45 }
 0x24f   : > { %2693 = vmatmul.msk.bf16.gmra.mxu2 %vm613_vm1, %v3940_v33  ;;  %v1260_v55 = vpop.f32.mrf.mxu3 }
 0x252   : > { %v1230_v46 = vpop.f32.mrf.mxu1  ;;  %v1310_v19 = vpop.f32.mrf.mxu2 }
 0x253   : > { %v4114_v29 = vadd.f32 %v1305_v25, %v1230_v46 }
 0x255   : > { %2683 = vmatmul.msk.bf16.gmra.mxu1 %vm613_vm1, %v3911_v58 }
 0x257   : > { %v1262_v28 = vpop.f32.mrf.mxu3 }
 0x25a   : > { %v1232_v43 = vpop.f32.mrf.mxu1  ;;  %v1312_v24 = vpop.f32.mrf.mxu2 }
 0x25b   : > { %v4118_v31 = vadd.f32 %v1307_v50, %v1232_v43 }
 0x25c   : > { %2675 = vmatmul.msk.bf16.gmra.mxu3 %vm613_vm1, %v3911_v58  ;;  %v1360_v58 = vrot.slane %v3438_v36, 1 }
 0x25e   : > { %v1361_v25 = vsel %vm1346_vm14, %v4541_v1, %v1360_v58 }
 0x25f   : > { %2694 = vmatmul.msk.bf16.gmra.mxu2 %vm613_vm1, %v3784_v57  ;;  %v1265_v8 = vpop.f32.mrf.mxu3 }
 0x262   : > { %v1235_v33 = vpop.f32.mrf.mxu1  ;;  %v1315_v35 = vpop.f32.mrf.mxu2 }
 0x263   : > { %v4124_v7 = vadd.f32 %v1310_v19, %v1235_v33 }
 0x265   : > { %2684 = vmatmul.msk.bf16.gmra.mxu1 %vm613_vm1, %v3948_v44 }
 0x267   : > { %v1267_v42 = vpop.f32.mrf.mxu3 }
 0x26a   : > { %v1237_v15 = vpop.f32.mrf.mxu1  ;;  %v1317_v27 = vpop.f32.mrf.mxu2 }
 0x26b   : > { %v4128_v16 = vadd.f32 %v1312_v24, %v1237_v15 }
 0x26c   : > { %2676 = vmatmul.msk.bf16.gmra.mxu3 %vm613_vm1, %v3948_v44 }
 0x26f   : > { %2695 = vmatmul.msk.bf16.gmra.mxu2 %vm613_vm1, %v3815_v5  ;;  %v1330_v57 = vpop.f32.mrf.mxu3 }
 0x270   : > { %v4135_v56 = vadd.f32 %v1330_v57, %v1255_v40 }
 0x272   : > { %v1240_v32 = vpop.f32.mrf.mxu1  ;;  %v1320_v21 = vpop.f32.mrf.mxu2 }
 0x273   : > { %v4137_v2 = vadd.f32 %v1315_v35, %v1240_v32 }
 0x275   : > { %2685 = vmatmul.msk.bf16.gmra.mxu1 %vm613_vm1, %v1361_v25 }
 0x277   : > { %v1332_v13 = vpop.f32.mrf.mxu3 }
 0x278   : > { %v4143_v44 = vadd.f32 %v1332_v13, %v1257_v0  ;;  %v1363_v0 = vsel %vm1346_vm14, %v1360_v58, %v3818_v30 }
 0x27a   : > { %v1242_v50 = vpop.f32.mrf.mxu1  ;;  %v1322_v5 = vpop.f32.mrf.mxu2 }
 0x27b   : > { %v4145_v63 = vadd.f32 %v1317_v27, %v1242_v50 }
 0x27c   : > { %2677 = vmatmul.msk.bf16.gmra.mxu3 %vm613_vm1, %v1361_v25 }
 0x27f   : > { %2696 = vmatmul.msk.bf16.gmra.mxu2 %vm613_vm1, %v3981_v60  ;;  %v1335_v40 = vpop.f32.mrf.mxu3 }
 0x280   : > { %v4150_v45 = vadd.f32 %v1335_v40, %v1260_v55  ;;  %v2891_v40 = vmov 0  }
 0x281   : > { %2798 = vset.pattern.permute.xlu0 %v2891_v40  ;;  %2799 = vset.pattern.permute.xlu1 %v2891_v40 }
 0x282   : > { %v1245_v46 = vpop.f32.mrf.mxu1  ;;  %v1325_v19 = vpop.f32.mrf.mxu2  ;;  %2797 = vset.pattern.permute.xlu2 %v2891_v40  ;;  %v4543_v40 = vld [vmem:[#allocation3_spill] sm:$0xff] }
 0x283   : > { %v4152_v43 = vadd.f32 %v1320_v21, %v1245_v46 }
 0x285   : > { %2686 = vmatmul.msk.bf16.gmra.mxu1 %vm613_vm1, %v1363_v0 }
 0x287   : > { %v1337_v24 = vpop.f32.mrf.mxu3 }
 0x288   : > { %v4157_v33 = vadd.f32 %v1337_v24, %v1262_v28 }
 0x28a   : > { %v1247_v35 = vpop.f32.mrf.mxu1  ;;  %v1327_v15 = vpop.f32.mrf.mxu2 }
 0x28b   : > { %v4159_v27 = vadd.f32 %v1322_v5, %v1247_v35  ;;  %v2206_v35 = vld [vmem:[%s4199_s15 + $0x10] sm:$0xff] }
 0x28c   : > { %2678 = vmatmul.msk.bf16.gmra.mxu3 %vm613_vm1, %v1363_v0  ;;  %2234 = vperm.xlu1 %2799, %v2206_v35  }
 0x28f   : > { %2697 = vmatmul.msk.bf16.gmra.mxu2 %vm613_vm1, %v3984_v9  ;;  %v1340_v60 = vpop.f32.mrf.mxu3  ;;  %v1301_v9 = vadd.f32 %v4083_v22, %v4102_v20 }
 0x290   : > { %v4164_v55 = vadd.f32 %v1340_v60, %v1265_v8 }
 0x292   : > { %v1250_v30 = vpop.f32.mrf.mxu1  ;;  %v1650_v57 = vpop.f32.mrf.mxu2 }
 0x293   : > { %v4166_v58 = vadd.f32 %v1325_v19, %v1250_v30 }
 0x295   : > { %2687 = vmatmul.msk.bf16.gmra.mxu1 %vm613_vm1, %v3959_v41 }
 0x297   : > { %v1342_v28 = vpop.f32.mrf.mxu3 }
 0x298   : > { %v4170_v32 = vadd.f32 %v1342_v28, %v1267_v42 }
 0x29a   : > { %v1252_v21 = vpop.f32.mrf.mxu1  ;;  %v4172_v1 = vpop.f32.mrf.mxu2 }
 0x29b   : > { %v4174_v25 = vadd.f32 %v1327_v15, %v1252_v21 }
 0x29c   : > { %2679 = vmatmul.msk.bf16.gmra.mxu3 %vm613_vm1, %v3837_v48 }
 0x29f   : > { %2725 = vmatmul.msk.bf16.vlgmr.msra.gmra.mxu2 %vm613_vm1, %v3840_v14  ;;  %v1405_v8 = vpop.f32.mrf.mxu3 }
 0x2a0   : > { %v1450_v41 = vadd.f32 %v1405_v8, %v1301_v9 }
 0x2a2   : > { %v1497_v42 = vpop.f32.mrf.mxu1  ;;  %v4184_v13 = vpop.f32.mrf.mxu2 }
 0x2a3   : > { %v1542_v50 = vadd.f32 %v1497_v42, %v1450_v41 }
 0x2a5   : > { %2688 = vmatmul.msk.bf16.gmra.mxu1 %vm613_vm1, %v3962_v51  ;;  %v2205_v51 = vld [vmem:[%s4199_s15 + $0x8] sm:$0xff]  ;;  %v4225_v41 = vadd.f32 %v1650_v57, %v1542_v50 }
 0x2a6   : > { %2229 = vperm.xlu0 %2798, %v2205_v51   ;;  %v4544_v51 = vrot.slane %v4543_v40, 3  ;;  %v4546_v40 = vld [vmem:[#allocation7_spill] sm:$0xff] }
 0x2a7   : > { %v1407_v48 = vpop.f32.mrf.mxu3 }
 0x2a8   : > { %v1451_v22 = vadd.f32 %v1407_v48, %v4106_v37 }
 0x2aa   : > { %v1499_v14 = vpop.f32.mrf.mxu1  ;;  %v4192_v20 = vpop.f32.mrf.mxu2 }
 0x2ab   : > { %v1543_v5 = vadd.f32 %v1499_v14, %v1451_v22  ;;  %v2090_v22 = vrot.slane %v3338_v10, 3  ;;  %v2209_v14 = vld [vmem:[%s4199_s15 + $0x28] sm:$0xff] }
 0x2ac   : > { %2698 = vmatmul.msk.bf16.vlgmr.msrb.gmra.mxu3 %vm613_vm1, %v3791_v34  ;;  %2249 = vperm.xlu1 %2799, %v2209_v14  }
 0x2af   : > { %2726 = vmatmul.msk.bf16.gmra.mxu2 %vm613_vm1, %v3889_v39  ;;  %v1410_v37 = vpop.f32.mrf.mxu3  ;;  %v2204_v39 = vld [vmem:[%s4199_s15] sm:$0xff] }
 0x2b0   : > { %v1452_v46 = vadd.f32 %v1410_v37, %v4114_v29  ;;  %2224 = vperm.xlu2 %2797, %v2204_v39   ;;  %v4545_v39 = vld [vmem:[#allocation4_spill] sm:$0xff] }
 0x2b2   : > { %v1502_v19 = vpop.f32.mrf.mxu1  ;;  %v4207_v0 = vpop.f32.mrf.mxu2 }
 0x2b3   : > { %v1544_v24 = vadd.f32 %v1502_v19, %v1452_v46  ;;  %v2207_v19 = vld [vmem:[%s4199_s15 + $0x18] sm:$0xff] }
 0x2b5   : > { %2716 = vmatmul.msk.bf16.vlgmr.msra.gmra.mxu1 %vm613_vm1, %v3868_v3 }
 0x2b7   : > { %v1412_v34 = vpop.f32.mrf.mxu3 }
 0x2b8   : > { %v1453_v15 = vadd.f32 %v1412_v34, %v4118_v31  ;;  %2239 = vperm.xlu2 %2797, %v2207_v19   ;;  %v4248_v34 = vadd.f32 %v4184_v13, %v1544_v24 }
 0x2ba   : > { %v1504_v60 = vpop.f32.mrf.mxu1  ;;  %v4213_v30 = vpop.f32.mrf.mxu2 }
 0x2bb   : > { %v1545_v28 = vadd.f32 %v1504_v60, %v1453_v15 }
 0x2bc   : > { %2699 = vmatmul.msk.bf16.gmra.mxu3 %vm613_vm1, %v3641_v47 }
 0x2bf   : > { %2727 = vmatmul.msk.bf16.gmra.mxu2 %vm613_vm1, %v3969_v54  ;;  %v1415_v29 = vpop.f32.mrf.mxu3 }
 0x2c0   : > { %v1454_v3 = vadd.f32 %v1415_v29, %v4124_v7  ;;  %v4542_v7 = vld [vmem:[#allocation2_spill] sm:$0xff]  ;;  %v2211_v29 = vld [vmem:[%s4199_s15 + $0x38] sm:$0xff] }
 0x2c1   : > { %2259 = vperm.xlu1 %2799, %v2211_v29  }
 0x2c2   : > { %v1507_v21 = vpop.f32.mrf.mxu1  ;;  %v4221_v9 = vpop.f32.mrf.mxu2 }
 0x2c3   : > { %v1546_v31 = vadd.f32 %v1507_v21, %v1454_v3 }
 0x2c5   : > { %2717 = vmatmul.msk.bf16.gmra.mxu1 %vm613_vm1, %v3919_v49  ;;  %v2091_v49 = vsel %vm2082_vm7, %v4544_v51, %v2090_v22  ;;  %v2210_v51 = vld [vmem:[%s4199_s15 + $0x30] sm:$0xff] }
 0x2c7   : > { %v1417_v8 = vpop.f32.mrf.mxu3 }
 0x2c8   : > { %v1455_v47 = vadd.f32 %v1417_v8, %v4128_v16  ;;  %v4239_v16 = vadd.f32 %v4172_v1, %v1543_v5 }
 0x2ca   : > { %v1509_v42 = vpop.f32.mrf.mxu1  ;;  %v4228_v48 = vpop.f32.mrf.mxu2 }
 0x2cb   : > { %v1547_v54 = vadd.f32 %v1509_v42, %v1455_v47  ;;  %v2212_v47 = vld [vmem:[%s4199_s15 + $0x40] sm:$0xff] }
 0x2cc   : > { %2700 = vmatmul.msk.bf16.gmra.mxu3 %vm613_vm1, %v4542_v7  ;;  %2264 = vperm.xlu0 %2798, %v2212_v47  }
 0x2cf   : > { %2728 = vmatmul.msk.bf16.gmra.mxu2 %vm613_vm1, %v2091_v49  ;;  %v1420_v57 = vpop.f32.mrf.mxu3 }
 0x2d0   : > { %v1456_v50 = vadd.f32 %v1420_v57, %v4137_v2  ;;  %v2092_v2 = vrot.slane %v3438_v36, 3 }
 0x2d2   : > { %v1512_v10 = vpop.f32.mrf.mxu1  ;;  %v4242_v37 = vpop.f32.mrf.mxu2  ;;  %v2093_v3 = vsel %vm2082_vm7, %v2090_v22, %v2092_v2  ;;  %v4270_v22 = vadd.f32 %v4207_v0, %v1546_v31 }
 0x2d3   : > { %v1548_v46 = vadd.f32 %v1512_v10, %v1456_v50  ;;  %v4547_v50 = vld [vmem:[#allocation5_spill] sm:$0xff]  ;;  %v2214_v10 = vld [vmem:[%s4199_s15 + $0x50] sm:$0xff] }
 0x2d4   : > { %2274 = vperm.xlu1 %2799, %v2214_v10  }
 0x2d5   : > { %2718 = vmatmul.msk.bf16.gmra.mxu1 %vm613_vm1, %v4011_v18  ;;  %v2208_v18 = vld [vmem:[%s4199_s15 + $0x20] sm:$0xff] }
 0x2d6   : > { %2244 = vperm.xlu2 %2797, %v2208_v18  }
 0x2d7   : > { %v1422_v35 = vpop.f32.mrf.mxu3 }
 0x2d8   : > { %v1457_v1 = vadd.f32 %v1422_v35, %v4145_v63  ;;  %v4261_v63 = vadd.f32 %v4192_v20, %v1545_v28  ;;  %v4291_v35 = vadd.f32 %v4221_v9, %v1548_v46 }
 0x2da   : > { %v1514_v5 = vpop.f32.mrf.mxu1  ;;  %v4251_v15 = vpop.f32.mrf.mxu2 }
 0x2db   : > { %v1549_v60 = vadd.f32 %v1514_v5, %v1457_v1  ;;  %v2217_v5 = vld [vmem:[%s4199_s15 + $0x68] sm:$0xff] }
 0x2dc   : > { %2701 = vmatmul.msk.bf16.gmra.mxu3 %vm613_vm1, %v4545_v39  ;;  %2289 = vperm.xlu1 %2799, %v2217_v5  }
 0x2dd   : > { %v4305_v9 = vadd.f32 %v4228_v48, %v1549_v60 }
 0x2de   : > { %2254 = vperm.xlu2 %2797, %v2210_v51  }
 0x2df   : > { %2729 = vmatmul.msk.bf16.gmra.mxu2 %vm613_vm1, %v2093_v3  ;;  %v1425_v13 = vpop.f32.mrf.mxu3  ;;  %v4548_v3 = vld [vmem:[#allocation6_spill] sm:$0xff] }
 0x2e0   : > { %v1458_v36 = vadd.f32 %v1425_v13, %v4152_v43  ;;  %v2094_v43 = vrot.slane %v3575_v62, 3  ;;  %v2213_v13 = vld [vmem:[%s4199_s15 + $0x48] sm:$0xff] }
 0x2e2   : > { %v1517_v24 = vpop.f32.mrf.mxu1  ;;  %v4264_v21 = vpop.f32.mrf.mxu2  ;;  %v2097_v39 = vsel %vm2082_vm7, %v2094_v43, %v2096_v26  ;;  %v2218_v26 = vld [vmem:[%s4199_s15 + $0x70] sm:$0xff] }
 0x2e3   : > { %v1550_v8 = vadd.f32 %v1517_v24, %v1458_v36 }
 0x2e4   : > { %2304 = vperm.xlu1 %2799, %v2220_v61  }
 0x2e5   : > { %2719 = vmatmul.msk.bf16.gmra.mxu1 %vm613_vm1, %v4015_v59  ;;  %v2095_v59 = vsel %vm2082_vm7, %v2092_v2, %v2094_v43  ;;  %v2215_v2 = vld [vmem:[%s4199_s15 + $0x58] sm:$0xff]  ;;  %v4316_v48 = vadd.f32 %v4242_v37, %v1550_v8 }
 0x2e6   : > { %2279 = vperm.xlu0 %2798, %v2215_v2   ;;  %2269 = vperm.xlu2 %2797, %v2213_v13  }
 0x2e7   : > { %v1427_v42 = vpop.f32.mrf.mxu3 }
 0x2e8   : > { %v1459_v7 = vadd.f32 %v1427_v42, %v4159_v27  ;;  %v4282_v27 = vadd.f32 %v4213_v30, %v1547_v54  ;;  %v2221_v42 = vld [vmem:[%s4199_s15 + $0x88] sm:$0xff] }
 0x2ea   : > { %v1519_v20 = vpop.f32.mrf.mxu1  ;;  %v4273_v28 = vpop.f32.mrf.mxu2 }
 0x2eb   : > { %v1551_v14 = vadd.f32 %v1519_v20, %v1459_v7  ;;  %v2216_v7 = vld [vmem:[%s4199_s15 + $0x60] sm:$0xff]  ;;  %v1865_v20 = vpop.f32.mrf.mxu0 }
 0x2ec   : > { %2702 = vmatmul.msk.bf16.gmra.mxu3 %vm613_vm1, %v4546_v40 }
 0x2ed   : > { %v4328_v8 = vadd.f32 %v4251_v15, %v1551_v14 }
 0x2ee   : > { %2294 = vperm.xlu0 %2798, %v2218_v26   ;;  %2284 = vperm.xlu2 %2797, %v2216_v7  }
 0x2ef   : > { %2730 = vmatmul.msk.bf16.gmra.mxu2 %vm613_vm1, %v2095_v59  ;;  %v1430_v0 = vpop.f32.mrf.mxu3 }
 0x2f0   : > { %v1460_v31 = vadd.f32 %v1430_v0, %v4166_v58 }
 0x2f2   : > { %v1522_v49 = vpop.f32.mrf.mxu1  ;;  %v4285_v62 = vpop.f32.mrf.mxu2 }
 0x2f3   : > { %v1552_v57 = vadd.f32 %v1522_v49, %v1460_v31 }
 0x2f5   : > { %2720 = vmatmul.msk.bf16.gmra.mxu1 %vm613_vm1, %v4547_v50  ;;  %v4337_v0 = vadd.f32 %v4264_v21, %v1552_v57 }
 0x2f6   : > { %2309 = vperm.xlu0 %2798, %v2221_v42  }
 0x2f7   : > { %v1432_v19 = vpop.f32.mrf.mxu3 }
 0x2f8   : > { %v1461_v1 = vadd.f32 %v1432_v19, %v4174_v25 }
 0x2fa   : > { %v1524_v30 = vpop.f32.mrf.mxu1  ;;  %v4294_v54 = vpop.f32.mrf.mxu2 }
 0x2fb   : > { %v1553_v58 = vadd.f32 %v1524_v30, %v1461_v1 }
 0x2fc   : > { %2703 = vmatmul.msk.bf16.gmra.mxu3 %vm613_vm1, %v4038_v4 }
 0x2fd   : > { %v4347_v49 = vadd.f32 %v4273_v28, %v1553_v58 }
 0x2ff   : > { %2731 = vmatmul.msk.bf16.gmra.mxu2 %vm613_vm1, %v2097_v39  ;;  %v1435_v25 = vpop.f32.mrf.mxu3 }
 0x300   : > { %v1462_v46 = vadd.f32 %v1435_v25, %v4135_v56 }
 0x302   : > { %v1527_v29 = vpop.f32.mrf.mxu1  ;;  %v4308_v18 = vpop.f32.mrf.mxu2 }
 0x303   : > { %v1554_v4 = vadd.f32 %v1527_v29, %v1462_v46 }
 0x305   : > { %2721 = vmatmul.msk.bf16.gmra.mxu1 %vm613_vm1, %v4548_v3  ;;  %v4353_v1 = vadd.f32 %v4285_v62, %v1554_v4 }
 0x307   : > { %v1437_v36 = vpop.f32.mrf.mxu3 }
 0x308   : > { %v1463_v56 = vadd.f32 %v1437_v36, %v4143_v44 }
 0x30a   : > { %v1529_v60 = vpop.f32.mrf.mxu1  ;;  %v4319_v24 = vpop.f32.mrf.mxu2 }
 0x30b   : > { %v1555_v47 = vadd.f32 %v1529_v60, %v1463_v56 }
 0x30c   : > { %2704 = vmatmul.msk.bf16.gmra.mxu3 %vm613_vm1, %v4063_v53  ;;  %v2219_v53 = vld [vmem:[%s4199_s15 + $0x78] sm:$0xff] }
 0x30d   : > { %2299 = vperm.xlu2 %2797, %v2219_v53   ;;  %v4361_v58 = vadd.f32 %v4294_v54, %v1555_v47 }
 0x30f   : > { %2732 = vmatmul.msk.bf16.gmra.mxu2 %vm613_vm1, %v4032_v38  ;;  %v1440_v37 = vpop.f32.mrf.mxu3  ;;  %v1867_v38 = vpop.f32.mrf.mxu0 }
 0x310   : > { %v1464_v44 = vadd.f32 %v1440_v37, %v4150_v45 }
 0x312   : > { %v1532_v43 = vpop.f32.mrf.mxu1  ;;  %v4331_v40 = vpop.f32.mrf.mxu2 }
 0x313   : > { %v1556_v51 = vadd.f32 %v1532_v43, %v1464_v44 }
 0x315   : > { %2722 = vmatmul.msk.bf16.gmra.mxu1 %vm613_vm1, %v4021_v52  ;;  %v4372_v4 = vadd.f32 %v4308_v18, %v1556_v51 }
 0x317   : > { %v1442_v59 = vpop.f32.mrf.mxu3  ;;  %v1870_v10 = vpop.f32.mrf.mxu0 }
 0x318   : > { %v1465_v31 = vadd.f32 %v1442_v59, %v4157_v33  ;;  %v2230_v60 = vpop.permute.xlu0 %2229 }
 0x31a   : > { %v1534_v15 = vpop.f32.mrf.mxu1  ;;  %v4340_v14 = vpop.f32.mrf.mxu2 }
 0x31b   : > { %v1557_v45 = vadd.f32 %v1534_v15, %v1465_v31  ;;  %v2235_v15 = vpop.permute.xlu1 %2234 }
 0x31c   : > { %2705 = vmatmul.msk.bf16.gmra.mxu3 %vm613_vm1, %v4078_v23 }
 0x31d   : > { %v4384_v7 = vadd.f32 %v4319_v24, %v1557_v45 }
 0x31f   : > { %2733 = vmatmul.msk.bf16.gmra.mxu2 %vm613_vm1, %v4086_v12  ;;  %v1445_v52 = vpop.f32.mrf.mxu3  ;;  %v1872_v28 = vpop.f32.mrf.mxu0 }
 0x320   : > { %v1466_v21 = vadd.f32 %v1445_v52, %v4164_v55 }
 0x322   : > { %v1537_v57 = vpop.f32.mrf.mxu1  ;;  %v2141_v50 = vpop.f32.mrf.mxu2 }
 0x323   : > { %v1558_v33 = vadd.f32 %v1537_v57, %v1466_v21 }
 0x325   : > { %2723 = vmatmul.msk.bf16.gmra.mxu1 %vm613_vm1, %v4045_v17  ;;  %v4391_v57 = vadd.f32 %v4331_v40, %v1558_v33 }
 0x327   : > { %v1447_v19 = vpop.f32.mrf.mxu3  ;;  %v1875_v46 = vpop.f32.mrf.mxu0 }
 0x328   : > { %v1467_v23 = vadd.f32 %v1447_v19, %v4170_v32  ;;  %v2225_v32 = vpop.permute.xlu2 %2224 }
 0x32a   : > { %v1539_v12 = vpop.f32.mrf.mxu1  ;;  %v2143_v30 = vpop.f32.mrf.mxu2 }
 0x32b   : > { %v4356_v5 = vadd.f32 %v1539_v12, %v1467_v23 }
 0x32c   : > { %2706 = vmatmul.msk.bf16.gmra.mxu3 %vm613_vm1, %v4000_v11  ;;  %v4369_v11 = vld [vmem:[%s4483_s6] ss:$0 sm:$0xff] }
 0x32f   : > { %v1773_v55 = vpop.f32.mrf.mxu3 }
 0x330   : > { %v1818_v17 = vadd.f32 %v1773_v55, %v4225_v41  ;;  %v2240_v55 = vpop.permute.xlu2 %2239 }
 0x332   : > { %v2018_v2 = vpop.f32.mrf.mxu1  ;;  %v2146_v39 = vpop.f32.mrf.mxu2  ;;  %v1910_v62 = vadd.f32 %v1865_v20, %v1818_v17 }
 0x333   : > { %v1877_v20 = vpop.f32.mrf.mxu0 }
 0x334   : > { %v2063_v25 = vadd.f32 %v2018_v2, %v1910_v62 }
 0x335   : > { %2724 = vmatmul.msk.bf16.gmra.mxu1 %vm613_vm1, %v4091_v6 }
 0x336   : > { %v2186_v29 = vadd.f32 %v2141_v50, %v2063_v25 }
 0x337   : > { %v1775_v54 = vpop.f32.mrf.mxu3 }
 0x338   : > { %v1819_v41 = vadd.f32 %v1775_v54, %v4239_v16  ;;  %v2312_v3 = vadd.f32 %v2225_v32, %v2186_v29 }
 0x33a   : > { %v2020_v61 = vpop.f32.mrf.mxu1  ;;  %v2148_v26 = vpop.f32.mrf.mxu2  ;;  %v2334_v6 = vadd.f32 %v4369_v11, %v2312_v3  ;;  %v1911_v13 = vadd.f32 %v1867_v38, %v1819_v41 }
 0x33c   : > { %vm2352_vm1 = vcmp.ge.f32.partialorder %v2334_v6, 0.0  ;;  %v2370_v36 = vmul.f32 0.2, %v2334_v6  ;;  %v2064_v56 = vadd.f32 %v2020_v61, %v1911_v13 }
 0x33e   : > { %v2388_v18 = vsel %vm2352_vm1, %v2334_v6, %v2370_v36  ;;  %v2187_v16 = vadd.f32 %v2143_v30, %v2064_v56  ;;  %v2245_v6 = vpop.permute.xlu2 %2244 }
 0x33f   : > { %v2406_v47 = vmul.f32 1.4142135, %v2388_v18  ;;  %v1778_v42 = vpop.f32.mrf.mxu3 }
 0x340   : > { %v2313_v37 = vadd.f32 %v2230_v60, %v2187_v16  ;;  %v1820_v44 = vadd.f32 %v1778_v42, %v4248_v34 }
 0x341   : > { %2425 = vst.msk [vmem:[%s4381_s20] sm:$0xff] %vm2424_vm12, %v2406_v47 }
 0x342   : > { %v2023_v43 = vpop.f32.mrf.mxu1  ;;  %v2151_v51 = vpop.f32.mrf.mxu2  ;;  %v2335_v53 = vadd.f32 %v4369_v11, %v2313_v37  ;;  %v1912_v59 = vadd.f32 %v1870_v10, %v1820_v44 }
 0x343   : > { %v1880_v10 = vpop.f32.mrf.mxu0  ;;  %v2250_v37 = vpop.permute.xlu1 %2249 }
 0x344   : > { %vm2353_vm15 = vcmp.ge.f32.partialorder %v2335_v53, 0.0  ;;  %v2371_v38 = vmul.f32 0.2, %v2335_v53  ;;  %v2065_v31 = vadd.f32 %v2023_v43, %v1912_v59 }
 0x346   : > { %v2389_v52 = vsel %vm2353_vm15, %v2335_v53, %v2371_v38  ;;  %v2188_v21 = vadd.f32 %v2146_v39, %v2065_v31 }
 0x347   : > { %v2407_v24 = vmul.f32 1.4142135, %v2389_v52  ;;  %v1780_v45 = vpop.f32.mrf.mxu3 }
 0x348   : > { %v2314_v34 = vadd.f32 %v2235_v15, %v2188_v21  ;;  %v1821_v50 = vadd.f32 %v1780_v45, %v4261_v63  ;;  %v4399_v63 = vadd.f32 %v4340_v14, %v4356_v5  ;;  %v2255_v45 = vpop.permute.xlu2 %2254 }
 0x349   : > { %2426 = vst.msk [vmem:[%s4381_s20 + $0x8] sm:$0xff] %vm2424_vm12, %v2407_v24 }
 0x34a   : > { %v2025_v19 = vpop.f32.mrf.mxu1  ;;  %v2153_v23 = vpop.f32.mrf.mxu2  ;;  %v2336_v12 = vadd.f32 %v4369_v11, %v2314_v34  ;;  %v1913_v30 = vadd.f32 %v1872_v28, %v1821_v50 }
 0x34b   : > { %v1882_v3 = vpop.f32.mrf.mxu0 }
 0x34c   : > { %vm2354_vm11 = vcmp.ge.f32.partialorder %v2336_v12, 0.0  ;;  %v2372_v17 = vmul.f32 0.2, %v2336_v12  ;;  %v2066_v2 = vadd.f32 %v2025_v19, %v1913_v30 }
 0x34e   : > { %v2390_v39 = vsel %vm2354_vm11, %v2336_v12, %v2372_v17  ;;  %v2189_v62 = vadd.f32 %v2148_v26, %v2066_v2 }
 0x34f   : > { %v2408_v40 = vmul.f32 1.4142135, %v2390_v39  ;;  %v1783_v33 = vpop.f32.mrf.mxu3 }
 0x350   : > { %v1822_v25 = vadd.f32 %v1783_v33, %v4270_v22  ;;  %v2315_v32 = vadd.f32 %v2240_v55, %v2189_v62 }
 0x351   : > { %2427 = vst.msk [vmem:[%s4381_s20 + $0x10] sm:$0xff] %vm2424_vm12, %v2408_v40  ;;  %v2260_v40 = vpop.permute.xlu1 %2259 }
 0x352   : > { %v2028_v29 = vpop.f32.mrf.mxu1  ;;  %v2156_v28 = vpop.f32.mrf.mxu2  ;;  %v2337_v54 = vadd.f32 %v4369_v11, %v2315_v32  ;;  %v1914_v41 = vadd.f32 %v1875_v46, %v1822_v25 }
 0x353   : > { %v1885_v44 = vpop.f32.mrf.mxu0 }
 0x354   : > { %vm2355_vm13 = vcmp.ge.f32.partialorder %v2337_v54, 0.0  ;;  %v2373_v61 = vmul.f32 0.2, %v2337_v54  ;;  %v2067_v26 = vadd.f32 %v2028_v29, %v1914_v41 }
 0x356   : > { %v2391_v13 = vsel %vm2355_vm13, %v2337_v54, %v2373_v61  ;;  %v2190_v36 = vadd.f32 %v2151_v51, %v2067_v26 }
 0x357   : > { %v2409_v14 = vmul.f32 1.4142135, %v2391_v13  ;;  %v1785_v5 = vpop.f32.mrf.mxu3  ;;  %v2265_v13 = vpop.permute.xlu0 %2264 }
 0x358   : > { %v1823_v22 = vadd.f32 %v1785_v5, %v4282_v27  ;;  %v2316_v56 = vadd.f32 %v2245_v6, %v2190_v36 }
 0x359   : > { %2428 = vst.msk [vmem:[%s4381_s20 + $0x18] sm:$0xff] %vm2424_vm12, %v2409_v14 }
 0x35a   : > { %v2030_v60 = vpop.f32.mrf.mxu1  ;;  %v2158_v18 = vpop.f32.mrf.mxu2  ;;  %v2338_v16 = vadd.f32 %v4369_v11, %v2316_v56  ;;  %v1915_v46 = vadd.f32 %v1877_v20, %v1823_v22 }
 0x35b   : > { %v1887_v12 = vpop.f32.mrf.mxu0 }
 0x35c   : > { %vm2356_vm14 = vcmp.ge.f32.partialorder %v2338_v16, 0.0  ;;  %v2374_v47 = vmul.f32 0.2, %v2338_v16  ;;  %v2068_v42 = vadd.f32 %v2030_v60, %v1915_v46 }
 0x35e   : > { %v2392_v43 = vsel %vm2356_vm14, %v2338_v16, %v2374_v47  ;;  %v2191_v51 = vadd.f32 %v2153_v23, %v2068_v42 }
 0x35f   : > { %v2410_v53 = vmul.f32 1.4142135, %v2392_v43  ;;  %v1788_v59 = vpop.f32.mrf.mxu3 }
 0x360   : > { %v2317_v38 = vadd.f32 %v2250_v37, %v2191_v51  ;;  %v1824_v27 = vadd.f32 %v1788_v59, %v4291_v35 }
 0x361   : > { %2429 = vst.msk [vmem:[%s4381_s20 + $0x20] sm:$0xff] %vm2424_vm12, %v2410_v53 }
 0x362   : > { %v2033_v31 = vpop.f32.mrf.mxu1  ;;  %v2339_v15 = vadd.f32 %v4369_v11, %v2317_v38  ;;  %v1916_v52 = vadd.f32 %v1880_v10, %v1824_v27  ;;  %v2161_v20 = vpop.f32.mrf.mxu2 }
 0x363   : > { %v1890_v41 = vpop.f32.mrf.mxu0 }
 0x364   : > { %vm2357_vm0 = vcmp.ge.f32.partialorder %v2339_v15, 0.0  ;;  %v2375_v21 = vmul.f32 0.2, %v2339_v15  ;;  %v2069_v24 = vadd.f32 %v2033_v31, %v1916_v52 }
 0x366   : > { %v2393_v34 = vsel %vm2357_vm0, %v2339_v15, %v2375_v21  ;;  %v2192_v50 = vadd.f32 %v2156_v28, %v2069_v24  ;;  %v2275_v24 = vpop.permute.xlu1 %2274 }
 0x367   : > { %v2411_v19 = vmul.f32 1.4142135, %v2393_v34  ;;  %v1790_v23 = vpop.f32.mrf.mxu3 }
 0x368   : > { %v1825_v30 = vadd.f32 %v1790_v23, %v4305_v9  ;;  %v2318_v35 = vadd.f32 %v2255_v45, %v2192_v50 }
 0x369   : > { %2430 = vst.msk [vmem:[%s4381_s20 + $0x28] sm:$0xff] %vm2424_vm12, %v2411_v19 }
 0x36a   : > { %v2035_v55 = vpop.f32.mrf.mxu1  ;;  %v2340_v17 = vadd.f32 %v4369_v11, %v2318_v35  ;;  %v1917_v10 = vadd.f32 %v1882_v3, %v1825_v30  ;;  %v2163_v62 = vpop.f32.mrf.mxu2 }
 0x36b   : > { %v1892_v47 = vpop.f32.mrf.mxu0 }
 0x36c   : > { %vm2358_vm2 = vcmp.ge.f32.partialorder %v2340_v17, 0.0  ;;  %v2376_v2 = vmul.f32 0.2, %v2340_v17  ;;  %v2070_v39 = vadd.f32 %v2035_v55, %v1917_v10 }
 0x36e   : > { %v2394_v33 = vsel %vm2358_vm2, %v2340_v17, %v2376_v2  ;;  %v2193_v25 = vadd.f32 %v2158_v18, %v2070_v39  ;;  %v2280_v39 = vpop.permute.xlu0 %2279 }
 0x36f   : > { %v2412_v32 = vmul.f32 1.4142135, %v2394_v33  ;;  %v1793_v29 = vpop.f32.mrf.mxu3 }
 0x370   : > { %v2319_v28 = vadd.f32 %v2260_v40, %v2193_v25  ;;  %v1826_v9 = vadd.f32 %v1793_v29, %v4316_v48 }
 0x371   : > { %2431 = vst.msk [vmem:[%s4381_s20 + $0x30] sm:$0xff] %vm2424_vm12, %v2412_v32 }
 0x372   : > { %v2038_v54 = vpop.f32.mrf.mxu1  ;;  %v2341_v61 = vadd.f32 %v4369_v11, %v2319_v28  ;;  %v1918_v3 = vadd.f32 %v1885_v44, %v1826_v9  ;;  %v2166_v22 = vpop.f32.mrf.mxu2 }
 0x373   : > { %v2270_v44 = vpop.permute.xlu2 %2269  ;;  %v1895_v45 = vpop.f32.mrf.mxu0 }
 0x374   : > { %vm2359_vm4 = vcmp.ge.f32.partialorder %v2341_v61, 0.0  ;;  %v2377_v26 = vmul.f32 0.2, %v2341_v61  ;;  %v2071_v6 = vadd.f32 %v2038_v54, %v1918_v3 }
 0x376   : > { %v2395_v36 = vsel %vm2359_vm4, %v2341_v61, %v2377_v26  ;;  %v2194_v14 = vadd.f32 %v2161_v20, %v2071_v6 }
 0x377   : > { %v2413_v5 = vmul.f32 1.4142135, %v2395_v36  ;;  %v1795_v56 = vpop.f32.mrf.mxu3 }
 0x378   : > { %v2320_v60 = vadd.f32 %v2265_v13, %v2194_v14  ;;  %v1827_v48 = vadd.f32 %v1795_v56, %v4328_v8 }
 0x379   : > { %2432 = vst.msk [vmem:[%s4381_s20 + $0x38] sm:$0xff] %vm2424_vm12, %v2413_v5 }
 0x37a   : > { %v2040_v18 = vpop.f32.mrf.mxu1  ;;  %v2342_v16 = vadd.f32 %v4369_v11, %v2320_v60  ;;  %v1919_v46 = vadd.f32 %v1887_v12, %v1827_v48  ;;  %v2168_v8 = vpop.f32.mrf.mxu2 }
 0x37b   : > { %v1897_v32 = vpop.f32.mrf.mxu0  ;;  %v2285_v13 = vpop.permute.xlu2 %2284 }
 0x37c   : > { %vm2360_vm5 = vcmp.ge.f32.partialorder %v2342_v16, 0.0  ;;  %v2378_v42 = vmul.f32 0.2, %v2342_v16  ;;  %v2072_v37 = vadd.f32 %v2040_v18, %v1919_v46  ;;  %v2290_v46 = vpop.permute.xlu1 %2289 }
 0x37e   : > { %v2396_v43 = vsel %vm2360_vm5, %v2342_v16, %v2378_v42  ;;  %v2195_v51 = vadd.f32 %v2163_v62, %v2072_v37 }
 0x37f   : > { %v2414_v53 = vmul.f32 1.4142135, %v2396_v43  ;;  %v1798_v59 = vpop.f32.mrf.mxu3 }
 0x380   : > { %v1828_v38 = vadd.f32 %v1798_v59, %v4337_v0  ;;  %v2321_v27 = vadd.f32 %v2270_v44, %v2195_v51 }
 0x381   : > { %2433 = vst.msk [vmem:[%s4381_s20 + $0x40] sm:$0xff] %vm2424_vm12, %v2414_v53 }
 0x382   : > { %v2043_v31 = vpop.f32.mrf.mxu1  ;;  %v2343_v15 = vadd.f32 %v4369_v11, %v2321_v27  ;;  %v1920_v52 = vadd.f32 %v1890_v41, %v1828_v38  ;;  %v2171_v17 = vpop.f32.mrf.mxu2 }
 0x383   : > { %v1900_v56 = vpop.f32.mrf.mxu0 }
 0x384   : > { %vm2361_vm6 = vcmp.ge.f32.partialorder %v2343_v15, 0.0  ;;  %v2379_v20 = vmul.f32 0.2, %v2343_v15  ;;  %v2073_v21 = vadd.f32 %v2043_v31, %v1920_v52 }
 0x386   : > { %v2397_v34 = vsel %vm2361_vm6, %v2343_v15, %v2379_v20  ;;  %v2196_v50 = vadd.f32 %v2166_v22, %v2073_v21  ;;  %v2295_v20 = vpop.permute.xlu0 %2294 }
 0x387   : > { %v2415_v19 = vmul.f32 1.4142135, %v2397_v34  ;;  %v1800_v23 = vpop.f32.mrf.mxu3 }
 0x388   : > { %v2322_v12 = vadd.f32 %v2275_v24, %v2196_v50  ;;  %v1829_v0 = vadd.f32 %v1800_v23, %v4347_v49 }
 0x389   : > { %2434 = vst.msk [vmem:[%s4381_s20 + $0x48] sm:$0xff] %vm2424_vm12, %v2415_v19 }
 0x38a   : > { %v2045_v30 = vpop.f32.mrf.mxu1  ;;  %v2344_v35 = vadd.f32 %v4369_v11, %v2322_v12  ;;  %v1921_v55 = vadd.f32 %v1892_v47, %v1829_v0  ;;  %v2173_v3 = vpop.f32.mrf.mxu2 }
 0x38b   : > { %v1902_v27 = vpop.f32.mrf.mxu0 }
 0x38c   : > { %vm2362_vm7 = vcmp.ge.f32.partialorder %v2344_v35, 0.0  ;;  %v2380_v10 = vmul.f32 0.2, %v2344_v35  ;;  %v2074_v2 = vadd.f32 %v2045_v30, %v1921_v55 }
 0x38e   : > { %v2398_v62 = vsel %vm2362_vm7, %v2344_v35, %v2380_v10  ;;  %v2197_v40 = vadd.f32 %v2168_v8, %v2074_v2 }
 0x38f   : > { %v2416_v33 = vmul.f32 1.4142135, %v2398_v62  ;;  %v1803_v25 = vpop.f32.mrf.mxu3 }
 0x390   : > { %v2323_v29 = vadd.f32 %v2280_v39, %v2197_v40  ;;  %v1830_v49 = vadd.f32 %v1803_v25, %v4353_v1 }
 0x391   : > { %2435 = vst.msk [vmem:[%s4381_s20 + $0x50] sm:$0xff] %vm2424_vm12, %v2416_v33 }
 0x392   : > { %v2048_v28 = vpop.f32.mrf.mxu1  ;;  %v2345_v9 = vadd.f32 %v4369_v11, %v2323_v29  ;;  %v1922_v54 = vadd.f32 %v1895_v45, %v1830_v49  ;;  %v2176_v44 = vpop.f32.mrf.mxu2 }
 0x393   : > { %v1905_v30 = vpop.f32.mrf.mxu0 }
 0x394   : > { %vm2363_vm8 = vcmp.ge.f32.partialorder %v2345_v9, 0.0  ;;  %v2381_v41 = vmul.f32 0.2, %v2345_v9  ;;  %v2075_v61 = vadd.f32 %v2048_v28, %v1922_v54 }
 0x396   : > { %v2399_v26 = vsel %vm2363_vm8, %v2345_v9, %v2381_v41  ;;  %v2198_v6 = vadd.f32 %v2171_v17, %v2075_v61  ;;  %v2300_v17 = vpop.permute.xlu2 %2299  ;;  %v2305_v9 = vpop.permute.xlu1 %2304 }
 0x397   : > { %v2417_v36 = vmul.f32 1.4142135, %v2399_v26  ;;  %v1805_v14 = vpop.f32.mrf.mxu3 }
 0x398   : > { %v2324_v5 = vadd.f32 %v2285_v13, %v2198_v6  ;;  %v1831_v22 = vadd.f32 %v1805_v14, %v4361_v58 }
 0x399   : > { %2436 = vst.msk [vmem:[%s4381_s20 + $0x58] sm:$0xff] %vm2424_vm12, %v2417_v36 }
 0x39a   : > { %v2050_v1 = vpop.f32.mrf.mxu1  ;;  %v2346_v60 = vadd.f32 %v4369_v11, %v2324_v5  ;;  %v1923_v48 = vadd.f32 %v1897_v32, %v1831_v22 }
 0x39c   : > { %vm2364_vm3 = vcmp.ge.f32.partialorder %v2346_v60, 0.0  ;;  %v2382_v18 = vmul.f32 0.2, %v2346_v60  ;;  %v2076_v16 = vadd.f32 %v2050_v1, %v1923_v48 }
 0x39e   : > { %v2400_v47 = vsel %vm2364_vm3, %v2346_v60, %v2382_v18  ;;  %v2199_v42 = vadd.f32 %v2173_v3, %v2076_v16  ;;  %v1907_v3 = vpop.f32.mrf.mxu0 }
 0x39f   : > { %v2418_v37 = vmul.f32 1.4142135, %v2400_v47  ;;  %v1808_v43 = vpop.f32.mrf.mxu3 }
 0x3a0   : > { %v2325_v51 = vadd.f32 %v2290_v46, %v2199_v42  ;;  %v1832_v58 = vadd.f32 %v1808_v43, %v4372_v4  ;;  %v2178_v4 = vpop.f32.mrf.mxu2 }
 0x3a1   : > { %2437 = vst.msk [vmem:[%s4381_s20 + $0x60] sm:$0xff] %vm2424_vm12, %v2418_v37 }
 0x3a2   : > { %v2053_v53 = vpop.f32.mrf.mxu1  ;;  %v2347_v59 = vadd.f32 %v4369_v11, %v2325_v51  ;;  %v1924_v38 = vadd.f32 %v1900_v56, %v1832_v58  ;;  %v2310_v56 = vpop.permute.xlu0 %2309 }
 0x3a4   : > { %vm2365_vm9 = vcmp.ge.f32.partialorder %v2347_v59, 0.0  ;;  %v2383_v8 = vmul.f32 0.2, %v2347_v59  ;;  %v2077_v31 = vadd.f32 %v2053_v53, %v1924_v38 }
 0x3a6   : > { %v2401_v15 = vsel %vm2365_vm9, %v2347_v59, %v2383_v8  ;;  %v2200_v52 = vadd.f32 %v2176_v44, %v2077_v31 }
 0x3a7   : > { %v2419_v21 = vmul.f32 1.4142135, %v2401_v15  ;;  %v1810_v24 = vpop.f32.mrf.mxu3 }
 0x3a8   : > { %v2326_v45 = vadd.f32 %v2295_v20, %v2200_v52  ;;  %v1833_v34 = vadd.f32 %v1810_v24, %v4384_v7  ;;  %v2181_v25 = vpop.f32.mrf.mxu2 }
 0x3a9   : > { %2438 = vst.msk [vmem:[%s4381_s20 + $0x68] sm:$0xff] %vm2424_vm12, %v2419_v21 }
 0x3aa   : > { %v2055_v50 = vpop.f32.mrf.mxu1  ;;  %v2348_v19 = vadd.f32 %v4369_v11, %v2326_v45  ;;  %v1925_v23 = vadd.f32 %v1902_v27, %v1833_v34 }
 0x3ac   : > { %vm2366_vm10 = vcmp.ge.f32.partialorder %v2348_v19, 0.0  ;;  %v2384_v12 = vmul.f32 0.2, %v2348_v19  ;;  %v2078_v0 = vadd.f32 %v2055_v50, %v1925_v23 }
 0x3ae   : > { %v2402_v35 = vsel %vm2366_vm10, %v2348_v19, %v2384_v12  ;;  %v2201_v55 = vadd.f32 %v2178_v4, %v2078_v0 }
 0x3af   : > { %v2420_v10 = vmul.f32 1.4142135, %v2402_v35  ;;  %v1813_v2 = vpop.f32.mrf.mxu3 }
 0x3b0   : > { %v2327_v39 = vadd.f32 %v2300_v17, %v2201_v55  ;;  %v1834_v7 = vadd.f32 %v1813_v2, %v4391_v57  ;;  %v2183_v5 = vpop.f32.mrf.mxu2 }
 0x3b1   : > { %2439 = vst.msk [vmem:[%s4381_s20 + $0x70] sm:$0xff] %vm2424_vm12, %v2420_v10 }
 0x3b2   : > { %v2058_v62 = vpop.f32.mrf.mxu1  ;;  %v2349_v40 = vadd.f32 %v4369_v11, %v2327_v39  ;;  %v1926_v33 = vadd.f32 %v1905_v30, %v1834_v7 }
 0x3b4   : > { %vm2367_vm1 = vcmp.ge.f32.partialorder %v2349_v40, 0.0  ;;  %v2385_v32 = vmul.f32 0.2, %v2349_v40  ;;  %v2079_v29 = vadd.f32 %v2058_v62, %v1926_v33 }
 0x3b6   : > { %v2403_v49 = vsel %vm2367_vm1, %v2349_v40, %v2385_v32  ;;  %v2202_v28 = vadd.f32 %v2181_v25, %v2079_v29 }
 0x3b7   : > { %v2421_v54 = vmul.f32 1.4142135, %v2403_v49  ;;  %v1815_v41 = vpop.f32.mrf.mxu3 }
 0x3b8   : > { %v2328_v61 = vadd.f32 %v2305_v9, %v2202_v28  ;;  %v1835_v57 = vadd.f32 %v1815_v41, %v4399_v63 }
 0x3b9   : > { %2440 = vst.msk [vmem:[%s4381_s20 + $0x78] sm:$0xff] %vm2424_vm12, %v2421_v54 }
 0x3ba   : > { %v2350_v26 = vadd.f32 %v4369_v11, %v2328_v61  ;;  %v1927_v6 = vadd.f32 %v1907_v3, %v1835_v57  ;;  %v2060_v13 = vpop.f32.mrf.mxu1 }
 0x3bc   : > { %vm2368_vm15 = vcmp.ge.f32.partialorder %v2350_v26, 0.0  ;;  %v2386_v36 = vmul.f32 0.2, %v2350_v26  ;;  %v2080_v14 = vadd.f32 %v2060_v13, %v1927_v6 }
 0x3be   : > { %v2404_v22 = vsel %vm2368_vm15, %v2350_v26, %v2386_v36  ;;  %v2203_v1 = vadd.f32 %v2183_v5, %v2080_v14 }
 0x3bf   : > { %v2422_v60 = vmul.f32 1.4142135, %v2404_v22 }
 0x3c0   : > { %v2329_v48 = vadd.f32 %v2310_v56, %v2203_v1 }
 0x3c1   : > { %2441 = vst.msk [vmem:[%s4381_s20 + $0x80] sm:$0xff] %vm2424_vm12, %v2422_v60 }
 0x3c2   : > { %v2351_v63 = vadd.f32 %v4369_v11, %v2329_v48 }
 0x3c4   : > { %vm2369_vm11 = vcmp.ge.f32.partialorder %v2351_v63, 0.0  ;;  %v2387_v18 = vmul.f32 0.2, %v2351_v63 }
 0x3c6   : > { %v2405_v16 = vsel %vm2369_vm11, %v2351_v63, %v2387_v18 }
 0x3c7   : > { %v2423_v46 = vmul.f32 1.4142135, %v2405_v16 }
 0x3c9   : > { %2442 = vst.msk [vmem:[%s4381_s20 + $0x88] sm:$0xff] %vm2424_vm12, %v2423_v46 }
 0x3ca PF: > { %s17_s28 = sadd.s32 1, %s2888_s28   ;;  %s4549_s24 = smov %s2880_s26 }
 0x3cb   : > { %p14_p7 = scmp.ge.s32.totalorder %s17_s28, 6   ;;  %s4550_s25 = smov %s2884_s27 }
 0x3cc   : > { %s4551_s26 = smov %s4554_s29  ;;  %s4552_s27 = smov %s4558_s30 }
 0x3cd   :  { %16 = sbr.rel (!%p14_p7) target bundleno = 3 (0x3), region = 84 }

// kernel: tpu_custom_call.1
= control target key start
LH: loop header
LB: loop body
LE: loop exit
PB: predicated region body
PF: predicated region fallthrough
CT: control target
= control target key end

     0   :  { %s2932_s24 = smov 0   ;;  %s2934_s25 = smov 0   ;;  %s4477_s0 = inlined_call_operand.vmem [shape: bf16[2,2,184,32], index: 0, kind: input, shape index: {}]   ;;  %s4478_s1 = inlined_call_operand.vmem [shape: f32[2,2,184,8], index: 1, kind: input, shape index: {}]   ;;  %s4479_s2 = inlined_call_operand.vmem [shape: f32[2,2,144,1], index: 2, kind: input, shape index: {}]   ;;  %s4480_s3 = inlined_call_operand.vmem [shape: bf16[32,8], index: 3, kind: input, shape index: {}]   ;;  %s4481_s4 = inlined_call_operand.vmem [shape: f32[1,8], index: 4, kind: input, shape index: {}]   ;;  %s4482_s5 = inlined_call_operand.vmem [shape: bf16[72,16], index: 5, kind: input, shape index: {}]   ;;  %s4483_s6 = inlined_call_operand.vmem [shape: f32[1,16], index: 6, kind: input, shape index: {}]   ;;  %s4484_s7 = inlined_call_operand.vmem [shape: f32[2,2,144,16], index: 7, kind: output, shape index: {}]  }
   0x1   :  { %s2936_s26 = smov 0   ;;  %s2938_s27 = smov 0  }
   0x2   :  { %s2940_s28 = smov 0  }
   0x3 LB: > { %s26_s29 = sadd.s32 1, %s2880_s26  ;;  %s29_s30 = sadd.s32 1, %s2884_s27  ;;  %s2888_s28 = sphi %s2940_s28, %s17_s28   ;;  %s2884_s27 = sphi %s2938_s27, %s4552_s27   ;;  %s2880_s26 = sphi %s2936_s26, %s4551_s26   ;;  %s2876_s25 = sphi %s2934_s25, %s4550_s25   ;;  %s2872_s24 = sphi %s2932_s24, %s4549_s24  }
   0x4   : > { %p27_p0 = scmp.ge.s32.totalorder %s26_s29, 2  ;;  %p2584_p1 = scmp.ge.s32.totalorder %s2888_s28, 1 }
   0x5   : > { %p289_p2 = scmp.lt.s32.totalorder %s2888_s28, 5 }
   0x6   : > { %s4554_s29 = smov (%p27_p0, %s26_s29), 0  ;;  %s4556_s30 = smov (!%p27_p0, %s29_s30), %s2884_s27 }
   0x7   : > { %p290_p3 = pnand %p2584_p1, %p289_p2  ;;  %p31_p4 = scmp.ge.s32.totalorder %s4556_s30, 2 }
   0x9   : > { %s4558_s30 = smov (%p31_p4, %s4556_s30), 0  ;;  %293 = sbr.rel (%p290_p3) target bundleno = 970 (0x3ca), region = 48 }
   0xe   : > { %v2748_v0 = vld [vmem:[%s4480_s3 + $0x8] sm:$0xff]  ;;  %p347_p5 = scmp.lt.s32.totalorder %s2876_s25, 1  ;;  %p349_p6 = scmp.lt.s32.totalorder %s2872_s24, 1  ;;  %v2747_v1 = vld [vmem:[%s4480_s3] sm:$0xff]  ;;  %vm485_vm0 = vcmask 261120   ;;  %vm613_vm1 = vcmask 64512  }
   0xf   : > { %528 = vmatpush.bf16.msra.mxu0 %v2748_v0  ;;  %v3001_v10 = vld [vmem:[%s4481_s4] ss:$0 sm:$0xff]  ;;  %v2890_v35 = vmov 8.0   ;;  %vm1212_vm3 = vcmask 1043456  }
  0x10   : > { %s4560_s25 = smov (!%p347_p5, %s2876_s25), 1  ;;  %s4562_s24 = smov (!%p349_p6, %s2872_s24), 1  ;;  %2802 = vrcp.f32 %v2890_v35 }
  0x11   : > { %s2752_s12 = smul.u32 46, %s4560_s25 }
  0x12   : > { %s2751_s13 = smul.u32 23, %s4562_s24 }
  0x13   : > { %529 = vmatpush.bf16.msra.mxu0 %v2747_v1  ;;  %v1058_v1 = vld [vmem:[%s4482_s5] sm:$0xf] }
  0x14   : > { %s2974_s14 = sadd.s32 %s2752_s12, %s2751_s13  ;;  %s2754_s12 = smul.u32 36, %s4560_s25 }
  0x15   : > { %s2585_s15 = sshll.u32 %s2974_s14, 2  ;;  %s2586_s23 = sshll.u32 %s2974_s14, 3 }
  0x16   : > { %s2980_s18 = scalar_lea.vmem %s4477_s0, %s2585_s15  ;;  %v2803_v39 = vpop.eup %2802  ;;  %s3121_s10 = scalar_lea.vmem %s4478_s1, %s2586_s23 }
  0x17   : > { %v2736_v2 = vld [vmem:[%s2980_s18] sm:$0xff]  ;;  %v2737_v3 = vld [vmem:[%s2980_s18 + $0x8] sm:$0xff]  ;;  %v2738_v4 = vld [vmem:[%s2980_s18 + $0x10] sm:$0xff]  ;;  %v684_v41 = vmul.f32 8.0, %v2803_v39  ;;  %vm688_vm2 = vweird.f32 %v2803_v39 }
  0x18   : > { %2641 = vmatmul.msk.bf16.vlgmr.msra.gmra.mxu0 %vm485_vm0, %v2736_v2  ;;  %v2739_v5 = vld [vmem:[%s2980_s18 + $0x18] sm:$0xff]  ;;  %v2740_v6 = vld [vmem:[%s2980_s18 + $0x20] sm:$0xff]  ;;  %v2741_v7 = vld [vmem:[%s2980_s18 + $0x28] sm:$0xff]  ;;  %v3077_v2 = vsel %vm1212_vm3, %v1058_v1, 0 }
  0x19   : > { %v2742_v8 = vld [vmem:[%s2980_s18 + $0x30] sm:$0xff]  ;;  %v2743_v9 = vld [vmem:[%s2980_s18 + $0x38] sm:$0xff]  ;;  %v2744_v11 = vld [vmem:[%s2980_s18 + $0x40] sm:$0xff]  ;;  %v685_v45 = vsub.f32 1.0, %v684_v41  ;;  %1298 = vmatpush.bf16.msra.mxu2 %v3077_v2 }
  0x1a   : > { %v2745_v20 = vld [vmem:[%s2980_s18 + $0x48] sm:$0xff]  ;;  %v2746_v23 = vld [vmem:[%s2980_s18 + $0x50] sm:$0xff]  ;;  %v406_v26 = vld [vmem:[%s2980_s18 + $0x58] sm:$0xf] }
  0x1b   : > { %v460_v27 = vunpack.c.l.b16 %v406_v26  ;;  %v686_v48 = vmul.f32 %v2803_v39, %v685_v45 }
  0x1d   : > { %v472_v29 = vpack.c.b16 %v460_v27, %v460_v27  ;;  %v687_v53 = vadd.f32 %v2803_v39, %v686_v48 }
  0x1f   : > { %v3061_v56 = vsel %vm688_vm2, %v2803_v39, %v687_v53  ;;  %v989_v53 = vld [vmem:[%s3121_s10] sm:$0xff] }
  0x28   : > { %2642 = vmatmul.msk.bf16.gmra.mxu0 %vm485_vm0, %v2737_v3 }
  0x38   : > { %2643 = vmatmul.msk.bf16.gmra.mxu0 %vm485_vm0, %v2738_v4 }
  0x48   : > { %2644 = vmatmul.msk.bf16.gmra.mxu0 %vm485_vm0, %v2739_v5 }
  0x58   : > { %2645 = vmatmul.msk.bf16.gmra.mxu0 %vm485_vm0, %v2740_v6 }
  0x68   : > { %2646 = vmatmul.msk.bf16.gmra.mxu0 %vm485_vm0, %v2741_v7 }
  0x78   : > { %2647 = vmatmul.msk.bf16.gmra.mxu0 %vm485_vm0, %v2742_v8 }
  0x88   : > { %2648 = vmatmul.msk.bf16.gmra.mxu0 %vm485_vm0, %v2743_v9 }
  0x95   : > { %v531_v12 = vpop.f32.mrf.mxu0 }
  0x96   : > { %v3005_v13 = vadd.f32 %v3001_v10, %v531_v12 }
  0x98   : > { %2649 = vmatmul.msk.bf16.gmra.mxu0 %vm485_vm0, %v2744_v11  ;;  %v590_v14 = vmul.f32 %v3005_v13, %v3005_v13 }
  0x9a   : > { %v614_v15 = vsel %vm613_vm1, %v590_v14, 0.0 }
  0x9b   : > { %615 = vadd.xlane.f32.xlu2 %v614_v15 }
  0x9d   : > { %v533_v16 = vpop.f32.mrf.mxu0 }
  0x9e   : > { %v3012_v17 = vadd.f32 %v3001_v10, %v533_v16 }
  0xa0   : > { %v591_v18 = vmul.f32 %v3012_v17, %v3012_v17 }
  0xa2   : > { %v617_v19 = vsel %vm613_vm1, %v591_v18, 0.0 }
  0xa3   : > { %618 = vadd.xlane.f32.xlu2 %v617_v19 }
  0xa5   : > { %v536_v21 = vpop.f32.mrf.mxu0 }
  0xa6   : > { %v3049_v46 = vadd.f32 %v3001_v10, %v536_v21 }
  0xa8   : > { %2650 = vmatmul.msk.bf16.gmra.mxu0 %vm485_vm0, %v2745_v20  ;;  %v592_v51 = vmul.f32 %v3049_v46, %v3049_v46 }
  0xaa   : > { %v620_v55 = vsel %vm613_vm1, %v592_v51, 0.0 }
  0xad   : > { %v538_v22 = vpop.f32.mrf.mxu0 }
  0xae   : > { %v3070_v63 = vadd.f32 %v3001_v10, %v538_v22 }
  0xb0   : > { %v593_v6 = vmul.f32 %v3070_v63, %v3070_v63 }
  0xb2   : > { %v623_v15 = vsel %vm613_vm1, %v593_v6, 0.0 }
  0xb5   : > { %v541_v24 = vpop.f32.mrf.mxu0 }
  0xb6   : > { %v3089_v11 = vadd.f32 %v3001_v10, %v541_v24 }
  0xb8   : > { %2651 = vmatmul.msk.bf16.gmra.mxu0 %vm485_vm0, %v2746_v23  ;;  %v594_v21 = vmul.f32 %v3089_v11, %v3089_v11 }
  0xba   : > { %v626_v35 = vsel %vm613_vm1, %v594_v21, 0.0 }
  0xbd   : > { %v3021_v25 = vpop.f32.mrf.mxu0 }
  0xbe   : > { %v3095_v18 = vadd.f32 %v3001_v10, %v3021_v25 }
  0xc0   : > { %v595_v24 = vmul.f32 %v3095_v18, %v3095_v18 }
  0xc2   : > { %v629_v41 = vsel %vm613_vm1, %v595_v24, 0.0 }
  0xc5   : > { %v3024_v28 = vpop.f32.mrf.mxu0 }
  0xc8   : > { %2652 = vmatmul.msk.bf16.gmra.mxu0 %vm485_vm0, %v472_v29  ;;  %v3108_v29 = vadd.f32 %v3001_v10, %v3024_v28 }
  0xca   : > { %v596_v45 = vmul.f32 %v3108_v29, %v3108_v29 }
  0xcd   : > { %v3027_v30 = vpop.f32.mrf.mxu0 }
  0xd5   : > { %v3029_v31 = vpop.f32.mrf.mxu0 }
  0xdd   : > { %v3031_v32 = vpop.f32.mrf.mxu0 }
  0xe5   : > { %v3033_v33 = vpop.f32.mrf.mxu0 }
  0xed   : > { %v3035_v34 = vpop.f32.mrf.mxu0 }
  0xf5   : > { %v561_v36 = vpop.f32.mrf.mxu0 }
  0xf6   : > { %v3038_v37 = vadd.f32 %v3001_v10, %v561_v36 }
  0xf8   : > { %v602_v38 = vmul.f32 %v3038_v37, %v3038_v37 }
  0xfa   : > { %v650_v40 = vsel %vm613_vm1, %v602_v38, 0.0 }
  0xfb   : > { %651 = vadd.xlane.f32.xlu0 %v650_v40  ;;  %v3115_v40 = vadd.f32 %v3001_v10, %v3027_v30 }
  0xfd   : > { %v563_v42 = vpop.f32.mrf.mxu0 }
  0xfe   : > { %v3044_v43 = vadd.f32 %v3001_v10, %v563_v42 }
 0x100   : > { %v603_v44 = vmul.f32 %v3044_v43, %v3044_v43 }
 0x102   : > { %v653_v47 = vsel %vm613_vm1, %v603_v44, 0.0 }
 0x103   : > { %654 = vadd.xlane.f32.xlu0 %v653_v47 }
 0x105   : > { %v566_v49 = vpop.f32.mrf.mxu0 }
 0x106   : > { %v3053_v50 = vadd.f32 %v3001_v10, %v566_v49  ;;  %v597_v49 = vmul.f32 %v3115_v40, %v3115_v40 }
 0x108   : > { %v604_v52 = vmul.f32 %v3053_v50, %v3053_v50 }
 0x10a   : > { %v656_v54 = vsel %vm613_vm1, %v604_v52, 0.0 }
 0x10b   : > { %657 = vadd.xlane.f32.xlu1 %v656_v54  ;;  %621 = vadd.xlane.f32.xlu0 %v620_v55  ;;  %v3136_v54 = vadd.f32 %v3001_v10, %v3029_v31  ;;  %v632_v55 = vsel %vm613_vm1, %v596_v45, 0.0  ;;  %v635_v31 = vsel %vm613_vm1, %v597_v49, 0.0 }
 0x10d   : > { %v568_v57 = vpop.f32.mrf.mxu0 }
 0x10e   : > { %v3064_v58 = vadd.f32 %v3001_v10, %v568_v57  ;;  %v616_v59 = vpop.xlane.xlu2 %615  ;;  %v3141_v57 = vadd.f32 %v3001_v10, %v3031_v32 }
 0x10f   : > { %v690_v60 = vmul.f32 %v3061_v56, %v616_v59 }
 0x110   : > { %v605_v61 = vmul.f32 %v3064_v58, %v3064_v58 }
 0x111   : > { %v713_v62 = vadd.f32 1e-08, %v690_v60  ;;  %v3146_v60 = vadd.f32 %v3001_v10, %v3033_v33 }
 0x112   : > { %v659_v0 = vsel %vm613_vm1, %v605_v61, 0.0 }
 0x113   : > { %2804 = vrsqrt.f32 %v713_v62  ;;  %660 = vadd.xlane.f32.xlu1 %v659_v0  ;;  %vm742_vm5 = vweird.f32 %v713_v62  ;;  %v990_v0 = vld [vmem:[%s3121_s10 + $0x8] sm:$0xff]  ;;  %v600_v33 = vmul.f32 %v3146_v60, %v3146_v60 }
 0x115   : > { %v571_v3 = vpop.f32.mrf.mxu0 }
 0x116   : > { %v3081_v4 = vadd.f32 %v3001_v10, %v571_v3  ;;  %v619_v5 = vpop.xlane.xlu2 %618  ;;  %v599_v3 = vmul.f32 %v3141_v57, %v3141_v57 }
 0x117   : > { %v691_v7 = vmul.f32 %v3061_v56, %v619_v5  ;;  %v598_v5 = vmul.f32 %v3136_v54, %v3136_v54 }
 0x118   : > { %v606_v8 = vmul.f32 %v3081_v4, %v3081_v4 }
 0x119   : > { %v2805_v9 = vpop.eup %2804  ;;  %v714_v12 = vadd.f32 1e-08, %v691_v7 }
 0x11a   : > { %v737_v14 = vmul.f32 %v2805_v9, %v713_v62  ;;  %v662_v16 = vsel %vm613_vm1, %v606_v8, 0.0  ;;  %vm743_vm4 = vweird.f32 %v2805_v9 }
 0x11b   : > { %2806 = vrsqrt.f32 %v714_v12  ;;  %624 = vadd.xlane.f32.xlu1 %v623_v15  ;;  %663 = vadd.xlane.f32.xlu2 %v662_v16  ;;  %vm744_vm6 = vmor %vm742_vm5, %vm743_vm4  ;;  %vm752_vm8 = vweird.f32 %v714_v12  ;;  %v644_v15 = vsel %vm613_vm1, %v600_v33, 0.0 }
 0x11c   : > { %v738_v19 = vmul.f32 %v2805_v9, %v737_v14  ;;  %v638_v14 = vsel %vm613_vm1, %v598_v5, 0.0 }
 0x11d   : > { %v573_v20 = vpop.f32.mrf.mxu0 }
 0x11e   : > { %v739_v22 = vmul.f32 0.5, %v738_v19  ;;  %v3100_v23 = vadd.f32 %v3001_v10, %v573_v20 }
 0x120   : > { %v740_v26 = vsub.f32 1.5, %v739_v22  ;;  %v607_v25 = vmul.f32 %v3100_v23, %v3100_v23 }
 0x121   : > { %v2807_v27 = vpop.eup %2806 }
 0x122   : > { %v741_v36 = vmul.f32 %v2805_v9, %v740_v26  ;;  %v747_v38 = vmul.f32 %v2807_v27, %v714_v12  ;;  %v665_v39 = vsel %vm613_vm1, %v607_v25, 0.0  ;;  %vm753_vm7 = vweird.f32 %v2807_v27 }
 0x123   : > { %627 = vadd.xlane.f32.xlu1 %v626_v35  ;;  %666 = vadd.xlane.f32.xlu0 %v665_v39  ;;  %vm754_vm9 = vmor %vm752_vm8, %vm753_vm7 }
 0x124   : > { %v745_v42 = vsel %vm744_vm6, %v2805_v9, %v741_v36  ;;  %v748_v28 = vmul.f32 %v2807_v27, %v747_v38  ;;  %630 = vadd.xlane.f32.xlu2 %v629_v41  ;;  %v3159_v9 = vadd.f32 %v3001_v10, %v3035_v34 }
 0x125   : > { %v576_v44 = vpop.f32.mrf.mxu0  ;;  %v966_v48 = vmul.f32 %v745_v42, %v3005_v13 }
 0x126   : > { %v749_v30 = vmul.f32 0.5, %v748_v28  ;;  %v3126_v47 = vadd.f32 %v3001_v10, %v576_v44  ;;  %v601_v24 = vmul.f32 %v3159_v9, %v3159_v9 }
 0x127   : > { %v1012_v61 = vmul.f32 %v989_v53, %v966_v48 }
 0x128   : > { %v750_v51 = vsub.f32 1.5, %v749_v30  ;;  %v608_v52 = vmul.f32 %v3126_v47, %v3126_v47 }
 0x129   : > { %v1035_v7 = vpack.c.bf16 %v1012_v61, %v1012_v61 }
 0x12a   : > { %v751_v13 = vmul.f32 %v2807_v27, %v750_v51  ;;  %v668_v59 = vsel %vm613_vm1, %v608_v52, 0.0 }
 0x12b   : > { %633 = vadd.xlane.f32.xlu1 %v632_v55  ;;  %669 = vadd.xlane.f32.xlu0 %v668_v59  ;;  %v1079_v16 = vunpack.c.l.b16 %v1035_v7 }
 0x12c   : > { %v755_v62 = vsel %vm754_vm9, %v2807_v27, %v751_v13  ;;  %636 = vadd.xlane.f32.xlu2 %v635_v31  ;;  %v647_v27 = vsel %vm613_vm1, %v601_v24, 0.0 }
 0x12d   : > { %v967_v32 = vmul.f32 %v755_v62, %v3012_v17  ;;  %v578_v1 = vpop.f32.mrf.mxu0  ;;  %v641_v17 = vsel %vm613_vm1, %v599_v3, 0.0 }
 0x12e   : > { %v3162_v12 = vadd.f32 %v3001_v10, %v578_v1 }
 0x12f   : > { %v1013_v6 = vmul.f32 %v990_v0, %v967_v32 }
 0x130   : > { %v609_v22 = vmul.f32 %v3162_v12, %v3162_v12 }
 0x131   : > { %v1036_v8 = vpack.c.bf16 %v1013_v6, %v1013_v6 }
 0x132   : > { %v671_v25 = vsel %vm613_vm1, %v609_v22, 0.0 }
 0x133   : > { %642 = vadd.xlane.f32.xlu1 %v641_v17  ;;  %639 = vadd.xlane.f32.xlu0 %v638_v14  ;;  %v1080_v19 = vunpack.c.l.b16 %v1036_v8 }
 0x134   : > { %645 = vadd.xlane.f32.xlu2 %v644_v15 }
 0x135   : > { %v581_v20 = vpop.f32.mrf.mxu0  ;;  %v3167_v21 = vpack.c.b16 %v1080_v19, %v1079_v16 }
 0x136   : > { %v3170_v34 = vadd.f32 %v3001_v10, %v581_v20 }
 0x137   : > { %2662 = vmatmul.msk.bf16.vlgmr.msra.gmra.mxu2 %vm613_vm1, %v3167_v21 }
 0x138   : > { %v610_v26 = vmul.f32 %v3170_v34, %v3170_v34 }
 0x13a   : > { %v674_v35 = vsel %vm613_vm1, %v610_v26, 0.0 }
 0x13b   : > { %672 = vadd.xlane.f32.xlu1 %v671_v25  ;;  %648 = vadd.xlane.f32.xlu0 %v647_v27 }
 0x13c   : > { %675 = vadd.xlane.f32.xlu2 %v674_v35 }
 0x13d   : > { %v583_v36 = vpop.f32.mrf.mxu0 }
 0x13e   : > { %v3184_v38 = vadd.f32 %v3001_v10, %v583_v36 }
 0x140   : > { %v611_v39 = vmul.f32 %v3184_v38, %v3184_v38 }
 0x142   : > { %v677_v41 = vsel %vm613_vm1, %v611_v39, 0.0 }
 0x143   : > { %678 = vadd.xlane.f32.xlu0 %v677_v41 }
 0x145   : > { %v586_v42 = vpop.f32.mrf.mxu0 }
 0x146   : > { %v3190_v28 = vadd.f32 %v3001_v10, %v586_v42 }
 0x148   : > { %v612_v44 = vmul.f32 %v3190_v28, %v3190_v28 }
 0x14a   : > { %v680_v45 = vsel %vm613_vm1, %v612_v44, 0.0 }
 0x14b   : > { %681 = vadd.xlane.f32.xlu1 %v680_v45 }
 0x14d   : > { %v588_v30 = vpop.f32.mrf.mxu0 }
 0x16e   : > { %v652_v48 = vpop.xlane.xlu0 %651 }
 0x16f   : > { %v702_v49 = vmul.f32 %v3061_v56, %v652_v48 }
 0x171   : > { %v725_v51 = vadd.f32 1e-08, %v702_v49 }
 0x173   : > { %2808 = vrsqrt.f32 %v725_v51  ;;  %vm862_vm13 = vweird.f32 %v725_v51 }
 0x176   : > { %v655_v52 = vpop.xlane.xlu0 %654 }
 0x177   : > { %v703_v53 = vmul.f32 %v3061_v56, %v655_v52 }
 0x179   : > { %v726_v55 = vadd.f32 1e-08, %v703_v53  ;;  %v2809_v13 = vpop.eup %2808 }
 0x17a   : > { %v857_v62 = vmul.f32 %v2809_v13, %v725_v51  ;;  %vm863_vm10 = vweird.f32 %v2809_v13 }
 0x17b   : > { %2810 = vrsqrt.f32 %v726_v55  ;;  %vm872_vm12 = vweird.f32 %v726_v55  ;;  %vm3230_vm15 = vmor %vm862_vm13, %vm863_vm10 }
 0x17c   : > { %v858_v5 = vmul.f32 %v2809_v13, %v857_v62 }
 0x17e   : > { %v658_v10 = vpop.xlane.xlu1 %657  ;;  %v622_v59 = vpop.xlane.xlu0 %621  ;;  %v859_v8 = vmul.f32 0.5, %v858_v5 }
 0x17f   : > { %v704_v31 = vmul.f32 %v3061_v56, %v658_v10  ;;  %v692_v61 = vmul.f32 %v3061_v56, %v622_v59 }
 0x180   : > { %v860_v20 = vsub.f32 1.5, %v859_v8  ;;  %v1002_v8 = vld [vmem:[%s3121_s10 + $0x68] sm:$0xff] }
 0x181   : > { %v2811_v0 = vpop.eup %2810  ;;  %v3199_v32 = vadd.f32 1e-08, %v704_v31  ;;  %v3201_v1 = vadd.f32 1e-08, %v692_v61 }
 0x182   : > { %v867_v3 = vmul.f32 %v2811_v0, %v726_v55  ;;  %v861_v39 = vmul.f32 %v2809_v13, %v860_v20  ;;  %vm873_vm11 = vweird.f32 %v2811_v0 }
 0x183   : > { %2812 = vrsqrt.f32 %v3199_v32  ;;  %vm874_vm14 = vmor %vm872_vm12, %vm873_vm11  ;;  %vm882_vm2 = vweird.f32 %v3199_v32  ;;  %vm762_vm7 = vweird.f32 %v3201_v1 }
 0x184   : > { %v868_v33 = vmul.f32 %v2811_v0, %v867_v3  ;;  %2814 = vrsqrt.f32 %v3201_v1  ;;  %v865_v55 = vsel %vm3230_vm15, %v2809_v13, %v861_v39  ;;  %v1059_v3 = vld [vmem:[%s4482_s5 + $0x4] sm:$0xf] }
 0x185   : > { %v978_v13 = vmul.f32 %v865_v55, %v3038_v37 }
 0x186   : > { %v661_v6 = vpop.xlane.xlu1 %660  ;;  %v869_v17 = vmul.f32 0.5, %v868_v33 }
 0x187   : > { %v705_v7 = vmul.f32 %v3061_v56, %v661_v6 }
 0x188   : > { %v870_v22 = vsub.f32 1.5, %v869_v17 }
 0x189   : > { %v3206_v14 = vpop.eup %2812  ;;  %v3208_v15 = vadd.f32 1e-08, %v705_v7  ;;  %v1214_v7 = vsel %vm1212_vm3, %v1059_v3, 0 }
 0x18a   : > { %v3210_v16 = vpop.eup %2814  ;;  %v877_v19 = vmul.f32 %v3206_v14, %v3199_v32  ;;  %v871_v41 = vmul.f32 %v2811_v0, %v870_v22  ;;  %vm883_vm0 = vweird.f32 %v3206_v14  ;;  %2749 = vmatpush.bf16.msra.mxu3 %v1214_v7  ;;  %1223 = vmatpush.bf16.msra.mxu1 %v1214_v7  ;;  %v1003_v7 = vld [vmem:[%s3121_s10 + $0x70] sm:$0xff] }
 0x18b   : > { %2816 = vrsqrt.f32 %v3208_v15  ;;  %v757_v26 = vmul.f32 %v3210_v16, %v3201_v1  ;;  %vm3268_vm4 = vmor %vm882_vm2, %vm883_vm0  ;;  %vm763_vm5 = vweird.f32 %v3210_v16  ;;  %vm892_vm9 = vweird.f32 %v3208_v15 }
 0x18c   : > { %v878_v24 = vmul.f32 %v3206_v14, %v877_v19  ;;  %v875_v53 = vsel %vm874_vm14, %v2811_v0, %v871_v41  ;;  %v1001_v19 = vld [vmem:[%s3121_s10 + $0x60] sm:$0xff]  ;;  %vm3289_vm8 = vmor %vm762_vm7, %vm763_vm5  ;;  %v1110_v1 = vshrl.u32 %v3167_v21, 16 }
 0x18d   : > { %v758_v45 = vmul.f32 %v3210_v16, %v757_v26  ;;  %v979_v0 = vmul.f32 %v875_v53, %v3044_v43  ;;  %v1024_v39 = vmul.f32 %v1001_v19, %v978_v13 }
 0x18e   : > { %v625_v25 = vpop.xlane.xlu1 %624  ;;  %v664_v27 = vpop.xlane.xlu2 %663  ;;  %v879_v44 = vmul.f32 0.5, %v878_v24  ;;  %2750 = vmatpush.bf16.msrb.mxu3 %v3077_v2  ;;  %v991_v2 = vld [vmem:[%s3121_s10 + $0x10] sm:$0xff] }
 0x18f   : > { %v693_v35 = vmul.f32 %v3061_v56, %v625_v25  ;;  %v706_v36 = vmul.f32 %v3061_v56, %v664_v27  ;;  %v759_v31 = vmul.f32 0.5, %v758_v45  ;;  %v1047_v3 = vpack.c.bf16 %v1024_v39, %v1024_v39 }
 0x190   : > { %v880_v59 = vsub.f32 1.5, %v879_v44 }
 0x191   : > { %v3220_v42 = vpop.eup %2816  ;;  %v3223_v30 = vadd.f32 1e-08, %v693_v35  ;;  %v3225_v48 = vadd.f32 1e-08, %v706_v36  ;;  %v760_v43 = vsub.f32 1.5, %v759_v31  ;;  %v1025_v35 = vmul.f32 %v1002_v8, %v979_v0 }
 0x192   : > { %v887_v49 = vmul.f32 %v3220_v42, %v3208_v15  ;;  %v881_v20 = vmul.f32 %v3206_v14, %v880_v59  ;;  %vm893_vm6 = vweird.f32 %v3220_v42  ;;  %v1112_v31 = vshll.u32 %v3167_v21, 16 }
 0x193   : > { %2818 = vrsqrt.f32 %v3223_v30  ;;  %v761_v44 = vmul.f32 %v3210_v16, %v760_v43  ;;  %v1048_v55 = vpack.c.bf16 %v1025_v35, %v1025_v35  ;;  %vm3305_vm10 = vmor %vm892_vm9, %vm893_vm6  ;;  %vm772_vm11 = vweird.f32 %v3223_v30 }
 0x194   : > { %v888_v10 = vmul.f32 %v3220_v42, %v887_v49  ;;  %2820 = vrsqrt.f32 %v3225_v48  ;;  %v885_v32 = vsel %vm3268_vm4, %v3206_v14, %v881_v20  ;;  %vm902_vm13 = vweird.f32 %v3225_v48 }
 0x195   : > { %v980_v0 = vmul.f32 %v885_v32, %v3053_v50  ;;  %v1092_v20 = vunpack.c.l.b16 %v1048_v55 }
 0x196   : > { %v889_v51 = vmul.f32 0.5, %v888_v10  ;;  %v628_v61 = vpop.xlane.xlu1 %627  ;;  %v667_v62 = vpop.xlane.xlu0 %666 }
 0x197   : > { %v694_v5 = vmul.f32 %v3061_v56, %v628_v61  ;;  %v707_v33 = vmul.f32 %v3061_v56, %v667_v62  ;;  %v631_v6 = vpop.xlane.xlu2 %630  ;;  %v1026_v39 = vmul.f32 %v1003_v7, %v980_v0 }
 0x198   : > { %v890_v37 = vsub.f32 1.5, %v889_v51  ;;  %v695_v27 = vmul.f32 %v3061_v56, %v631_v6 }
 0x199   : > { %v3248_v17 = vpop.eup %2818  ;;  %v3252_v22 = vadd.f32 1e-08, %v694_v5  ;;  %v3254_v24 = vadd.f32 1e-08, %v707_v33  ;;  %v765_v5 = vsel %vm3289_vm8, %v3210_v16, %v761_v44  ;;  %v1004_v44 = vld [vmem:[%s3121_s10 + $0x78] sm:$0xff] }
 0x19a   : > { %v3257_v26 = vpop.eup %2820  ;;  %v767_v25 = vmul.f32 %v3248_v17, %v3223_v30  ;;  %v891_v45 = vmul.f32 %v3220_v42, %v890_v37  ;;  %v3282_v53 = vadd.f32 1e-08, %v695_v27  ;;  %v3322_v37 = vrot.slane %v1112_v31, 1 }
 0x19b   : > { %v897_v36 = vmul.f32 %v3257_v26, %v3225_v48  ;;  %2822 = vrsqrt.f32 %v3252_v22  ;;  %vm773_vm12 = vweird.f32 %v3248_v17  ;;  %vm903_vm15 = vweird.f32 %v3257_v26 }
 0x19c   : > { %v768_v41 = vmul.f32 %v3248_v17, %v767_v25  ;;  %2824 = vrsqrt.f32 %v3254_v24  ;;  %v895_v13 = vsel %vm3305_vm10, %v3220_v42, %v891_v45  ;;  %v968_v25 = vmul.f32 %v765_v5, %v3049_v46  ;;  %vm3354_vm14 = vmor %vm772_vm11, %vm773_vm12 }
 0x19d   : > { %v898_v52 = vmul.f32 %v3257_v26, %v897_v36  ;;  %2826 = vrsqrt.f32 %v3282_v53  ;;  %v1091_v36 = vunpack.c.l.b16 %v1047_v3  ;;  %vm3383_vm0 = vmor %vm902_vm13, %vm903_vm15  ;;  %vm782_vm5 = vweird.f32 %v3252_v22 }
 0x19e   : > { %v769_v49 = vmul.f32 0.5, %v768_v41  ;;  %v634_v10 = vpop.xlane.xlu1 %633  ;;  %v670_v6 = vpop.xlane.xlu0 %669  ;;  %v981_v41 = vmul.f32 %v895_v13, %v3064_v58  ;;  %v3343_v58 = vmul.f32 %v991_v2, %v968_v25  ;;  %vm912_vm7 = vweird.f32 %v3254_v24 }
 0x19f   : > { %v696_v14 = vmul.f32 %v3061_v56, %v634_v10  ;;  %v637_v59 = vpop.xlane.xlu2 %636  ;;  %v899_v8 = vmul.f32 0.5, %v898_v52  ;;  %v708_v35 = vmul.f32 %v3061_v56, %v670_v6  ;;  %v3338_v10 = vpack.c.b16 %v1092_v20, %v1091_v36 }
 0x1a0   : > { %v697_v61 = vmul.f32 %v3061_v56, %v637_v59  ;;  %v770_v50 = vsub.f32 1.5, %v769_v49  ;;  %v1027_v3 = vmul.f32 %v1004_v44, %v981_v41  ;;  %v1037_v25 = vpack.c.bf16 %v3343_v58, %v3343_v58  ;;  %v992_v41 = vld [vmem:[%s3121_s10 + $0x18] sm:$0xff]  ;;  %v1560_v58 = vld [vmem:[%s4482_s5 + $0x10] sm:$0xf] }
 0x1a1   : > { %v3297_v62 = vpop.eup %2822  ;;  %v3309_v15 = vadd.f32 1e-08, %v696_v14  ;;  %v900_v46 = vsub.f32 1.5, %v899_v8  ;;  %v3346_v31 = vadd.f32 1e-08, %v708_v35  ;;  %v3368_v20 = vshll.u32 %v3338_v10, 16 }
 0x1a2   : > { %v777_v16 = vmul.f32 %v3297_v62, %v3252_v22  ;;  %v3317_v19 = vpop.eup %2824  ;;  %v3320_v43 = vadd.f32 1e-08, %v697_v61  ;;  %v771_v45 = vmul.f32 %v3248_v17, %v770_v50  ;;  %v1049_v61 = vpack.c.bf16 %v1026_v39, %v1026_v39 }
 0x1a3   : > { %2828 = vrsqrt.f32 %v3309_v15  ;;  %v907_v42 = vmul.f32 %v3317_v19, %v3254_v24  ;;  %v3332_v32 = vpop.eup %2826  ;;  %v901_v7 = vmul.f32 %v3257_v26, %v900_v46  ;;  %v1050_v36 = vpack.c.bf16 %v1027_v3, %v1027_v3 }
 0x1a4   : > { %v778_v27 = vmul.f32 %v3297_v62, %v777_v16  ;;  %v787_v14 = vmul.f32 %v3332_v32, %v3282_v53  ;;  %2830 = vrsqrt.f32 %v3320_v43  ;;  %v775_v6 = vsel %vm3354_vm14, %v3248_v17, %v771_v45 }
 0x1a5   : > { %v908_v49 = vmul.f32 %v3317_v19, %v907_v42  ;;  %2832 = vrsqrt.f32 %v3346_v31  ;;  %v1093_v35 = vunpack.c.l.b16 %v1049_v61  ;;  %v969_v39 = vmul.f32 %v775_v6, %v3070_v63 }
 0x1a6   : > { %v643_v52 = vpop.xlane.xlu1 %642  ;;  %v779_v55 = vmul.f32 0.5, %v778_v27  ;;  %v788_v5 = vmul.f32 %v3332_v32, %v787_v14  ;;  %v640_v16 = vpop.xlane.xlu0 %639  ;;  %vm783_vm2 = vweird.f32 %v3297_v62  ;;  %v905_v44 = vsel %vm3383_vm0, %v3257_v26, %v901_v7 }
 0x1a7   : > { %v909_v59 = vmul.f32 0.5, %v908_v49  ;;  %v699_v33 = vmul.f32 %v3061_v56, %v643_v52  ;;  %v698_v63 = vmul.f32 %v3061_v56, %v640_v16  ;;  %vm913_vm4 = vweird.f32 %v3317_v19  ;;  %vm3404_vm6 = vmor %vm782_vm5, %vm783_vm2  ;;  %v646_v3 = vpop.xlane.xlu2 %645 }
 0x1a8   : > { %v780_v30 = vsub.f32 1.5, %v779_v55  ;;  %v789_v8 = vmul.f32 0.5, %v788_v5  ;;  %v1015_v26 = vmul.f32 %v992_v41, %v969_v39  ;;  %vm792_vm8 = vweird.f32 %v3282_v53  ;;  %v1005_v5 = vld [vmem:[%s3121_s10 + $0x80] sm:$0xff]  ;;  %vm3415_vm9 = vmor %vm912_vm7, %vm913_vm4 }
 0x1a9   : > { %v3348_v51 = vpop.eup %2828  ;;  %v910_v50 = vsub.f32 1.5, %v909_v59  ;;  %v3374_v27 = vadd.f32 1e-08, %v699_v33  ;;  %v982_v59 = vmul.f32 %v905_v44, %v3081_v4  ;;  %v1094_v0 = vunpack.c.l.b16 %v1050_v36  ;;  %v1006_v44 = vld [vmem:[%s3121_s10 + $0x88] sm:$0xff] }
 0x1aa   : > { %v797_v13 = vmul.f32 %v3348_v51, %v3309_v15  ;;  %v3376_v42 = vpop.eup %2830  ;;  %v781_v49 = vmul.f32 %v3297_v62, %v780_v30  ;;  %v790_v52 = vsub.f32 1.5, %v789_v8  ;;  %vm793_vm10 = vweird.f32 %v3332_v32  ;;  %v994_v33 = vld [vmem:[%s3121_s10 + $0x28] sm:$0xff] }
 0x1ab   : > { %v807_v46 = vmul.f32 %v3376_v42, %v3320_v43  ;;  %v911_v48 = vmul.f32 %v3317_v19, %v910_v50  ;;  %2834 = vrsqrt.f32 %v3374_v27  ;;  %v3410_v22 = vpop.eup %2832  ;;  %v3420_v6 = vadd.f32 1e-08, %v698_v63  ;;  %vm3445_vm14 = vmor %vm792_vm8, %vm793_vm10 }
 0x1ac   : > { %v798_v17 = vmul.f32 %v3348_v51, %v797_v13  ;;  %v785_v24 = vsel %vm3404_vm6, %v3297_v62, %v781_v49  ;;  %v791_v13 = vmul.f32 %v3332_v32, %v790_v52  ;;  %vm803_vm11 = vweird.f32 %v3348_v51 }
 0x1ad   : > { %v808_v14 = vmul.f32 %v3376_v42, %v807_v46  ;;  %v915_v7 = vsel %vm3415_vm9, %v3317_v19, %v911_v48  ;;  %vm1108_vm12 = vsmask.f32 7424  ;;  %2836 = vrsqrt.f32 %v3420_v6  ;;  %v993_v46 = vld [vmem:[%s3121_s10 + $0x20] sm:$0xff] }
 0x1ae   : > { %v799_v45 = vmul.f32 0.5, %v798_v17  ;;  %v700_v8 = vmul.f32 %v3061_v56, %v646_v3  ;;  %v1038_v16 = vpack.c.bf16 %v1015_v26, %v1015_v26  ;;  %v1028_v62 = vmul.f32 %v1005_v5, %v982_v59 }
 0x1af   : > { %v809_v4 = vmul.f32 0.5, %v808_v14  ;;  %vm802_vm13 = vweird.f32 %v3309_v15  ;;  %v917_v19 = vmul.f32 %v3410_v22, %v3346_v31  ;;  %v3438_v36 = vpack.c.b16 %v1094_v0, %v1093_v35  ;;  %v649_v14 = vpop.xlane.xlu0 %648  ;;  %v673_v0 = vpop.xlane.xlu1 %672 }
 0x1b0   : > { %v800_v55 = vsub.f32 1.5, %v799_v45  ;;  %v983_v39 = vmul.f32 %v915_v7, %v3100_v23  ;;  %vm813_vm15 = vweird.f32 %v3376_v42  ;;  %v970_v15 = vmul.f32 %v785_v24, %v3089_v11  ;;  %vm3458_vm0 = vmor %vm802_vm13, %vm803_vm11 }
 0x1b1   : > { %v810_v50 = vsub.f32 1.5, %v809_v4  ;;  %v3436_v17 = vpop.eup %2834  ;;  %v795_v35 = vsel %vm3445_vm14, %v3332_v32, %v791_v13  ;;  %v4485_v45 = vrot.slane %v3368_v20, 1  ;;  %vm812_vm2 = vweird.f32 %v3320_v43 }
 0x1b2   : > { %v801_v30 = vmul.f32 %v3348_v51, %v800_v55  ;;  %v827_v53 = vmul.f32 %v3436_v17, %v3374_v27  ;;  %v3470_v32 = vadd.f32 1e-08, %v700_v8  ;;  %v3473_v63 = vshrl.u32 %v3338_v10, 16  ;;  %vm3478_vm4 = vmor %vm812_vm2, %vm813_vm15 }
 0x1b3   : > { %v811_v41 = vmul.f32 %v3376_v42, %v810_v50  ;;  %v1082_v49 = vunpack.c.l.b16 %v1038_v16  ;;  %v1051_v48 = vpack.c.bf16 %v1028_v62, %v1028_v62  ;;  %v918_v52 = vmul.f32 %v3410_v22, %v917_v19  ;;  %v3483_v43 = vpop.eup %2836 }
 0x1b4   : > { %v805_v11 = vsel %vm3458_vm0, %v3348_v51, %v801_v30  ;;  %v828_v51 = vmul.f32 %v3436_v17, %v827_v53  ;;  %v1029_v26 = vmul.f32 %v1006_v44, %v983_v39  ;;  %v971_v59 = vmul.f32 %v795_v35, %v3095_v18  ;;  %v995_v30 = vld [vmem:[%s3121_s10 + $0x30] sm:$0xff]  ;;  %v996_v39 = vld [vmem:[%s3121_s10 + $0x38] sm:$0xff] }
 0x1b5   : > { %v815_v61 = vsel %vm3478_vm4, %v3376_v42, %v811_v41  ;;  %v3490_v3 = vshll.u32 %v3438_v36, 16  ;;  %v1016_v5 = vmul.f32 %v993_v46, %v970_v15  ;;  %v972_v4 = vmul.f32 %v805_v11, %v3108_v29  ;;  %v676_v11 = vpop.xlane.xlu2 %675 }
 0x1b6   : > { %v829_v24 = vmul.f32 0.5, %v828_v51  ;;  %v817_v7 = vmul.f32 %v3483_v43, %v3420_v6  ;;  %2838 = vrsqrt.f32 %v3470_v32  ;;  %v1163_v18 = vor.u32 %v3473_v63, %v4485_v45 }
 0x1b7   : > { %v1167_v42 = vrot.slane %v3490_v3, 1  ;;  %v701_v13 = vmul.f32 %v3061_v56, %v649_v14  ;;  %v919_v50 = vmul.f32 0.5, %v918_v52  ;;  %v973_v8 = vmul.f32 %v815_v61, %v3115_v40 }
 0x1b8   : > { %v818_v29 = vmul.f32 %v3483_v43, %v817_v7  ;;  %v709_v16 = vmul.f32 %v3061_v56, %v673_v0  ;;  %v1052_v62 = vpack.c.bf16 %v1029_v26, %v1029_v26  ;;  %v1017_v19 = vmul.f32 %v994_v33, %v971_v59 }
 0x1b9   : > { %v1168_v2 = vsel %vm1108_vm12, %v1163_v18, %v1167_v42  ;;  %v3510_v41 = vadd.f32 1e-08, %v701_v13  ;;  %v1081_v15 = vunpack.c.l.b16 %v1037_v25  ;;  %v830_v44 = vsub.f32 1.5, %v829_v24  ;;  %v1468_v25 = vld [vmem:[%s4482_s5 + $0xc] sm:$0xf] }
 0x1ba   : > { %v819_v35 = vmul.f32 0.5, %v818_v29  ;;  %2659 = vmatmul.msk.bf16.vlgmr.msra.gmra.mxu3 %vm613_vm1, %v1168_v2  ;;  %v1115_v40 = vor.u32 %v3322_v37, %v1110_v1  ;;  %v1095_v23 = vunpack.c.l.b16 %v1051_v48  ;;  %v1039_v53 = vpack.c.bf16 %v1016_v5, %v1016_v5  ;;  %v679_v2 = vpop.xlane.xlu0 %678 }
 0x1bb   : > { %v1018_v46 = vmul.f32 %v995_v30, %v972_v4  ;;  %vm922_vm5 = vweird.f32 %v3346_v31  ;;  %2840 = vrsqrt.f32 %v3510_v41  ;;  %v920_v52 = vsub.f32 1.5, %v919_v50 }
 0x1bc   : > { %v1019_v55 = vmul.f32 %v996_v39, %v973_v8  ;;  %v820_v51 = vsub.f32 1.5, %v819_v35  ;;  %v3527_v1 = vadd.f32 1e-08, %v709_v16  ;;  %v3529_v37 = vpop.eup %2838  ;;  %v1096_v48 = vunpack.c.l.b16 %v1052_v62 }
 0x1bd   : > { %v1040_v14 = vpack.c.bf16 %v1017_v19, %v1017_v19  ;;  %vm833_vm6 = vweird.f32 %v3436_v17  ;;  %v3532_v26 = vpack.c.b16 %v1082_v49, %v1081_v15  ;;  %v831_v59 = vmul.f32 %v3436_v17, %v830_v44 }
 0x1be   : > { %v710_v61 = vmul.f32 %v3061_v56, %v676_v11  ;;  %v1639_v0 = vsel %vm1212_vm3, %v1560_v58, 0  ;;  %v1486_v5 = vsel %vm1212_vm3, %v1468_v25, 0  ;;  %v1041_v33 = vpack.c.bf16 %v1018_v46, %v1018_v46  ;;  %v998_v58 = vld [vmem:[%s3121_s10 + $0x48] sm:$0xff] }
 0x1bf   : > { %v821_v4 = vmul.f32 %v3483_v43, %v820_v51  ;;  %vm823_vm7 = vweird.f32 %v3483_v43  ;;  %2663 = vmatmul.msk.bf16.gmra.mxu2 %vm613_vm1, %v3532_v26  ;;  %v4487_v24 = vshll.u32 %v3532_v26, 16  ;;  %1495 = vmatpush.bf16.msrb.mxu1 %v1486_v5  ;;  %v1042_v49 = vpack.c.bf16 %v1019_v55, %v1019_v55 }
 0x1c0   : > { %vm832_vm8 = vweird.f32 %v3374_v27  ;;  %v837_v7 = vmul.f32 %v3529_v37, %v3470_v32  ;;  %2842 = vrsqrt.f32 %v3527_v1  ;;  %1648 = vmatpush.bf16.msrb.mxu2 %v1639_v0  ;;  %v1083_v13 = vunpack.c.l.b16 %v1039_v53 }
 0x1c1   : > { %v3547_v18 = vpop.eup %2840  ;;  %vm923_vm9 = vweird.f32 %v3410_v22  ;;  %vm3552_vm10 = vmor %vm832_vm8, %vm833_vm6  ;;  %vm822_vm11 = vweird.f32 %v3420_v6  ;;  %v3559_v27 = vrot.slane %v4487_v24, 1  ;;  %v921_v50 = vmul.f32 %v3410_v22, %v920_v52  ;;  %v997_v52 = vld [vmem:[%s3121_s10 + $0x40] sm:$0xff] }
 0x1c2   : > { %v835_v8 = vsel %vm3552_vm10, %v3436_v17, %v831_v59  ;;  %vm3567_vm13 = vmor %vm822_vm11, %vm823_vm7  ;;  %v847_v16 = vmul.f32 %v3547_v18, %v3510_v41  ;;  %v3573_v6 = vadd.f32 1e-08, %v710_v61  ;;  %v3575_v62 = vpack.c.b16 %v1096_v48, %v1095_v23  ;;  %v1836_v23 = vld [vmem:[%s4482_s5 + $0x18] sm:$0xf] }
 0x1c3   : > { %v1084_v19 = vunpack.c.l.b16 %v1040_v14  ;;  %v1085_v39 = vunpack.c.l.b16 %v1041_v33  ;;  %v825_v17 = vsel %vm3567_vm13, %v3483_v43, %v821_v4  ;;  %v1086_v15 = vunpack.c.l.b16 %v1042_v49  ;;  %vm3595_vm14 = vmor %vm922_vm5, %vm923_vm9 }
 0x1c4   : > { %v838_v44 = vmul.f32 %v3529_v37, %v837_v7  ;;  %v848_v35 = vmul.f32 %v3547_v18, %v847_v16  ;;  %v1120_v53 = vsel %vm1108_vm12, %v1115_v40, %v3559_v27  ;;  %v975_v46 = vmul.f32 %v835_v8, %v3141_v57  ;;  %v1007_v16 = vld [vmem:[%s3121_s10 + $0x90] sm:$0xff] }
 0x1c5   : > { %2653 = vmatmul.msk.bf16.vlgmr.msra.gmra.mxu1 %vm613_vm1, %v1120_v53  ;;  %v974_v40 = vmul.f32 %v825_v17, %v3136_v54  ;;  %2844 = vrsqrt.f32 %v3573_v6  ;;  %v711_v25 = vmul.f32 %v3061_v56, %v679_v2  ;;  %v925_v57 = vsel %vm3595_vm14, %v3410_v22, %v921_v50 }
 0x1c6   : > { %v3589_v11 = vpop.eup %2842  ;;  %v849_v55 = vmul.f32 0.5, %v848_v35  ;;  %v3608_v51 = vshll.u32 %v3575_v62, 16  ;;  %v1854_v31 = vsel %vm1212_vm3, %v1836_v23, 0  ;;  %v3611_v48 = vpack.c.b16 %v1084_v19, %v1083_v13 }
 0x1c7   : > { %v3613_v14 = vpack.c.b16 %v1086_v15, %v1085_v39  ;;  %v839_v54 = vmul.f32 0.5, %v838_v44  ;;  %v3616_v59 = vshrl.u32 %v3438_v36, 16  ;;  %1863 = vmatpush.bf16.msrb.mxu0 %v1854_v31  ;;  %v1021_v61 = vmul.f32 %v998_v58, %v975_v46 }
 0x1c8   : > { %v927_v22 = vmul.f32 %v3589_v11, %v3527_v1  ;;  %v1020_v0 = vmul.f32 %v997_v52, %v974_v40  ;;  %v3620_v5 = vadd.f32 1e-08, %v711_v25  ;;  %v1175_v4 = vrot.slane %v3608_v51, 1 }
 0x1c9   : > { %v1171_v33 = vor.u32 %v3616_v59, %v1167_v42  ;;  %v984_v49 = vmul.f32 %v925_v57, %v3126_v47  ;;  %v850_v7 = vsub.f32 1.5, %v849_v55  ;;  %v840_v30 = vsub.f32 1.5, %v839_v54 }
 0x1ca   : > { %v1716_v8 = vrot.slane %v3611_v48, 2  ;;  %v1718_v29 = vrot.slane %v3613_v14, 2  ;;  %v1044_v19 = vpack.c.bf16 %v1021_v61, %v1021_v61  ;;  %v928_v39 = vmul.f32 %v3589_v11, %v927_v22 }
 0x1cb   : > { %v3627_v13 = vpop.eup %2844  ;;  %v1176_v50 = vsel %vm1108_vm12, %v1171_v33, %v1175_v4  ;;  %vm1714_vm15 = vcmask 1045504   ;;  %v1043_v42 = vpack.c.bf16 %v1020_v0, %v1020_v0  ;;  %2846 = vrsqrt.f32 %v3620_v5 }
 0x1cc   : > { %2660 = vmatmul.msk.bf16.gmra.mxu3 %vm613_vm1, %v1176_v50  ;;  %v3641_v47 = vsel %vm1714_vm15, %v1716_v8, %v1718_v29  ;;  %v3644_v17 = vshll.u32 %v3611_v48, 16  ;;  %v851_v2 = vmul.f32 %v3547_v18, %v850_v7  ;;  %vm853_vm0 = vweird.f32 %v3547_v18  ;;  %v999_v50 = vld [vmem:[%s3121_s10 + $0x50] sm:$0xff] }
 0x1cd   : > { %v937_v15 = vmul.f32 %v3627_v13, %v3573_v6  ;;  %2707 = vmatmul.msk.bf16.vlgmr.msrb.gmra.mxu0 %vm613_vm1, %v3641_v47  ;;  %v1030_v44 = vmul.f32 %v1007_v16, %v984_v49  ;;  %v841_v35 = vmul.f32 %v3529_v37, %v840_v30  ;;  %vm843_vm2 = vweird.f32 %v3529_v37 }
 0x1ce   : > { %v4488_v53 = vshrl.u32 %v3532_v26, 16  ;;  %v1127_v23 = vrot.slane %v3644_v17, 1  ;;  %vm842_vm4 = vweird.f32 %v3470_v32  ;;  %vm852_vm5 = vweird.f32 %v3510_v41  ;;  %v1345_v41 = vld [vmem:[%s4482_s5 + $0x8] sm:$0xf] }
 0x1cf   : > { %2664 = vmatmul.msk.bf16.gmra.mxu2 %vm613_vm1, %v3611_v48  ;;  %v1053_v46 = vpack.c.bf16 %v1030_v44, %v1030_v44  ;;  %v1088_v43 = vunpack.c.l.b16 %v1044_v19  ;;  %v1087_v58 = vunpack.c.l.b16 %v1043_v42  ;;  %v929_v40 = vmul.f32 0.5, %v928_v39  ;;  %vm854_vm6 = vmor %vm852_vm5, %vm853_vm0 }
 0x1d0   : > { %v1123_v25 = vor.u32 %v4488_v53, %v3559_v27  ;;  %vm844_vm7 = vmor %vm842_vm4, %vm843_vm2  ;;  %v855_v57 = vsel %vm854_vm6, %v3547_v18, %v851_v2  ;;  %v938_v52 = vmul.f32 %v3627_v13, %v937_v15  ;;  %v1394_v0 = vsel %vm1212_vm3, %v1345_v41, 0 }
 0x1d1   : > { %v3667_v32 = vunpack.c.l.b16 %v1053_v46  ;;  %v3672_v55 = vpop.eup %2846  ;;  %v845_v31 = vsel %vm844_vm7, %v3529_v37, %v841_v35  ;;  %v3683_v54 = vpack.c.b16 %v1088_v43, %v1087_v58  ;;  %v930_v61 = vsub.f32 1.5, %v929_v40  ;;  %v1000_v37 = vld [vmem:[%s3121_s10 + $0x58] sm:$0xff]  ;;  %1403 = vmatpush.bf16.msra.mxu3 %v1394_v0 }
 0x1d2   : > { %v1128_v27 = vsel %vm1108_vm12, %v1123_v25, %v1127_v23  ;;  %v977_v22 = vmul.f32 %v855_v57, %v3159_v9  ;;  %v976_v33 = vmul.f32 %v845_v31, %v3146_v60  ;;  %v939_v49 = vmul.f32 0.5, %v938_v52 }
 0x1d3   : > { %v3681_v18 = vpack.c.b16 %v3667_v32, %v3667_v32  ;;  %v947_v7 = vmul.f32 %v3672_v55, %v3620_v5  ;;  %v3694_v16 = vshrl.u32 %v3575_v62, 16  ;;  %vm933_vm8 = vweird.f32 %v3589_v11 }
 0x1d4   : > { %v931_v9 = vmul.f32 %v3589_v11, %v930_v61  ;;  %v1023_v39 = vmul.f32 %v1000_v37, %v977_v22  ;;  %v1720_v42 = vrot.slane %v3683_v54, 2  ;;  %v1022_v2 = vmul.f32 %v999_v50, %v976_v33  ;;  %v1008_v33 = vld [vmem:[%s3121_s10 + $0x98] sm:$0xff] }
 0x1d5   : > { %2654 = vmatmul.msk.bf16.gmra.mxu1 %vm613_vm1, %v1128_v27  ;;  %v1181_v30 = vshll.u32 %v3681_v18, 16  ;;  %v1179_v60 = vor.u32 %v3694_v16, %v1175_v4  ;;  %v940_v15 = vsub.f32 1.5, %v939_v49  ;;  %v948_v44 = vmul.f32 %v3672_v55, %v947_v7 }
 0x1d6   : > { %vm932_vm9 = vweird.f32 %v3527_v1  ;;  %v3704_v46 = vshll.u32 %v3613_v14, 16  ;;  %vm942_vm11 = vweird.f32 %v3573_v6  ;;  %vm943_vm13 = vweird.f32 %v3627_v13 }
 0x1d7   : > { %v1183_v19 = vrot.slane %v1181_v30, 1  ;;  %vm3706_vm10 = vmor %vm932_vm9, %vm933_vm8  ;;  %v1347_v4 = vrot.slane %v3167_v21, 1  ;;  %v1348_v58 = vrot.slane %v3532_v26, 1  ;;  %v1046_v40 = vpack.c.bf16 %v1023_v39, %v1023_v39 }
 0x1d8   : > { %v935_v1 = vsel %vm3706_vm10, %v3589_v11, %v931_v9  ;;  %v3723_v25 = vsel %vm1714_vm15, %v1718_v29, %v1720_v42  ;;  %v1350_v57 = vrot.slane %v3611_v48, 1  ;;  %v1045_v52 = vpack.c.bf16 %v1022_v2, %v1022_v2  ;;  %vm3746_vm0 = vmor %vm942_vm11, %vm943_vm13 }
 0x1d9   : > { %v1184_v35 = vsel %vm1108_vm12, %v1179_v60, %v1183_v19  ;;  %4525 = vst [vmem:[#allocation2_spill] sm:$0xff] %v3723_v25  ;;  %v941_v21 = vmul.f32 %v3627_v13, %v940_v15  ;;  %v949_v41 = vmul.f32 0.5, %v948_v44  ;;  %vm1346_vm14 = vcmask 1046528  }
 0x1da   : > { %v3732_v11 = vshrl.u32 %v3611_v48, 16  ;;  %v1135_v31 = vrot.slane %v3704_v46, 1  ;;  %v3736_v29 = vsel %vm1346_vm14, %v1347_v4, %v1348_v58  ;;  %v3739_v27 = vsel %vm1346_vm14, %v1348_v58, %v1350_v57  ;;  %v1009_v58 = vld [vmem:[%s3121_s10 + $0xa0] sm:$0xff] }
 0x1db   : > { %v985_v61 = vmul.f32 %v935_v1, %v3162_v12  ;;  %v1352_v0 = vrot.slane %v3613_v14, 1  ;;  %v1090_v37 = vunpack.c.l.b16 %v1046_v40  ;;  %v1581_v7 = vrot.slane %v3473_v63, 1 }
 0x1dc   : > { %2661 = vmatmul.msk.bf16.gmra.mxu3 %vm613_vm1, %v1184_v35  ;;  %v1131_v49 = vor.u32 %v3732_v11, %v1127_v23  ;;  %v1582_v12 = vrot.slane %v3368_v20, 2  ;;  %v1089_v30 = vunpack.c.l.b16 %v1045_v52  ;;  %v1585_v6 = vrot.slane %v3616_v59, 1 }
 0x1dd   : > { %2708 = vmatmul.msk.bf16.gmra.mxu0 %vm613_vm1, %v3723_v25  ;;  %v3758_v50 = vsel %vm1346_vm14, %v1350_v57, %v1352_v0  ;;  %v945_v19 = vsel %vm3746_vm0, %v3627_v13, %v941_v21  ;;  %v950_v9 = vsub.f32 1.5, %v949_v41  ;;  %v1586_v39 = vrot.slane %v3490_v3, 2 }
 0x1de   : > { %v1136_v23 = vsel %vm1108_vm12, %v1131_v49, %v1135_v31  ;;  %v1031_v60 = vmul.f32 %v1008_v33, %v985_v61  ;;  %vm952_vm2 = vweird.f32 %v3620_v5  ;;  %vm1561_vm4 = vsmask.f32 6400 }
 0x1df   : > { %2665 = vmatmul.msk.bf16.gmra.mxu2 %vm613_vm1, %v3613_v14  ;;  %v3770_v2 = vpack.c.b16 %v1090_v37, %v1089_v30  ;;  %v3772_v15 = vor.u32 %v1582_v12, %v1581_v7  ;;  %v1587_v44 = vor.u32 %v1586_v39, %v1585_v6  ;;  %v1589_v13 = vrot.slane %v3694_v16, 1  ;;  %v682_v39 = vpop.xlane.xlu1 %681 }
 0x1e0   : > { %v986_v35 = vmul.f32 %v945_v19, %v3170_v34  ;;  %vm953_vm5 = vweird.f32 %v3672_v55  ;;  %v1590_v43 = vrot.slane %v3608_v51, 2  ;;  %v1715_v4 = vrot.slane %v3532_v26, 2 }
 0x1e1   : > { %4528 = vst [vmem:[#allocation3_spill] sm:$0xff] %v3770_v2  ;;  %v951_v1 = vmul.f32 %v3672_v55, %v950_v9  ;;  %v1354_v40 = vrot.slane %v3683_v54, 1  ;;  %v3784_v57 = vsel %vm1561_vm4, %v3772_v15, %v1587_v44  ;;  %v1930_v21 = vrot.slane %v3732_v11, 2  ;;  %vm3797_vm6 = vmor %vm952_vm2, %vm953_vm5 }
 0x1e2   : > { %v3786_v52 = vor.u32 %v1590_v43, %v1589_v13  ;;  %v3791_v34 = vsel %vm1714_vm15, %v1715_v4, %v1716_v8  ;;  %v1931_v41 = vrot.slane %v3644_v17, 3  ;;  %v1054_v61 = vpack.c.bf16 %v1031_v60, %v1031_v60 }
 0x1e3   : > { %v1722_v33 = vrot.slane %v3770_v2, 2  ;;  %v3803_v37 = vshrl.u32 %v3613_v14, 16  ;;  %v3808_v8 = vsel %vm1346_vm14, %v1352_v0, %v1354_v40  ;;  %v1032_v49 = vmul.f32 %v1009_v58, %v986_v35 }
 0x1e4   : > { %v3811_v7 = vshll.u32 %v3683_v54, 16  ;;  %v3815_v5 = vsel %vm1561_vm4, %v1587_v44, %v3786_v52  ;;  %v1932_v12 = vor.u32 %v1931_v41, %v1930_v21  ;;  %v3818_v30 = vrot.slane %v3575_v62, 1 }
 0x1e5   : > { %2655 = vmatmul.msk.bf16.gmra.mxu1 %vm613_vm1, %v1136_v23  ;;  %v1364_v6 = vrot.slane %v3681_v18, 1  ;;  %v2083_v19 = vrot.slane %v3611_v48, 3  ;;  %v2084_v9 = vrot.slane %v3613_v14, 3  ;;  %v955_v0 = vsel %vm3797_vm6, %v3672_v55, %v951_v1 }
 0x1e6   : > { %vm2082_vm7 = vcmask 1044480   ;;  %v3833_v23 = vsel %vm1714_vm15, %v1720_v42, %v1722_v33  ;;  %v1933_v55 = vrot.slane %v3803_v37, 2  ;;  %v1471_v18 = vunpack.c.l.b16 %v1054_v61 }
 0x1e7   : > { %4531 = vst [vmem:[#allocation4_spill] sm:$0xff] %v3833_v23  ;;  %v3837_v48 = vsel %vm1346_vm14, %v3818_v30, %v1364_v6  ;;  %v3840_v14 = vsel %vm2082_vm7, %v2083_v19, %v2084_v9  ;;  %v1934_v42 = vrot.slane %v3704_v46, 3  ;;  %v1945_v60 = vrot.slane %v3473_v63, 2  ;;  %v1010_v19 = vld [vmem:[%s3121_s10 + $0xa8] sm:$0xff] }
 0x1e8   : > { %v1946_v44 = vrot.slane %v3368_v20, 3  ;;  %v1055_v13 = vpack.c.bf16 %v1032_v49, %v1032_v49  ;;  %v4489_v35 = vrot.slane %v3811_v7, 1  ;;  %v1949_v43 = vrot.slane %v3616_v59, 2 }
 0x1e9   : > { %v1950_v4 = vrot.slane %v3490_v3, 3  ;;  %v987_v58 = vmul.f32 %v955_v0, %v3184_v38  ;;  %v3855_v1 = vshll.u32 %v3770_v2, 16  ;;  %v3858_v21 = vshrl.u32 %v3770_v2, 16 }
 0x1ea   : > { %v1935_v41 = vor.u32 %v1934_v42, %v1933_v55  ;;  %v712_v63 = vmul.f32 %v3061_v56, %v682_v39  ;;  %v1139_v61 = vor.u32 %v3803_v37, %v1135_v31  ;;  %v3865_v22 = vshrl.u32 %v3683_v54, 16 }
 0x1eb   : > { %vm1929_vm8 = vsmask.f32 5376  ;;  %v3870_v38 = vor.u32 %v1946_v44, %v1945_v60  ;;  %v1951_v59 = vor.u32 %v1950_v4, %v1949_v43  ;;  %v1953_v49 = vrot.slane %v3694_v16, 2 }
 0x1ec   : > { %2668 = vmatmul.msk.bf16.vlgmr.msrb.gmra.mxu3 %vm613_vm1, %v3338_v10  ;;  %v3868_v3 = vsel %vm1929_vm8, %v1932_v12, %v1935_v41  ;;  %v3873_v6 = vunpack.c.l.b16 %v1055_v13  ;;  %v1144_v56 = vsel %vm1108_vm12, %v1139_v61, %v4489_v35  ;;  %v2086_v31 = vrot.slane %v3683_v54, 3 }
 0x1ed   : > { %2709 = vmatmul.msk.bf16.gmra.mxu0 %vm613_vm1, %v3833_v23  ;;  %v1954_v0 = vrot.slane %v3608_v51, 3  ;;  %v1577_v12 = vrot.slane %v3858_v21, 1  ;;  %v1578_v55 = vrot.slane %v3855_v1, 2  ;;  %v3886_v16 = vsel %vm1929_vm8, %v3870_v38, %v1951_v59 }
 0x1ee   : > { %4532 = vst [vmem:[#allocation5_spill] sm:$0xff] %v3886_v16  ;;  %v3889_v39 = vsel %vm2082_vm7, %v2084_v9, %v2086_v31  ;;  %v1937_v42 = vrot.slane %v3865_v22, 2  ;;  %v1938_v60 = vrot.slane %v3811_v7, 3  ;;  %v1033_v44 = vmul.f32 %v1010_v19, %v987_v58 }
 0x1ef   : > { %2666 = vmatmul.msk.bf16.gmra.mxu2 %vm613_vm1, %v3683_v54  ;;  %v3893_v13 = vadd.f32 1e-08, %v712_v63  ;;  %v1356_v51 = vrot.slane %v3770_v2, 1  ;;  %v3896_v43 = vor.u32 %v1954_v0, %v1953_v49  ;;  %v1474_v4 = vpack.c.b16 %v3873_v6, %v3873_v6 }
 0x1f0   : > { %v3901_v61 = vpack.c.b16 %v1471_v18, %v3667_v32  ;;  %v4486_v9 = vrot.slane %v3338_v10, 2  ;;  %v3906_v45 = vor.u32 %v1578_v55, %v1577_v12  ;;  %v1056_v32 = vpack.c.bf16 %v1033_v44, %v1033_v44 }
 0x1f1   : > { %v3911_v58 = vsel %vm1346_vm14, %v1354_v40, %v1356_v51  ;;  %v3915_v63 = vsel %vm1929_vm8, %v1951_v59, %v3896_v43  ;;  %2848 = vrsqrt.f32 %v3893_v13  ;;  %v4490_v40 = vrot.slane %v3338_v10, 1 }
 0x1f2   : > { %4533 = vst [vmem:[#allocation6_spill] sm:$0xff] %v3915_v63  ;;  %v3927_v54 = vsel %vm1714_vm15, %v1722_v33, %v4486_v9  ;;  %v1594_v18 = vshrl.u32 %v3901_v61, 16  ;;  %v1597_v59 = vshll.u32 %v3901_v61, 16  ;;  %v1603_v19 = vshrl.u32 %v1474_v4, 16 }
 0x1f3   : > { %4534 = vst [vmem:[#allocation7_spill] sm:$0xff] %v3927_v54  ;;  %v1606_v0 = vshll.u32 %v1474_v4, 16  ;;  %v3940_v33 = vsel %vm1561_vm4, %v3906_v45, %v3772_v15  ;;  %v1475_v12 = vrot.slane %v3901_v61, 1  ;;  %v1477_v55 = vrot.slane %v1474_v4, 1  ;;  %v2081_v15 = vld [vmem:[%s4482_s5 + $0x20] sm:$0xf] }
 0x1f4   : > { %v3948_v44 = vsel %vm1346_vm14, %v1356_v51, %v4490_v40  ;;  %v1596_v9 = vrot.slane %v1594_v18, 1  ;;  %v1599_v24 = vrot.slane %v1597_v59, 2  ;;  %v1605_v53 = vrot.slane %v1603_v19, 1 }
 0x1f5   : > { %2656 = vmatmul.msk.bf16.gmra.mxu1 %vm613_vm1, %v1144_v56  ;;  %v3903_v56 = vor.u32 %v1938_v60, %v1937_v42  ;;  %v1608_v35 = vrot.slane %v1606_v0, 2  ;;  %v3962_v51 = vsel %vm1346_vm14, %v1475_v12, %v1477_v55  ;;  %v1151_v40 = vrot.slane %v3855_v1, 1 }
 0x1f6   : > { %v2130_v42 = vsel %vm1212_vm3, %v2081_v15, 0  ;;  %v1600_v63 = vor.u32 %v1599_v24, %v1596_v9  ;;  %v4535_v16 = vrot.slane %v3770_v2, 3  ;;  %v4536_v23 = vrot.slane %v3811_v7, 1 }
 0x1f7   : > { %v3919_v49 = vsel %vm1929_vm8, %v1935_v41, %v3903_v56  ;;  %v1713_v41 = vld [vmem:[%s4482_s5 + $0x14] sm:$0xf]  ;;  %v3971_v19 = vpop.eup %2848  ;;  %2139 = vmatpush.bf16.msra.mxu2 %v2130_v42  ;;  %v1609_v0 = vor.u32 %v1608_v35, %v1605_v53  ;;  %v3977_v55 = vrot.slane %v3901_v61, 2  ;;  %v1839_v24 = vunpack.c.l.b16 %v1056_v32 }
 0x1f8   : > { %v1762_v60 = vsel %vm1212_vm3, %v1713_v41, 0  ;;  %v3959_v41 = vsel %vm1346_vm14, %v3818_v30, %v1475_v12  ;;  %v1147_v12 = vor.u32 %v3865_v22, %v4536_v23  ;;  %v1565_v53 = vrot.slane %v3732_v11, 1 }
 0x1f9   : > { %1771 = vmatpush.bf16.msrb.mxu3 %v1762_v60  ;;  %v3981_v60 = vsel %vm1561_vm4, %v3786_v52, %v1600_v63  ;;  %v3984_v9 = vsel %vm1561_vm4, %v1600_v63, %v1609_v0  ;;  %v957_v35 = vmul.f32 %v3971_v19, %v3893_v13  ;;  %v1566_v23 = vrot.slane %v3644_v17, 2  ;;  %v1928_v52 = vld [vmem:[%s4482_s5 + $0x1c] sm:$0xf] }
 0x1fa   : > { %v1941_v32 = vrot.slane %v3858_v21, 2  ;;  %v1942_v63 = vrot.slane %v3855_v1, 3  ;;  %v1957_v42 = vrot.slane %v1594_v18, 2  ;;  %v1958_v15 = vrot.slane %v1597_v59, 3 }
 0x1fb   : > { %v4003_v0 = vpack.c.b16 %v1839_v24, %v3873_v6  ;;  %v958_v6 = vmul.f32 %v3971_v19, %v957_v35  ;;  %v1567_v24 = vor.u32 %v1566_v23, %v1565_v53  ;;  %v4539_v23 = vrot.slane %v3338_v10, 2 }
 0x1fc   : > { %2669 = vmatmul.msk.bf16.gmra.mxu3 %vm613_vm1, %v3438_v36  ;;  %v1943_v17 = vor.u32 %v1942_v63, %v1941_v32  ;;  %v1959_v1 = vor.u32 %v1958_v15, %v1957_v42  ;;  %v1155_v15 = vor.u32 %v3858_v21, %v1151_v40  ;;  %vm963_vm9 = vweird.f32 %v3971_v19 }
 0x1fd   : > { %2710 = vmatmul.msk.bf16.gmra.mxu0 %vm613_vm1, %v3927_v54  ;;  %v3969_v54 = vsel %vm2082_vm7, %v2086_v31, %v4535_v16  ;;  %v1732_v31 = vrot.slane %v1474_v4, 2  ;;  %v1152_v16 = vsel %vm1108_vm12, %v1147_v12, %v1151_v40  ;;  %v2007_v4 = vsel %vm1212_vm3, %v1928_v52, 0 }
 0x1fe   : > { %2016 = vmatpush.bf16.msra.mxu1 %v2007_v4  ;;  %v4537_v12 = vshrl.u32 %v3532_v26, 16  ;;  %v4011_v18 = vsel %vm1929_vm8, %v3903_v56, %v1943_v17  ;;  %v4015_v59 = vsel %vm1929_vm8, %v1943_v17, %v3870_v38  ;;  %v4021_v52 = vsel %vm1929_vm8, %v3896_v43, %v1959_v1 }
 0x1ff   : > { %2667 = vmatmul.msk.bf16.gmra.mxu2 %vm613_vm1, %v3770_v2  ;;  %v4000_v11 = vsel %vm1714_vm15, %v3977_v55, %v1732_v31  ;;  %v4538_v2 = vshll.u32 %v3532_v26, 16  ;;  %v1726_v31 = vrot.slane %v3438_v36, 2  ;;  %v2096_v26 = vrot.slane %v3901_v61, 3 }
 0x200   : > { %v1962_v56 = vshrl.u32 %v4003_v0, 16  ;;  %v1965_v32 = vshll.u32 %v4003_v0, 16  ;;  %v959_v42 = vmul.f32 0.5, %v958_v6  ;;  %vm962_vm3 = vweird.f32 %v3893_v13 }
 0x201   : > { %v1563_v25 = vrot.slane %v4538_v2, 2  ;;  %v2098_v2 = vrot.slane %v4003_v0, 3  ;;  %v4038_v4 = vsel %vm1714_vm15, %v4539_v23, %v1726_v31  ;;  %v1569_v6 = vrot.slane %v3803_v37, 1  ;;  %vm964_vm10 = vmor %vm962_vm3, %vm963_vm9  ;;  %v1011_v37 = vld [vmem:[%s3121_s10 + $0xb0] sm:$0xff]  ;;  %s2753_s10 = smul.u32 18, %s4562_s24 }
 0x202   : > { %v1964_v53 = vrot.slane %v1962_v56, 2  ;;  %v1967_v43 = vrot.slane %v1965_v32, 3  ;;  %v1570_v32 = vrot.slane %v3704_v46, 2 }
 0x203   : > { %v4032_v38 = vsel %vm2082_vm7, %v2096_v26, %v2098_v2  ;;  %s4186_s13 = sadd.s32 %s2754_s12, %s2753_s10 }
 0x204   : > { %v1571_v40 = vor.u32 %v1570_v32, %v1569_v6  ;;  %s2587_s14 = sshll.u32 %s4186_s13, 3 }
 0x205   : > { %2657 = vmatmul.msk.bf16.gmra.mxu1 %vm613_vm1, %v1152_v16  ;;  %v1562_v16 = vrot.slane %v4537_v12, 1  ;;  %v960_v12 = vsub.f32 1.5, %v959_v42  ;;  %s4199_s15 = scalar_lea.vmem %s4479_s2, %s2587_s14  ;;  %s4381_s20 = scalar_lea.vmem %s4484_s7, %s2587_s14 }
 0x206   : > { %v2220_v61 = vld [vmem:[%s4199_s15 + $0x80] sm:$0xff] }
 0x207   : > { %v1564_v63 = vor.u32 %v1563_v25, %v1562_v16  ;;  %v1968_v25 = vor.u32 %v1967_v43, %v1964_v53  ;;  %v4540_v16 = vrot.slane %v3368_v20, 1  ;;  %v961_v21 = vmul.f32 %v3971_v19, %v960_v12 }
 0x209   : > { %v1568_v35 = vsel %vm1561_vm4, %v1564_v63, %v1567_v24  ;;  %v4045_v17 = vsel %vm1929_vm8, %v1959_v1, %v1968_v25  ;;  %v1160_v56 = vsel %vm1108_vm12, %v1155_v15, %v4540_v16  ;;  %v1728_v1 = vrot.slane %v3575_v62, 2 }
 0x20a   : > { %v965_v20 = vsel %vm964_vm10, %v3971_v19, %v961_v21  ;;  %v1572_v63 = vsel %vm1561_vm4, %v1567_v24, %v1571_v40  ;;  %v1843_v21 = vrot.slane %v4003_v0, 2  ;;  %vm2424_vm12 = vcmask 130048  }
 0x20b   : > { %v988_v13 = vmul.f32 %v965_v20, %v3190_v28  ;;  %v4063_v53 = vsel %vm1714_vm15, %v1726_v31, %v1728_v1  ;;  %v1574_v28 = vrot.slane %v3811_v7, 2  ;;  %v4078_v23 = vsel %vm1714_vm15, %v1728_v1, %v3977_v55 }
 0x20c   : > { %2670 = vmatmul.msk.bf16.gmra.mxu3 %vm613_vm1, %v3575_v62  ;;  %v1844_v1 = vsel %vm1714_vm15, %v3977_v55, %v1843_v21 }
 0x20d   : > { %2711 = vmatmul.msk.bf16.gmra.mxu0 %vm613_vm1, %v4038_v4  ;;  %v1034_v46 = vmul.f32 %v1011_v37, %v988_v13 }
 0x20f   : > { %2689 = vmatmul.msk.bf16.vlgmr.msrb.gmra.mxu2 %vm613_vm1, %v1568_v35  ;;  %v1057_v19 = vpack.c.bf16 %v1034_v46, %v1034_v46 }
 0x211   : > { %v1840_v43 = vunpack.c.l.b16 %v1057_v19 }
 0x213   : > { %v1842_v31 = vpack.c.b16 %v1840_v43, %v1840_v43 }
 0x215   : > { %2658 = vmatmul.msk.bf16.gmra.mxu1 %vm613_vm1, %v1160_v56  ;;  %v2100_v7 = vrot.slane %v1842_v31, 3  ;;  %v1971_v42 = vshrl.u32 %v1842_v31, 16  ;;  %v1974_v15 = vshll.u32 %v1842_v31, 16 }
 0x217   : > { %v4086_v12 = vsel %vm2082_vm7, %v2098_v2, %v2100_v7  ;;  %v1976_v16 = vrot.slane %v1974_v15, 3 }
 0x21c   : > { %2671 = vmatmul.msk.bf16.vlgmr.msra.gmra.mxu3 %vm613_vm1, %v3736_v29  ;;  %v1573_v29 = vrot.slane %v3865_v22, 1  ;;  %v4083_v22 = vpop.f32.mrf.mxu2 }
 0x21d   : > { %2712 = vmatmul.msk.bf16.gmra.mxu0 %vm613_vm1, %v4063_v53 }
 0x21e   : > { %v1575_v24 = vor.u32 %v1574_v28, %v1573_v29 }
 0x21f   : > { %2690 = vmatmul.msk.bf16.gmra.mxu2 %vm613_vm1, %v1572_v63  ;;  %v1845_v63 = vrot.slane %v1842_v31, 2 }
 0x220   : > { %v1576_v35 = vsel %vm1561_vm4, %v1571_v40, %v1575_v24  ;;  %v1580_v2 = vsel %vm1561_vm4, %v1575_v24, %v3906_v45 }
 0x221   : > { %v1846_v45 = vsel %vm1714_vm15, %v1843_v21, %v1845_v63 }
 0x224   : > { %v1302_v32 = vpop.f32.mrf.mxu2 }
 0x225   : > { %2680 = vmatmul.msk.bf16.vlgmr.msrb.gmra.mxu1 %vm613_vm1, %v3739_v27 }
 0x22c   : > { %2672 = vmatmul.msk.bf16.gmra.mxu3 %vm613_vm1, %v3739_v27  ;;  %v1973_v27 = vrot.slane %v1971_v42, 2 }
 0x22d   : > { %2713 = vmatmul.msk.bf16.gmra.mxu0 %vm613_vm1, %v4078_v23 }
 0x22e   : > { %v1977_v56 = vor.u32 %v1976_v16, %v1973_v27 }
 0x22f   : > { %2691 = vmatmul.msk.bf16.gmra.mxu2 %vm613_vm1, %v1576_v35 }
 0x230   : > { %v4091_v6 = vsel %vm1929_vm8, %v1968_v25, %v1977_v56 }
 0x235   : > { %2681 = vmatmul.msk.bf16.gmra.mxu1 %vm613_vm1, %v3758_v50 }
 0x23c   : > { %2673 = vmatmul.msk.bf16.gmra.mxu3 %vm613_vm1, %v3758_v50 }
 0x23d   : > { %v1255_v40 = vpop.f32.mrf.mxu3  ;;  %2714 = vmatmul.msk.bf16.gmra.mxu0 %vm613_vm1, %v1844_v1  ;;  %v4541_v1 = vrot.slane %v3338_v10, 1 }
 0x23f   : > { %2692 = vmatmul.msk.bf16.gmra.mxu2 %vm613_vm1, %v1580_v2 }
 0x242   : > { %v4102_v20 = vpop.f32.mrf.mxu1  ;;  %v1305_v25 = vpop.f32.mrf.mxu2 }
 0x245   : > { %2682 = vmatmul.msk.bf16.gmra.mxu1 %vm613_vm1, %v3808_v8  ;;  %v1257_v0 = vpop.f32.mrf.mxu3 }
 0x24a   : > { %v1227_v13 = vpop.f32.mrf.mxu1  ;;  %v1307_v50 = vpop.f32.mrf.mxu2 }
 0x24b   : > { %v4106_v37 = vadd.f32 %v1302_v32, %v1227_v13 }
 0x24c   : > { %2674 = vmatmul.msk.bf16.gmra.mxu3 %vm613_vm1, %v3808_v8 }
 0x24d   : > { %2715 = vmatmul.msk.bf16.gmra.mxu0 %vm613_vm1, %v1846_v45 }
 0x24f   : > { %2693 = vmatmul.msk.bf16.gmra.mxu2 %vm613_vm1, %v3940_v33  ;;  %v1260_v55 = vpop.f32.mrf.mxu3 }
 0x252   : > { %v1230_v46 = vpop.f32.mrf.mxu1  ;;  %v1310_v19 = vpop.f32.mrf.mxu2 }
 0x253   : > { %v4114_v29 = vadd.f32 %v1305_v25, %v1230_v46 }
 0x255   : > { %2683 = vmatmul.msk.bf16.gmra.mxu1 %vm613_vm1, %v3911_v58 }
 0x257   : > { %v1262_v28 = vpop.f32.mrf.mxu3 }
 0x25a   : > { %v1232_v43 = vpop.f32.mrf.mxu1  ;;  %v1312_v24 = vpop.f32.mrf.mxu2 }
 0x25b   : > { %v4118_v31 = vadd.f32 %v1307_v50, %v1232_v43 }
 0x25c   : > { %2675 = vmatmul.msk.bf16.gmra.mxu3 %vm613_vm1, %v3911_v58  ;;  %v1360_v58 = vrot.slane %v3438_v36, 1 }
 0x25e   : > { %v1361_v25 = vsel %vm1346_vm14, %v4541_v1, %v1360_v58 }
 0x25f   : > { %2694 = vmatmul.msk.bf16.gmra.mxu2 %vm613_vm1, %v3784_v57  ;;  %v1265_v8 = vpop.f32.mrf.mxu3 }
 0x262   : > { %v1235_v33 = vpop.f32.mrf.mxu1  ;;  %v1315_v35 = vpop.f32.mrf.mxu2 }
 0x263   : > { %v4124_v7 = vadd.f32 %v1310_v19, %v1235_v33 }
 0x265   : > { %2684 = vmatmul.msk.bf16.gmra.mxu1 %vm613_vm1, %v3948_v44 }
 0x267   : > { %v1267_v42 = vpop.f32.mrf.mxu3 }
 0x26a   : > { %v1237_v15 = vpop.f32.mrf.mxu1  ;;  %v1317_v27 = vpop.f32.mrf.mxu2 }
 0x26b   : > { %v4128_v16 = vadd.f32 %v1312_v24, %v1237_v15 }
 0x26c   : > { %2676 = vmatmul.msk.bf16.gmra.mxu3 %vm613_vm1, %v3948_v44 }
 0x26f   : > { %2695 = vmatmul.msk.bf16.gmra.mxu2 %vm613_vm1, %v3815_v5  ;;  %v1330_v57 = vpop.f32.mrf.mxu3 }
 0x270   : > { %v4135_v56 = vadd.f32 %v1330_v57, %v1255_v40 }
 0x272   : > { %v1240_v32 = vpop.f32.mrf.mxu1  ;;  %v1320_v21 = vpop.f32.mrf.mxu2 }
 0x273   : > { %v4137_v2 = vadd.f32 %v1315_v35, %v1240_v32 }
 0x275   : > { %2685 = vmatmul.msk.bf16.gmra.mxu1 %vm613_vm1, %v1361_v25 }
 0x277   : > { %v1332_v13 = vpop.f32.mrf.mxu3 }
 0x278   : > { %v4143_v44 = vadd.f32 %v1332_v13, %v1257_v0  ;;  %v1363_v0 = vsel %vm1346_vm14, %v1360_v58, %v3818_v30 }
 0x27a   : > { %v1242_v50 = vpop.f32.mrf.mxu1  ;;  %v1322_v5 = vpop.f32.mrf.mxu2 }
 0x27b   : > { %v4145_v63 = vadd.f32 %v1317_v27, %v1242_v50 }
 0x27c   : > { %2677 = vmatmul.msk.bf16.gmra.mxu3 %vm613_vm1, %v1361_v25 }
 0x27f   : > { %2696 = vmatmul.msk.bf16.gmra.mxu2 %vm613_vm1, %v3981_v60  ;;  %v1335_v40 = vpop.f32.mrf.mxu3 }
 0x280   : > { %v4150_v45 = vadd.f32 %v1335_v40, %v1260_v55  ;;  %v2891_v40 = vmov 0  }
 0x281   : > { %2798 = vset.pattern.permute.xlu0 %v2891_v40  ;;  %2799 = vset.pattern.permute.xlu1 %v2891_v40 }
 0x282   : > { %v1245_v46 = vpop.f32.mrf.mxu1  ;;  %v1325_v19 = vpop.f32.mrf.mxu2  ;;  %2797 = vset.pattern.permute.xlu2 %v2891_v40  ;;  %v4543_v40 = vld [vmem:[#allocation3_spill] sm:$0xff] }
 0x283   : > { %v4152_v43 = vadd.f32 %v1320_v21, %v1245_v46 }
 0x285   : > { %2686 = vmatmul.msk.bf16.gmra.mxu1 %vm613_vm1, %v1363_v0 }
 0x287   : > { %v1337_v24 = vpop.f32.mrf.mxu3 }
 0x288   : > { %v4157_v33 = vadd.f32 %v1337_v24, %v1262_v28 }
 0x28a   : > { %v1247_v35 = vpop.f32.mrf.mxu1  ;;  %v1327_v15 = vpop.f32.mrf.mxu2 }
 0x28b   : > { %v4159_v27 = vadd.f32 %v1322_v5, %v1247_v35  ;;  %v2206_v35 = vld [vmem:[%s4199_s15 + $0x10] sm:$0xff] }
 0x28c   : > { %2678 = vmatmul.msk.bf16.gmra.mxu3 %vm613_vm1, %v1363_v0  ;;  %2234 = vperm.xlu1 %2799, %v2206_v35  }
 0x28f   : > { %2697 = vmatmul.msk.bf16.gmra.mxu2 %vm613_vm1, %v3984_v9  ;;  %v1340_v60 = vpop.f32.mrf.mxu3  ;;  %v1301_v9 = vadd.f32 %v4083_v22, %v4102_v20 }
 0x290   : > { %v4164_v55 = vadd.f32 %v1340_v60, %v1265_v8 }
 0x292   : > { %v1250_v30 = vpop.f32.mrf.mxu1  ;;  %v1650_v57 = vpop.f32.mrf.mxu2 }
 0x293   : > { %v4166_v58 = vadd.f32 %v1325_v19, %v1250_v30 }
 0x295   : > { %2687 = vmatmul.msk.bf16.gmra.mxu1 %vm613_vm1, %v3959_v41 }
 0x297   : > { %v1342_v28 = vpop.f32.mrf.mxu3 }
 0x298   : > { %v4170_v32 = vadd.f32 %v1342_v28, %v1267_v42 }
 0x29a   : > { %v1252_v21 = vpop.f32.mrf.mxu1  ;;  %v4172_v1 = vpop.f32.mrf.mxu2 }
 0x29b   : > { %v4174_v25 = vadd.f32 %v1327_v15, %v1252_v21 }
 0x29c   : > { %2679 = vmatmul.msk.bf16.gmra.mxu3 %vm613_vm1, %v3837_v48 }
 0x29f   : > { %2725 = vmatmul.msk.bf16.vlgmr.msra.gmra.mxu2 %vm613_vm1, %v3840_v14  ;;  %v1405_v8 = vpop.f32.mrf.mxu3 }
 0x2a0   : > { %v1450_v41 = vadd.f32 %v1405_v8, %v1301_v9 }
 0x2a2   : > { %v1497_v42 = vpop.f32.mrf.mxu1  ;;  %v4184_v13 = vpop.f32.mrf.mxu2 }
 0x2a3   : > { %v1542_v50 = vadd.f32 %v1497_v42, %v1450_v41 }
 0x2a5   : > { %2688 = vmatmul.msk.bf16.gmra.mxu1 %vm613_vm1, %v3962_v51  ;;  %v2205_v51 = vld [vmem:[%s4199_s15 + $0x8] sm:$0xff]  ;;  %v4225_v41 = vadd.f32 %v1650_v57, %v1542_v50 }
 0x2a6   : > { %2229 = vperm.xlu0 %2798, %v2205_v51   ;;  %v4544_v51 = vrot.slane %v4543_v40, 3  ;;  %v4546_v40 = vld [vmem:[#allocation7_spill] sm:$0xff] }
 0x2a7   : > { %v1407_v48 = vpop.f32.mrf.mxu3 }
 0x2a8   : > { %v1451_v22 = vadd.f32 %v1407_v48, %v4106_v37 }
 0x2aa   : > { %v1499_v14 = vpop.f32.mrf.mxu1  ;;  %v4192_v20 = vpop.f32.mrf.mxu2 }
 0x2ab   : > { %v1543_v5 = vadd.f32 %v1499_v14, %v1451_v22  ;;  %v2090_v22 = vrot.slane %v3338_v10, 3  ;;  %v2209_v14 = vld [vmem:[%s4199_s15 + $0x28] sm:$0xff] }
 0x2ac   : > { %2698 = vmatmul.msk.bf16.vlgmr.msrb.gmra.mxu3 %vm613_vm1, %v3791_v34  ;;  %2249 = vperm.xlu1 %2799, %v2209_v14  }
 0x2af   : > { %2726 = vmatmul.msk.bf16.gmra.mxu2 %vm613_vm1, %v3889_v39  ;;  %v1410_v37 = vpop.f32.mrf.mxu3  ;;  %v2204_v39 = vld [vmem:[%s4199_s15] sm:$0xff] }
 0x2b0   : > { %v1452_v46 = vadd.f32 %v1410_v37, %v4114_v29  ;;  %2224 = vperm.xlu2 %2797, %v2204_v39   ;;  %v4545_v39 = vld [vmem:[#allocation4_spill] sm:$0xff] }
 0x2b2   : > { %v1502_v19 = vpop.f32.mrf.mxu1  ;;  %v4207_v0 = vpop.f32.mrf.mxu2 }
 0x2b3   : > { %v1544_v24 = vadd.f32 %v1502_v19, %v1452_v46  ;;  %v2207_v19 = vld [vmem:[%s4199_s15 + $0x18] sm:$0xff] }
 0x2b5   : > { %2716 = vmatmul.msk.bf16.vlgmr.msra.gmra.mxu1 %vm613_vm1, %v3868_v3 }
 0x2b7   : > { %v1412_v34 = vpop.f32.mrf.mxu3 }
 0x2b8   : > { %v1453_v15 = vadd.f32 %v1412_v34, %v4118_v31  ;;  %2239 = vperm.xlu2 %2797, %v2207_v19   ;;  %v4248_v34 = vadd.f32 %v4184_v13, %v1544_v24 }
 0x2ba   : > { %v1504_v60 = vpop.f32.mrf.mxu1  ;;  %v4213_v30 = vpop.f32.mrf.mxu2 }
 0x2bb   : > { %v1545_v28 = vadd.f32 %v1504_v60, %v1453_v15 }
 0x2bc   : > { %2699 = vmatmul.msk.bf16.gmra.mxu3 %vm613_vm1, %v3641_v47 }
 0x2bf   : > { %2727 = vmatmul.msk.bf16.gmra.mxu2 %vm613_vm1, %v3969_v54  ;;  %v1415_v29 = vpop.f32.mrf.mxu3 }
 0x2c0   : > { %v1454_v3 = vadd.f32 %v1415_v29, %v4124_v7  ;;  %v4542_v7 = vld [vmem:[#allocation2_spill] sm:$0xff]  ;;  %v2211_v29 = vld [vmem:[%s4199_s15 + $0x38] sm:$0xff] }
 0x2c1   : > { %2259 = vperm.xlu1 %2799, %v2211_v29  }
 0x2c2   : > { %v1507_v21 = vpop.f32.mrf.mxu1  ;;  %v4221_v9 = vpop.f32.mrf.mxu2 }
 0x2c3   : > { %v1546_v31 = vadd.f32 %v1507_v21, %v1454_v3 }
 0x2c5   : > { %2717 = vmatmul.msk.bf16.gmra.mxu1 %vm613_vm1, %v3919_v49  ;;  %v2091_v49 = vsel %vm2082_vm7, %v4544_v51, %v2090_v22  ;;  %v2210_v51 = vld [vmem:[%s4199_s15 + $0x30] sm:$0xff] }
 0x2c7   : > { %v1417_v8 = vpop.f32.mrf.mxu3 }
 0x2c8   : > { %v1455_v47 = vadd.f32 %v1417_v8, %v4128_v16  ;;  %v4239_v16 = vadd.f32 %v4172_v1, %v1543_v5 }
 0x2ca   : > { %v1509_v42 = vpop.f32.mrf.mxu1  ;;  %v4228_v48 = vpop.f32.mrf.mxu2 }
 0x2cb   : > { %v1547_v54 = vadd.f32 %v1509_v42, %v1455_v47  ;;  %v2212_v47 = vld [vmem:[%s4199_s15 + $0x40] sm:$0xff] }
 0x2cc   : > { %2700 = vmatmul.msk.bf16.gmra.mxu3 %vm613_vm1, %v4542_v7  ;;  %2264 = vperm.xlu0 %2798, %v2212_v47  }
 0x2cf   : > { %2728 = vmatmul.msk.bf16.gmra.mxu2 %vm613_vm1, %v2091_v49  ;;  %v1420_v57 = vpop.f32.mrf.mxu3 }
 0x2d0   : > { %v1456_v50 = vadd.f32 %v1420_v57, %v4137_v2  ;;  %v2092_v2 = vrot.slane %v3438_v36, 3 }
 0x2d2   : > { %v1512_v10 = vpop.f32.mrf.mxu1  ;;  %v4242_v37 = vpop.f32.mrf.mxu2  ;;  %v2093_v3 = vsel %vm2082_vm7, %v2090_v22, %v2092_v2  ;;  %v4270_v22 = vadd.f32 %v4207_v0, %v1546_v31 }
 0x2d3   : > { %v1548_v46 = vadd.f32 %v1512_v10, %v1456_v50  ;;  %v4547_v50 = vld [vmem:[#allocation5_spill] sm:$0xff]  ;;  %v2214_v10 = vld [vmem:[%s4199_s15 + $0x50] sm:$0xff] }
 0x2d4   : > { %2274 = vperm.xlu1 %2799, %v2214_v10  }
 0x2d5   : > { %2718 = vmatmul.msk.bf16.gmra.mxu1 %vm613_vm1, %v4011_v18  ;;  %v2208_v18 = vld [vmem:[%s4199_s15 + $0x20] sm:$0xff] }
 0x2d6   : > { %2244 = vperm.xlu2 %2797, %v2208_v18  }
 0x2d7   : > { %v1422_v35 = vpop.f32.mrf.mxu3 }
 0x2d8   : > { %v1457_v1 = vadd.f32 %v1422_v35, %v4145_v63  ;;  %v4261_v63 = vadd.f32 %v4192_v20, %v1545_v28  ;;  %v4291_v35 = vadd.f32 %v4221_v9, %v1548_v46 }
 0x2da   : > { %v1514_v5 = vpop.f32.mrf.mxu1  ;;  %v4251_v15 = vpop.f32.mrf.mxu2 }
 0x2db   : > { %v1549_v60 = vadd.f32 %v1514_v5, %v1457_v1  ;;  %v2217_v5 = vld [vmem:[%s4199_s15 + $0x68] sm:$0xff] }
 0x2dc   : > { %2701 = vmatmul.msk.bf16.gmra.mxu3 %vm613_vm1, %v4545_v39  ;;  %2289 = vperm.xlu1 %2799, %v2217_v5  }
 0x2dd   : > { %v4305_v9 = vadd.f32 %v4228_v48, %v1549_v60 }
 0x2de   : > { %2254 = vperm.xlu2 %2797, %v2210_v51  }
 0x2df   : > { %2729 = vmatmul.msk.bf16.gmra.mxu2 %vm613_vm1, %v2093_v3  ;;  %v1425_v13 = vpop.f32.mrf.mxu3  ;;  %v4548_v3 = vld [vmem:[#allocation6_spill] sm:$0xff] }
 0x2e0   : > { %v1458_v36 = vadd.f32 %v1425_v13, %v4152_v43  ;;  %v2094_v43 = vrot.slane %v3575_v62, 3  ;;  %v2213_v13 = vld [vmem:[%s4199_s15 + $0x48] sm:$0xff] }
 0x2e2   : > { %v1517_v24 = vpop.f32.mrf.mxu1  ;;  %v4264_v21 = vpop.f32.mrf.mxu2  ;;  %v2097_v39 = vsel %vm2082_vm7, %v2094_v43, %v2096_v26  ;;  %v2218_v26 = vld [vmem:[%s4199_s15 + $0x70] sm:$0xff] }
 0x2e3   : > { %v1550_v8 = vadd.f32 %v1517_v24, %v1458_v36 }
 0x2e4   : > { %2304 = vperm.xlu1 %2799, %v2220_v61  }
 0x2e5   : > { %2719 = vmatmul.msk.bf16.gmra.mxu1 %vm613_vm1, %v4015_v59  ;;  %v2095_v59 = vsel %vm2082_vm7, %v2092_v2, %v2094_v43  ;;  %v2215_v2 = vld [vmem:[%s4199_s15 + $0x58] sm:$0xff]  ;;  %v4316_v48 = vadd.f32 %v4242_v37, %v1550_v8 }
 0x2e6   : > { %2279 = vperm.xlu0 %2798, %v2215_v2   ;;  %2269 = vperm.xlu2 %2797, %v2213_v13  }
 0x2e7   : > { %v1427_v42 = vpop.f32.mrf.mxu3 }
 0x2e8   : > { %v1459_v7 = vadd.f32 %v1427_v42, %v4159_v27  ;;  %v4282_v27 = vadd.f32 %v4213_v30, %v1547_v54  ;;  %v2221_v42 = vld [vmem:[%s4199_s15 + $0x88] sm:$0xff] }
 0x2ea   : > { %v1519_v20 = vpop.f32.mrf.mxu1  ;;  %v4273_v28 = vpop.f32.mrf.mxu2 }
 0x2eb   : > { %v1551_v14 = vadd.f32 %v1519_v20, %v1459_v7  ;;  %v2216_v7 = vld [vmem:[%s4199_s15 + $0x60] sm:$0xff]  ;;  %v1865_v20 = vpop.f32.mrf.mxu0 }
 0x2ec   : > { %2702 = vmatmul.msk.bf16.gmra.mxu3 %vm613_vm1, %v4546_v40 }
 0x2ed   : > { %v4328_v8 = vadd.f32 %v4251_v15, %v1551_v14 }
 0x2ee   : > { %2294 = vperm.xlu0 %2798, %v2218_v26   ;;  %2284 = vperm.xlu2 %2797, %v2216_v7  }
 0x2ef   : > { %2730 = vmatmul.msk.bf16.gmra.mxu2 %vm613_vm1, %v2095_v59  ;;  %v1430_v0 = vpop.f32.mrf.mxu3 }
 0x2f0   : > { %v1460_v31 = vadd.f32 %v1430_v0, %v4166_v58 }
 0x2f2   : > { %v1522_v49 = vpop.f32.mrf.mxu1  ;;  %v4285_v62 = vpop.f32.mrf.mxu2 }
 0x2f3   : > { %v1552_v57 = vadd.f32 %v1522_v49, %v1460_v31 }
 0x2f5   : > { %2720 = vmatmul.msk.bf16.gmra.mxu1 %vm613_vm1, %v4547_v50  ;;  %v4337_v0 = vadd.f32 %v4264_v21, %v1552_v57 }
 0x2f6   : > { %2309 = vperm.xlu0 %2798, %v2221_v42  }
 0x2f7   : > { %v1432_v19 = vpop.f32.mrf.mxu3 }
 0x2f8   : > { %v1461_v1 = vadd.f32 %v1432_v19, %v4174_v25 }
 0x2fa   : > { %v1524_v30 = vpop.f32.mrf.mxu1  ;;  %v4294_v54 = vpop.f32.mrf.mxu2 }
 0x2fb   : > { %v1553_v58 = vadd.f32 %v1524_v30, %v1461_v1 }
 0x2fc   : > { %2703 = vmatmul.msk.bf16.gmra.mxu3 %vm613_vm1, %v4038_v4 }
 0x2fd   : > { %v4347_v49 = vadd.f32 %v4273_v28, %v1553_v58 }
 0x2ff   : > { %2731 = vmatmul.msk.bf16.gmra.mxu2 %vm613_vm1, %v2097_v39  ;;  %v1435_v25 = vpop.f32.mrf.mxu3 }
 0x300   : > { %v1462_v46 = vadd.f32 %v1435_v25, %v4135_v56 }
 0x302   : > { %v1527_v29 = vpop.f32.mrf.mxu1  ;;  %v4308_v18 = vpop.f32.mrf.mxu2 }
 0x303   : > { %v1554_v4 = vadd.f32 %v1527_v29, %v1462_v46 }
 0x305   : > { %2721 = vmatmul.msk.bf16.gmra.mxu1 %vm613_vm1, %v4548_v3  ;;  %v4353_v1 = vadd.f32 %v4285_v62, %v1554_v4 }
 0x307   : > { %v1437_v36 = vpop.f32.mrf.mxu3 }
 0x308   : > { %v1463_v56 = vadd.f32 %v1437_v36, %v4143_v44 }
 0x30a   : > { %v1529_v60 = vpop.f32.mrf.mxu1  ;;  %v4319_v24 = vpop.f32.mrf.mxu2 }
 0x30b   : > { %v1555_v47 = vadd.f32 %v1529_v60, %v1463_v56 }
 0x30c   : > { %2704 = vmatmul.msk.bf16.gmra.mxu3 %vm613_vm1, %v4063_v53  ;;  %v2219_v53 = vld [vmem:[%s4199_s15 + $0x78] sm:$0xff] }
 0x30d   : > { %2299 = vperm.xlu2 %2797, %v2219_v53   ;;  %v4361_v58 = vadd.f32 %v4294_v54, %v1555_v47 }
 0x30f   : > { %2732 = vmatmul.msk.bf16.gmra.mxu2 %vm613_vm1, %v4032_v38  ;;  %v1440_v37 = vpop.f32.mrf.mxu3  ;;  %v1867_v38 = vpop.f32.mrf.mxu0 }
 0x310   : > { %v1464_v44 = vadd.f32 %v1440_v37, %v4150_v45 }
 0x312   : > { %v1532_v43 = vpop.f32.mrf.mxu1  ;;  %v4331_v40 = vpop.f32.mrf.mxu2 }
 0x313   : > { %v1556_v51 = vadd.f32 %v1532_v43, %v1464_v44 }
 0x315   : > { %2722 = vmatmul.msk.bf16.gmra.mxu1 %vm613_vm1, %v4021_v52  ;;  %v4372_v4 = vadd.f32 %v4308_v18, %v1556_v51 }
 0x317   : > { %v1442_v59 = vpop.f32.mrf.mxu3  ;;  %v1870_v10 = vpop.f32.mrf.mxu0 }
 0x318   : > { %v1465_v31 = vadd.f32 %v1442_v59, %v4157_v33  ;;  %v2230_v60 = vpop.permute.xlu0 %2229 }
 0x31a   : > { %v1534_v15 = vpop.f32.mrf.mxu1  ;;  %v4340_v14 = vpop.f32.mrf.mxu2 }
 0x31b   : > { %v1557_v45 = vadd.f32 %v1534_v15, %v1465_v31  ;;  %v2235_v15 = vpop.permute.xlu1 %2234 }
 0x31c   : > { %2705 = vmatmul.msk.bf16.gmra.mxu3 %vm613_vm1, %v4078_v23 }
 0x31d   : > { %v4384_v7 = vadd.f32 %v4319_v24, %v1557_v45 }
 0x31f   : > { %2733 = vmatmul.msk.bf16.gmra.mxu2 %vm613_vm1, %v4086_v12  ;;  %v1445_v52 = vpop.f32.mrf.mxu3  ;;  %v1872_v28 = vpop.f32.mrf.mxu0 }
 0x320   : > { %v1466_v21 = vadd.f32 %v1445_v52, %v4164_v55 }
 0x322   : > { %v1537_v57 = vpop.f32.mrf.mxu1  ;;  %v2141_v50 = vpop.f32.mrf.mxu2 }
 0x323   : > { %v1558_v33 = vadd.f32 %v1537_v57, %v1466_v21 }
 0x325   : > { %2723 = vmatmul.msk.bf16.gmra.mxu1 %vm613_vm1, %v4045_v17  ;;  %v4391_v57 = vadd.f32 %v4331_v40, %v1558_v33 }
 0x327   : > { %v1447_v19 = vpop.f32.mrf.mxu3  ;;  %v1875_v46 = vpop.f32.mrf.mxu0 }
 0x328   : > { %v1467_v23 = vadd.f32 %v1447_v19, %v4170_v32  ;;  %v2225_v32 = vpop.permute.xlu2 %2224 }
 0x32a   : > { %v1539_v12 = vpop.f32.mrf.mxu1  ;;  %v2143_v30 = vpop.f32.mrf.mxu2 }
 0x32b   : > { %v4356_v5 = vadd.f32 %v1539_v12, %v1467_v23 }
 0x32c   : > { %2706 = vmatmul.msk.bf16.gmra.mxu3 %vm613_vm1, %v4000_v11  ;;  %v4369_v11 = vld [vmem:[%s4483_s6] ss:$0 sm:$0xff] }
 0x32f   : > { %v1773_v55 = vpop.f32.mrf.mxu3 }
 0x330   : > { %v1818_v17 = vadd.f32 %v1773_v55, %v4225_v41  ;;  %v2240_v55 = vpop.permute.xlu2 %2239 }
 0x332   : > { %v2018_v2 = vpop.f32.mrf.mxu1  ;;  %v2146_v39 = vpop.f32.mrf.mxu2  ;;  %v1910_v62 = vadd.f32 %v1865_v20, %v1818_v17 }
 0x333   : > { %v1877_v20 = vpop.f32.mrf.mxu0 }
 0x334   : > { %v2063_v25 = vadd.f32 %v2018_v2, %v1910_v62 }
 0x335   : > { %2724 = vmatmul.msk.bf16.gmra.mxu1 %vm613_vm1, %v4091_v6 }
 0x336   : > { %v2186_v29 = vadd.f32 %v2141_v50, %v2063_v25 }
 0x337   : > { %v1775_v54 = vpop.f32.mrf.mxu3 }
 0x338   : > { %v1819_v41 = vadd.f32 %v1775_v54, %v4239_v16  ;;  %v2312_v3 = vadd.f32 %v2225_v32, %v2186_v29 }
 0x33a   : > { %v2020_v61 = vpop.f32.mrf.mxu1  ;;  %v2148_v26 = vpop.f32.mrf.mxu2  ;;  %v2334_v6 = vadd.f32 %v4369_v11, %v2312_v3  ;;  %v1911_v13 = vadd.f32 %v1867_v38, %v1819_v41 }
 0x33c   : > { %vm2352_vm1 = vcmp.ge.f32.partialorder %v2334_v6, 0.0  ;;  %v2370_v36 = vmul.f32 0.2, %v2334_v6  ;;  %v2064_v56 = vadd.f32 %v2020_v61, %v1911_v13 }
 0x33e   : > { %v2388_v18 = vsel %vm2352_vm1, %v2334_v6, %v2370_v36  ;;  %v2187_v16 = vadd.f32 %v2143_v30, %v2064_v56  ;;  %v2245_v6 = vpop.permute.xlu2 %2244 }
 0x33f   : > { %v2406_v47 = vmul.f32 1.4142135, %v2388_v18  ;;  %v1778_v42 = vpop.f32.mrf.mxu3 }
 0x340   : > { %v2313_v37 = vadd.f32 %v2230_v60, %v2187_v16  ;;  %v1820_v44 = vadd.f32 %v1778_v42, %v4248_v34 }
 0x341   : > { %2425 = vst.msk [vmem:[%s4381_s20] sm:$0xff] %vm2424_vm12, %v2406_v47 }
 0x342   : > { %v2023_v43 = vpop.f32.mrf.mxu1  ;;  %v2151_v51 = vpop.f32.mrf.mxu2  ;;  %v2335_v53 = vadd.f32 %v4369_v11, %v2313_v37  ;;  %v1912_v59 = vadd.f32 %v1870_v10, %v1820_v44 }
 0x343   : > { %v1880_v10 = vpop.f32.mrf.mxu0  ;;  %v2250_v37 = vpop.permute.xlu1 %2249 }
 0x344   : > { %vm2353_vm15 = vcmp.ge.f32.partialorder %v2335_v53, 0.0  ;;  %v2371_v38 = vmul.f32 0.2, %v2335_v53  ;;  %v2065_v31 = vadd.f32 %v2023_v43, %v1912_v59 }
 0x346   : > { %v2389_v52 = vsel %vm2353_vm15, %v2335_v53, %v2371_v38  ;;  %v2188_v21 = vadd.f32 %v2146_v39, %v2065_v31 }
 0x347   : > { %v2407_v24 = vmul.f32 1.4142135, %v2389_v52  ;;  %v1780_v45 = vpop.f32.mrf.mxu3 }
 0x348   : > { %v2314_v34 = vadd.f32 %v2235_v15, %v2188_v21  ;;  %v1821_v50 = vadd.f32 %v1780_v45, %v4261_v63  ;;  %v4399_v63 = vadd.f32 %v4340_v14, %v4356_v5  ;;  %v2255_v45 = vpop.permute.xlu2 %2254 }
 0x349   : > { %2426 = vst.msk [vmem:[%s4381_s20 + $0x8] sm:$0xff] %vm2424_vm12, %v2407_v24 }
 0x34a   : > { %v2025_v19 = vpop.f32.mrf.mxu1  ;;  %v2153_v23 = vpop.f32.mrf.mxu2  ;;  %v2336_v12 = vadd.f32 %v4369_v11, %v2314_v34  ;;  %v1913_v30 = vadd.f32 %v1872_v28, %v1821_v50 }
 0x34b   : > { %v1882_v3 = vpop.f32.mrf.mxu0 }
 0x34c   : > { %vm2354_vm11 = vcmp.ge.f32.partialorder %v2336_v12, 0.0  ;;  %v2372_v17 = vmul.f32 0.2, %v2336_v12  ;;  %v2066_v2 = vadd.f32 %v2025_v19, %v1913_v30 }
 0x34e   : > { %v2390_v39 = vsel %vm2354_vm11, %v2336_v12, %v2372_v17  ;;  %v2189_v62 = vadd.f32 %v2148_v26, %v2066_v2 }
 0x34f   : > { %v2408_v40 = vmul.f32 1.4142135, %v2390_v39  ;;  %v1783_v33 = vpop.f32.mrf.mxu3 }
 0x350   : > { %v1822_v25 = vadd.f32 %v1783_v33, %v4270_v22  ;;  %v2315_v32 = vadd.f32 %v2240_v55, %v2189_v62 }
 0x351   : > { %2427 = vst.msk [vmem:[%s4381_s20 + $0x10] sm:$0xff] %vm2424_vm12, %v2408_v40  ;;  %v2260_v40 = vpop.permute.xlu1 %2259 }
 0x352   : > { %v2028_v29 = vpop.f32.mrf.mxu1  ;;  %v2156_v28 = vpop.f32.mrf.mxu2  ;;  %v2337_v54 = vadd.f32 %v4369_v11, %v2315_v32  ;;  %v1914_v41 = vadd.f32 %v1875_v46, %v1822_v25 }
 0x353   : > { %v1885_v44 = vpop.f32.mrf.mxu0 }
 0x354   : > { %vm2355_vm13 = vcmp.ge.f32.partialorder %v2337_v54, 0.0  ;;  %v2373_v61 = vmul.f32 0.2, %v2337_v54  ;;  %v2067_v26 = vadd.f32 %v2028_v29, %v1914_v41 }
 0x356   : > { %v2391_v13 = vsel %vm2355_vm13, %v2337_v54, %v2373_v61  ;;  %v2190_v36 = vadd.f32 %v2151_v51, %v2067_v26 }
 0x357   : > { %v2409_v14 = vmul.f32 1.4142135, %v2391_v13  ;;  %v1785_v5 = vpop.f32.mrf.mxu3  ;;  %v2265_v13 = vpop.permute.xlu0 %2264 }
 0x358   : > { %v1823_v22 = vadd.f32 %v1785_v5, %v4282_v27  ;;  %v2316_v56 = vadd.f32 %v2245_v6, %v2190_v36 }
 0x359   : > { %2428 = vst.msk [vmem:[%s4381_s20 + $0x18] sm:$0xff] %vm2424_vm12, %v2409_v14 }
 0x35a   : > { %v2030_v60 = vpop.f32.mrf.mxu1  ;;  %v2158_v18 = vpop.f32.mrf.mxu2  ;;  %v2338_v16 = vadd.f32 %v4369_v11, %v2316_v56  ;;  %v1915_v46 = vadd.f32 %v1877_v20, %v1823_v22 }
 0x35b   : > { %v1887_v12 = vpop.f32.mrf.mxu0 }
 0x35c   : > { %vm2356_vm14 = vcmp.ge.f32.partialorder %v2338_v16, 0.0  ;;  %v2374_v47 = vmul.f32 0.2, %v2338_v16  ;;  %v2068_v42 = vadd.f32 %v2030_v60, %v1915_v46 }
 0x35e   : > { %v2392_v43 = vsel %vm2356_vm14, %v2338_v16, %v2374_v47  ;;  %v2191_v51 = vadd.f32 %v2153_v23, %v2068_v42 }
 0x35f   : > { %v2410_v53 = vmul.f32 1.4142135, %v2392_v43  ;;  %v1788_v59 = vpop.f32.mrf.mxu3 }
 0x360   : > { %v2317_v38 = vadd.f32 %v2250_v37, %v2191_v51  ;;  %v1824_v27 = vadd.f32 %v1788_v59, %v4291_v35 }
 0x361   : > { %2429 = vst.msk [vmem:[%s4381_s20 + $0x20] sm:$0xff] %vm2424_vm12, %v2410_v53 }
 0x362   : > { %v2033_v31 = vpop.f32.mrf.mxu1  ;;  %v2339_v15 = vadd.f32 %v4369_v11, %v2317_v38  ;;  %v1916_v52 = vadd.f32 %v1880_v10, %v1824_v27  ;;  %v2161_v20 = vpop.f32.mrf.mxu2 }
 0x363   : > { %v1890_v41 = vpop.f32.mrf.mxu0 }
 0x364   : > { %vm2357_vm0 = vcmp.ge.f32.partialorder %v2339_v15, 0.0  ;;  %v2375_v21 = vmul.f32 0.2, %v2339_v15  ;;  %v2069_v24 = vadd.f32 %v2033_v31, %v1916_v52 }
 0x366   : > { %v2393_v34 = vsel %vm2357_vm0, %v2339_v15, %v2375_v21  ;;  %v2192_v50 = vadd.f32 %v2156_v28, %v2069_v24  ;;  %v2275_v24 = vpop.permute.xlu1 %2274 }
 0x367   : > { %v2411_v19 = vmul.f32 1.4142135, %v2393_v34  ;;  %v1790_v23 = vpop.f32.mrf.mxu3 }
 0x368   : > { %v1825_v30 = vadd.f32 %v1790_v23, %v4305_v9  ;;  %v2318_v35 = vadd.f32 %v2255_v45, %v2192_v50 }
 0x369   : > { %2430 = vst.msk [vmem:[%s4381_s20 + $0x28] sm:$0xff] %vm2424_vm12, %v2411_v19 }
 0x36a   : > { %v2035_v55 = vpop.f32.mrf.mxu1  ;;  %v2340_v17 = vadd.f32 %v4369_v11, %v2318_v35  ;;  %v1917_v10 = vadd.f32 %v1882_v3, %v1825_v30  ;;  %v2163_v62 = vpop.f32.mrf.mxu2 }
 0x36b   : > { %v1892_v47 = vpop.f32.mrf.mxu0 }
 0x36c   : > { %vm2358_vm2 = vcmp.ge.f32.partialorder %v2340_v17, 0.0  ;;  %v2376_v2 = vmul.f32 0.2, %v2340_v17  ;;  %v2070_v39 = vadd.f32 %v2035_v55, %v1917_v10 }
 0x36e   : > { %v2394_v33 = vsel %vm2358_vm2, %v2340_v17, %v2376_v2  ;;  %v2193_v25 = vadd.f32 %v2158_v18, %v2070_v39  ;;  %v2280_v39 = vpop.permute.xlu0 %2279 }
 0x36f   : > { %v2412_v32 = vmul.f32 1.4142135, %v2394_v33  ;;  %v1793_v29 = vpop.f32.mrf.mxu3 }
 0x370   : > { %v2319_v28 = vadd.f32 %v2260_v40, %v2193_v25  ;;  %v1826_v9 = vadd.f32 %v1793_v29, %v4316_v48 }
 0x371   : > { %2431 = vst.msk [vmem:[%s4381_s20 + $0x30] sm:$0xff] %vm2424_vm12, %v2412_v32 }
 0x372   : > { %v2038_v54 = vpop.f32.mrf.mxu1  ;;  %v2341_v61 = vadd.f32 %v4369_v11, %v2319_v28  ;;  %v1918_v3 = vadd.f32 %v1885_v44, %v1826_v9  ;;  %v2166_v22 = vpop.f32.mrf.mxu2 }
 0x373   : > { %v2270_v44 = vpop.permute.xlu2 %2269  ;;  %v1895_v45 = vpop.f32.mrf.mxu0 }
 0x374   : > { %vm2359_vm4 = vcmp.ge.f32.partialorder %v2341_v61, 0.0  ;;  %v2377_v26 = vmul.f32 0.2, %v2341_v61  ;;  %v2071_v6 = vadd.f32 %v2038_v54, %v1918_v3 }
 0x376   : > { %v2395_v36 = vsel %vm2359_vm4, %v2341_v61, %v2377_v26  ;;  %v2194_v14 = vadd.f32 %v2161_v20, %v2071_v6 }
 0x377   : > { %v2413_v5 = vmul.f32 1.4142135, %v2395_v36  ;;  %v1795_v56 = vpop.f32.mrf.mxu3 }
 0x378   : > { %v2320_v60 = vadd.f32 %v2265_v13, %v2194_v14  ;;  %v1827_v48 = vadd.f32 %v1795_v56, %v4328_v8 }
 0x379   : > { %2432 = vst.msk [vmem:[%s4381_s20 + $0x38] sm:$0xff] %vm2424_vm12, %v2413_v5 }
 0x37a   : > { %v2040_v18 = vpop.f32.mrf.mxu1  ;;  %v2342_v16 = vadd.f32 %v4369_v11, %v2320_v60  ;;  %v1919_v46 = vadd.f32 %v1887_v12, %v1827_v48  ;;  %v2168_v8 = vpop.f32.mrf.mxu2 }
 0x37b   : > { %v1897_v32 = vpop.f32.mrf.mxu0  ;;  %v2285_v13 = vpop.permute.xlu2 %2284 }
 0x37c   : > { %vm2360_vm5 = vcmp.ge.f32.partialorder %v2342_v16, 0.0  ;;  %v2378_v42 = vmul.f32 0.2, %v2342_v16  ;;  %v2072_v37 = vadd.f32 %v2040_v18, %v1919_v46  ;;  %v2290_v46 = vpop.permute.xlu1 %2289 }
 0x37e   : > { %v2396_v43 = vsel %vm2360_vm5, %v2342_v16, %v2378_v42  ;;  %v2195_v51 = vadd.f32 %v2163_v62, %v2072_v37 }
 0x37f   : > { %v2414_v53 = vmul.f32 1.4142135, %v2396_v43  ;;  %v1798_v59 = vpop.f32.mrf.mxu3 }
 0x380   : > { %v1828_v38 = vadd.f32 %v1798_v59, %v4337_v0  ;;  %v2321_v27 = vadd.f32 %v2270_v44, %v2195_v51 }
 0x381   : > { %2433 = vst.msk [vmem:[%s4381_s20 + $0x40] sm:$0xff] %vm2424_vm12, %v2414_v53 }
 0x382   : > { %v2043_v31 = vpop.f32.mrf.mxu1  ;;  %v2343_v15 = vadd.f32 %v4369_v11, %v2321_v27  ;;  %v1920_v52 = vadd.f32 %v1890_v41, %v1828_v38  ;;  %v2171_v17 = vpop.f32.mrf.mxu2 }
 0x383   : > { %v1900_v56 = vpop.f32.mrf.mxu0 }
 0x384   : > { %vm2361_vm6 = vcmp.ge.f32.partialorder %v2343_v15, 0.0  ;;  %v2379_v20 = vmul.f32 0.2, %v2343_v15  ;;  %v2073_v21 = vadd.f32 %v2043_v31, %v1920_v52 }
 0x386   : > { %v2397_v34 = vsel %vm2361_vm6, %v2343_v15, %v2379_v20  ;;  %v2196_v50 = vadd.f32 %v2166_v22, %v2073_v21  ;;  %v2295_v20 = vpop.permute.xlu0 %2294 }
 0x387   : > { %v2415_v19 = vmul.f32 1.4142135, %v2397_v34  ;;  %v1800_v23 = vpop.f32.mrf.mxu3 }
 0x388   : > { %v2322_v12 = vadd.f32 %v2275_v24, %v2196_v50  ;;  %v1829_v0 = vadd.f32 %v1800_v23, %v4347_v49 }
 0x389   : > { %2434 = vst.msk [vmem:[%s4381_s20 + $0x48] sm:$0xff] %vm2424_vm12, %v2415_v19 }
 0x38a   : > { %v2045_v30 = vpop.f32.mrf.mxu1  ;;  %v2344_v35 = vadd.f32 %v4369_v11, %v2322_v12  ;;  %v1921_v55 = vadd.f32 %v1892_v47, %v1829_v0  ;;  %v2173_v3 = vpop.f32.mrf.mxu2 }
 0x38b   : > { %v1902_v27 = vpop.f32.mrf.mxu0 }
 0x38c   : > { %vm2362_vm7 = vcmp.ge.f32.partialorder %v2344_v35, 0.0  ;;  %v2380_v10 = vmul.f32 0.2, %v2344_v35  ;;  %v2074_v2 = vadd.f32 %v2045_v30, %v1921_v55 }
 0x38e   : > { %v2398_v62 = vsel %vm2362_vm7, %v2344_v35, %v2380_v10  ;;  %v2197_v40 = vadd.f32 %v2168_v8, %v2074_v2 }
 0x38f   : > { %v2416_v33 = vmul.f32 1.4142135, %v2398_v62  ;;  %v1803_v25 = vpop.f32.mrf.mxu3 }
 0x390   : > { %v2323_v29 = vadd.f32 %v2280_v39, %v2197_v40  ;;  %v1830_v49 = vadd.f32 %v1803_v25, %v4353_v1 }
 0x391   : > { %2435 = vst.msk [vmem:[%s4381_s20 + $0x50] sm:$0xff] %vm2424_vm12, %v2416_v33 }
 0x392   : > { %v2048_v28 = vpop.f32.mrf.mxu1  ;;  %v2345_v9 = vadd.f32 %v4369_v11, %v2323_v29  ;;  %v1922_v54 = vadd.f32 %v1895_v45, %v1830_v49  ;;  %v2176_v44 = vpop.f32.mrf.mxu2 }
 0x393   : > { %v1905_v30 = vpop.f32.mrf.mxu0 }
 0x394   : > { %vm2363_vm8 = vcmp.ge.f32.partialorder %v2345_v9, 0.0  ;;  %v2381_v41 = vmul.f32 0.2, %v2345_v9  ;;  %v2075_v61 = vadd.f32 %v2048_v28, %v1922_v54 }
 0x396   : > { %v2399_v26 = vsel %vm2363_vm8, %v2345_v9, %v2381_v41  ;;  %v2198_v6 = vadd.f32 %v2171_v17, %v2075_v61  ;;  %v2300_v17 = vpop.permute.xlu2 %2299  ;;  %v2305_v9 = vpop.permute.xlu1 %2304 }
 0x397   : > { %v2417_v36 = vmul.f32 1.4142135, %v2399_v26  ;;  %v1805_v14 = vpop.f32.mrf.mxu3 }
 0x398   : > { %v2324_v5 = vadd.f32 %v2285_v13, %v2198_v6  ;;  %v1831_v22 = vadd.f32 %v1805_v14, %v4361_v58 }
 0x399   : > { %2436 = vst.msk [vmem:[%s4381_s20 + $0x58] sm:$0xff] %vm2424_vm12, %v2417_v36 }
 0x39a   : > { %v2050_v1 = vpop.f32.mrf.mxu1  ;;  %v2346_v60 = vadd.f32 %v4369_v11, %v2324_v5  ;;  %v1923_v48 = vadd.f32 %v1897_v32, %v1831_v22 }
 0x39c   : > { %vm2364_vm3 = vcmp.ge.f32.partialorder %v2346_v60, 0.0  ;;  %v2382_v18 = vmul.f32 0.2, %v2346_v60  ;;  %v2076_v16 = vadd.f32 %v2050_v1, %v1923_v48 }
 0x39e   : > { %v2400_v47 = vsel %vm2364_vm3, %v2346_v60, %v2382_v18  ;;  %v2199_v42 = vadd.f32 %v2173_v3, %v2076_v16  ;;  %v1907_v3 = vpop.f32.mrf.mxu0 }
 0x39f   : > { %v2418_v37 = vmul.f32 1.4142135, %v2400_v47  ;;  %v1808_v43 = vpop.f32.mrf.mxu3 }
 0x3a0   : > { %v2325_v51 = vadd.f32 %v2290_v46, %v2199_v42  ;;  %v1832_v58 = vadd.f32 %v1808_v43, %v4372_v4  ;;  %v2178_v4 = vpop.f32.mrf.mxu2 }
 0x3a1   : > { %2437 = vst.msk [vmem:[%s4381_s20 + $0x60] sm:$0xff] %vm2424_vm12, %v2418_v37 }
 0x3a2   : > { %v2053_v53 = vpop.f32.mrf.mxu1  ;;  %v2347_v59 = vadd.f32 %v4369_v11, %v2325_v51  ;;  %v1924_v38 = vadd.f32 %v1900_v56, %v1832_v58  ;;  %v2310_v56 = vpop.permute.xlu0 %2309 }
 0x3a4   : > { %vm2365_vm9 = vcmp.ge.f32.partialorder %v2347_v59, 0.0  ;;  %v2383_v8 = vmul.f32 0.2, %v2347_v59  ;;  %v2077_v31 = vadd.f32 %v2053_v53, %v1924_v38 }
 0x3a6   : > { %v2401_v15 = vsel %vm2365_vm9, %v2347_v59, %v2383_v8  ;;  %v2200_v52 = vadd.f32 %v2176_v44, %v2077_v31 }
 0x3a7   : > { %v2419_v21 = vmul.f32 1.4142135, %v2401_v15  ;;  %v1810_v24 = vpop.f32.mrf.mxu3 }
 0x3a8   : > { %v2326_v45 = vadd.f32 %v2295_v20, %v2200_v52  ;;  %v1833_v34 = vadd.f32 %v1810_v24, %v4384_v7  ;;  %v2181_v25 = vpop.f32.mrf.mxu2 }
 0x3a9   : > { %2438 = vst.msk [vmem:[%s4381_s20 + $0x68] sm:$0xff] %vm2424_vm12, %v2419_v21 }
 0x3aa   : > { %v2055_v50 = vpop.f32.mrf.mxu1  ;;  %v2348_v19 = vadd.f32 %v4369_v11, %v2326_v45  ;;  %v1925_v23 = vadd.f32 %v1902_v27, %v1833_v34 }
 0x3ac   : > { %vm2366_vm10 = vcmp.ge.f32.partialorder %v2348_v19, 0.0  ;;  %v2384_v12 = vmul.f32 0.2, %v2348_v19  ;;  %v2078_v0 = vadd.f32 %v2055_v50, %v1925_v23 }
 0x3ae   : > { %v2402_v35 = vsel %vm2366_vm10, %v2348_v19, %v2384_v12  ;;  %v2201_v55 = vadd.f32 %v2178_v4, %v2078_v0 }
 0x3af   : > { %v2420_v10 = vmul.f32 1.4142135, %v2402_v35  ;;  %v1813_v2 = vpop.f32.mrf.mxu3 }
 0x3b0   : > { %v2327_v39 = vadd.f32 %v2300_v17, %v2201_v55  ;;  %v1834_v7 = vadd.f32 %v1813_v2, %v4391_v57  ;;  %v2183_v5 = vpop.f32.mrf.mxu2 }
 0x3b1   : > { %2439 = vst.msk [vmem:[%s4381_s20 + $0x70] sm:$0xff] %vm2424_vm12, %v2420_v10 }
 0x3b2   : > { %v2058_v62 = vpop.f32.mrf.mxu1  ;;  %v2349_v40 = vadd.f32 %v4369_v11, %v2327_v39  ;;  %v1926_v33 = vadd.f32 %v1905_v30, %v1834_v7 }
 0x3b4   : > { %vm2367_vm1 = vcmp.ge.f32.partialorder %v2349_v40, 0.0  ;;  %v2385_v32 = vmul.f32 0.2, %v2349_v40  ;;  %v2079_v29 = vadd.f32 %v2058_v62, %v1926_v33 }
 0x3b6   : > { %v2403_v49 = vsel %vm2367_vm1, %v2349_v40, %v2385_v32  ;;  %v2202_v28 = vadd.f32 %v2181_v25, %v2079_v29 }
 0x3b7   : > { %v2421_v54 = vmul.f32 1.4142135, %v2403_v49  ;;  %v1815_v41 = vpop.f32.mrf.mxu3 }
 0x3b8   : > { %v2328_v61 = vadd.f32 %v2305_v9, %v2202_v28  ;;  %v1835_v57 = vadd.f32 %v1815_v41, %v4399_v63 }
 0x3b9   : > { %2440 = vst.msk [vmem:[%s4381_s20 + $0x78] sm:$0xff] %vm2424_vm12, %v2421_v54 }
 0x3ba   : > { %v2350_v26 = vadd.f32 %v4369_v11, %v2328_v61  ;;  %v1927_v6 = vadd.f32 %v1907_v3, %v1835_v57  ;;  %v2060_v13 = vpop.f32.mrf.mxu1 }
 0x3bc   : > { %vm2368_vm15 = vcmp.ge.f32.partialorder %v2350_v26, 0.0  ;;  %v2386_v36 = vmul.f32 0.2, %v2350_v26  ;;  %v2080_v14 = vadd.f32 %v2060_v13, %v1927_v6 }
 0x3be   : > { %v2404_v22 = vsel %vm2368_vm15, %v2350_v26, %v2386_v36  ;;  %v2203_v1 = vadd.f32 %v2183_v5, %v2080_v14 }
 0x3bf   : > { %v2422_v60 = vmul.f32 1.4142135, %v2404_v22 }
 0x3c0   : > { %v2329_v48 = vadd.f32 %v2310_v56, %v2203_v1 }
 0x3c1   : > { %2441 = vst.msk [vmem:[%s4381_s20 + $0x80] sm:$0xff] %vm2424_vm12, %v2422_v60 }
 0x3c2   : > { %v2351_v63 = vadd.f32 %v4369_v11, %v2329_v48 }
 0x3c4   : > { %vm2369_vm11 = vcmp.ge.f32.partialorder %v2351_v63, 0.0  ;;  %v2387_v18 = vmul.f32 0.2, %v2351_v63 }
 0x3c6   : > { %v2405_v16 = vsel %vm2369_vm11, %v2351_v63, %v2387_v18 }
 0x3c7   : > { %v2423_v46 = vmul.f32 1.4142135, %v2405_v16 }
 0x3c9   : > { %2442 = vst.msk [vmem:[%s4381_s20 + $0x88] sm:$0xff] %vm2424_vm12, %v2423_v46 }
 0x3ca PF: > { %s17_s28 = sadd.s32 1, %s2888_s28   ;;  %s4549_s24 = smov %s2880_s26 }
 0x3cb   : > { %p14_p7 = scmp.ge.s32.totalorder %s17_s28, 6   ;;  %s4550_s25 = smov %s2884_s27 }
 0x3cc   : > { %s4551_s26 = smov %s4554_s29  ;;  %s4552_s27 = smov %s4558_s30 }
 0x3cd   :  { %16 = sbr.rel (!%p14_p7) target bundleno = 3 (0x3), region = 84 }

</bundles_post_ra>
